<compile_context>
chip_gen: v6e
topology: v6e:2x2x1
jax: 0.10.0
libtpu: 0.0.40
codegen_flags: <defaults>
</compile_context>

<pallas_src>
import functools
import math

import jax
import jax.numpy as jnp
from jax.experimental import pallas as pl
from jax.experimental.pallas import tpu as pltpu


# ----------------------------------------------------------------------------
# In-kernel helpers (pure value ops on VMEM-resident tiles)
# ----------------------------------------------------------------------------
def _shift_flat(x, d):
    """y[:, f] = x[:, f + d] on the flattened spatial axis, zero-filled where
    f + d falls outside [0, HW).  Lowers to static lane slices + a concat
    (no MXU work)."""
    if d == 0:
        return x
    c, hw = x.shape
    pad = jnp.zeros((c, abs(d)), x.dtype)
    if d > 0:
        return jnp.concatenate([x[:, d:], pad], axis=1)
    return jnp.concatenate([pad, x[:, :hw + d]], axis=1)


def _col_masks(W, hw):
    """Lane-validity masks for the dj = -1 / +1 conv taps ('same' padding).
    The row (di) boundary is handled by the zero fill of the flat shift."""
    w_idx = jax.lax.broadcasted_iota(jnp.int32, (1, hw), 1) % W
    return w_idx >= 1, w_idx <= W - 2


def _conv3x3(x, w_ref, W, masks):
    """3x3 'same' conv on channel-major, flat-spatial activations.

    x: (Cin, HW) f32 value.  w_ref: (Cout, 9*Cin) bf16 ref, packed tap-major
    (ki, kj) with input channel fastest (see pack3x3).  The 9 taps are built
    from the VMEM-resident tile with static lane shifts + border masks and
    contracted with ONE MXU matmul of depth K = 9*Cin (f32 accumulation).
    """
    cin, hw = x.shape
    cout = w_ref.shape[0]
    left_ok, right_ok = masks
    cols = [jnp.where(left_ok, _shift_flat(x, -1), 0.0),    # kj = 0  (w-1)
            x,                                              # kj = 1
            jnp.where(right_ok, _shift_flat(x, 1), 0.0)]    # kj = 2  (w+1)

    if cin == 1:
        # First layer (in_channels == 1): a K=9 contraction is MXU waste, do
        # the 9-term outer-product accumulate on the VPU instead.
        w = w_ref[...].astype(jnp.float32)                  # (Cout, 9)
        acc = jnp.zeros((cout, hw), jnp.float32)
        for ki in range(3):
            for kj in range(3):
                t = _shift_flat(cols[kj], (ki - 1) * W)
                k = ki * 3 + kj
                acc = acc + w[:, k:k + 1] * t
        return acc

    colcat = jnp.concatenate(cols, axis=0)                  # (3*Cin, HW)
    taps = jnp.concatenate(
        [_shift_flat(colcat, -W), colcat, _shift_flat(colcat, W)],
        axis=0)                                             # (9*Cin, HW)
    return jnp.dot(w_ref[...], taps.astype(jnp.bfloat16),
                   preferred_element_type=jnp.float32)


def _act_instnorm(z, gamma, beta, slope, eps):
    """LeakyReLU followed by affine InstanceNorm (per row = per (n, c))."""
    a = jnp.where(z >= 0.0, z, slope * z)
    mean = jnp.mean(a, axis=1, keepdims=True)
    var = jnp.mean(jnp.square(a - mean), axis=1, keepdims=True)  # biased (PyTorch)
    return (a - mean) * jax.lax.rsqrt(var + eps) * gamma + beta


# ----------------------------------------------------------------------------
# Fused level kernels
# ----------------------------------------------------------------------------
def _down_block_kernel(x_ref, w1_ref, w2_ref, pp_ref, *out_refs,
                       H, W, slope, eps, pool):
    """conv3x3+bias+LeakyReLU+IN, twice; optional fused 2x2 max-pool."""
    if pool:
        yfull_ref, yrows_ref = out_refs
    else:
        (yfull_ref,) = out_refs

    hw = H * W
    masks = _col_masks(W, hw)
    x = x_ref[0].astype(jnp.float32)        # (Cin, HW)
    pp = pp_ref[...]                        # (Cout, 8): [b1,g1,be1,b2,g2,be2,-,-]

    z = _conv3x3(x, w1_ref, W, masks) + pp[:, 0:1]
    z = _act_instnorm(z, pp[:, 1:2], pp[:, 2:3], slope, eps)
    z = _conv3x3(z, w2_ref, W, masks) + pp[:, 3:4]
    y = _act_instnorm(z, pp[:, 4:5], pp[:, 5:6], slope, eps)
    yfull_ref[0] = y.astype(yfull_ref.dtype)

    if pool:
        # 2x2 max-pool: window max on the VPU via two flat shifts, then keep
        # the even output rows in-kernel.  The remaining stride-2 lane
        # decimation happens as a free XLA slice in the wrapper.
        # TODO(synk): move the lane decimation in-kernel via a strided VMEM
        # read (ref[pl.ds(0, n, stride=2)]) once validated on all targets.
        m = jnp.maximum(y, _shift_flat(y, 1))
        m = jnp.maximum(m, _shift_flat(m, W))
        rows = [m[:, (2 * q) * W:(2 * q) * W + W] for q in range(H // 2)]
        yrows_ref[0] = jnp.concatenate(rows, axis=1).astype(yrows_ref.dtype)


def _up_block_kernel(xup_ref, br_ref, wup_ref, w1a_ref, w1b_ref, w2_ref,
                     wout_ref, pp_ref, y_ref, head_ref, *, H, W, slope, eps):
    """1x1 up-projection + concat-free double-conv block + fused 1x1 head."""
    hw = H * W
    masks = _col_masks(W, hw)
    pp = pp_ref[...]                        # (Cout, 8): [b_up,b1,g1,be1,b2,g2,be2,-]
    br = br_ref[0].astype(jnp.float32)      # (Cout, HW) bridge (already cropped)

    # 1x1 conv of the 'upsample' up-path (bilinear resize done in the wrapper).
    a = jnp.dot(wup_ref[...], xup_ref[0].astype(jnp.bfloat16),
                preferred_element_type=jnp.float32) + pp[:, 0:1]

    # First 3x3 conv: channel concat [up | bridge] folded into a weight split,
    # both halves accumulated into the same f32 result.
    z = (_conv3x3(a, w1a_ref, W, masks) + _conv3x3(br, w1b_ref, W, masks)
         + pp[:, 1:2])
    z = _act_instnorm(z, pp[:, 2:3], pp[:, 3:4], slope, eps)
    z = _conv3x3(z, w2_ref, W, masks) + pp[:, 4:5]
    y = _act_instnorm(z, pp[:, 5:6], pp[:, 6:7], slope, eps)
    y_ref[0] = y.astype(y_ref.dtype)

    # Fused 1x1 output head (bias-free); rows padded to 8 for the MXU, lanes
    # stay the dense spatial axis.
    head_ref[0] = jnp.dot(wout_ref[...], y.astype(jnp.bfloat16),
                          preferred_element_type=jnp.float32)


# ----------------------------------------------------------------------------
# pallas_call wrappers
# ----------------------------------------------------------------------------
def down_block(x, p, *, H, W, pool, slope, eps=1e-5):
    """x: (N, Cin, H*W) -> (full (N, Cout, H*W) bf16,
                            even-row window-max (N, Cout, H*W/2) bf16 or None)."""
    N, cin, HW = x.shape
    cout, k9 = p["w1"].shape

    in_specs = [
        pl.BlockSpec((1, cin, HW), lambda n: (n, 0, 0)),
        pl.BlockSpec((cout, k9), lambda n: (0, 0)),
        pl.BlockSpec((cout, 9 * cout), lambda n: (0, 0)),
        pl.BlockSpec((cout, 8), lambda n: (0, 0)),
    ]
    out_shape = [jax.ShapeDtypeStruct((N, cout, HW), jnp.bfloat16)]
    out_specs = [pl.BlockSpec((1, cout, HW), lambda n: (n, 0, 0))]
    if pool:
        hwr = (H // 2) * W
        out_shape.append(jax.ShapeDtypeStruct((N, cout, hwr), jnp.bfloat16))
        out_specs.append(pl.BlockSpec((1, cout, hwr), lambda n: (n, 0, 0)))

    outs = pl.pallas_call(
        functools.partial(_down_block_kernel, H=H, W=W, slope=slope, eps=eps,
                          pool=pool),
        grid=(N,),
        in_specs=in_specs,
        out_specs=out_specs,
        out_shape=out_shape,
        compiler_params=pltpu.CompilerParams(
            dimension_semantics=("parallel",)),
    )(x, p["w1"], p["w2"], p["pp"])
    return (outs[0], outs[1]) if pool else (outs[0], None)


def up_block(xup, bridge, p, *, H, W, slope, eps=1e-5):
    """xup: (N, Cprev, H*W), bridge: (N, Cout, H*W) -> (y bf16, head f32)."""
    N, cprev, HW = xup.shape
    cout = p["w_up"].shape[0]
    cpad = p["w_out"].shape[0]

    in_specs = [
        pl.BlockSpec((1, cprev, HW), lambda n: (n, 0, 0)),
        pl.BlockSpec((1, cout, HW), lambda n: (n, 0, 0)),
        pl.BlockSpec((cout, cprev), lambda n: (0, 0)),
        pl.BlockSpec((cout, 9 * cout), lambda n: (0, 0)),
        pl.BlockSpec((cout, 9 * cout), lambda n: (0, 0)),
        pl.BlockSpec((cout, 9 * cout), lambda n: (0, 0)),
        pl.BlockSpec((cpad, cout), lambda n: (0, 0)),
        pl.BlockSpec((cout, 8), lambda n: (0, 0)),
    ]
    out_shape = [jax.ShapeDtypeStruct((N, cout, HW), jnp.bfloat16),
                 jax.ShapeDtypeStruct((N, cpad, HW), jnp.float32)]
    out_specs = [pl.BlockSpec((1, cout, HW), lambda n: (n, 0, 0)),
                 pl.BlockSpec((1, cpad, HW), lambda n: (n, 0, 0))]

    y, head = pl.pallas_call(
        functools.partial(_up_block_kernel, H=H, W=W, slope=slope, eps=eps),
        grid=(N,),
        in_specs=in_specs,
        out_specs=out_specs,
        out_shape=out_shape,
        compiler_params=pltpu.CompilerParams(
            dimension_semantics=("parallel",)),
    )(xup, bridge, p["w_up"], p["w1a"], p["w1b"], p["w2"], p["w_out"], p["pp"])
    return y, head


# ----------------------------------------------------------------------------
# JAX glue (only resize / crop / trivial slices; conv/norm/pool math in Pallas)
# ----------------------------------------------------------------------------
def tensor_center_crop(x, target_size):
    th, tw = target_size
    H, W = x.shape[2], x.shape[3]
    dy = (H - th) // 2
    dx = (W - tw) // 2
    return x[:, :, dy:dy + th, dx:dx + tw]


def unet_forward(params, x, *, depth, n_classes, slope=0.01):
    N, cin, H, W = x.shape
    act = x.reshape(N, cin, H * W)
    h, w = H, W
    bridges = []

    # Down path.
    for i in range(depth):
        last = i == depth - 1
        y, yrows = down_block(act, params["down"][i], H=h, W=w,
                              pool=not last, slope=slope)
        if last:
            act = y
        else:
            bridges.append((y, h, w))
            hq, wq = h // 2, w // 2
            # Finish the fused max-pool: keep even columns (stride-2 lane
            # slice, essentially free in XLA).
            act = yrows.reshape(N, -1, hq, w)[:, :, :, ::2].reshape(N, -1, hq * wq)
            h, w = hq, wq

    # Up path (+ fused output heads).
    outputs = []
    for j, lvl in enumerate(reversed(range(depth - 1))):
        p = params["up"][j]
        cprev = act.shape[1]
        # TODO(synk): fuse the 2x bilinear upsample (0.25/0.75 stencil) into
        # _up_block_kernel; jax.image.resize matches nn.Upsample's
        # align_corners=False half-pixel-center semantics for 2x upsampling.
        up4 = jax.image.resize(act.reshape(N, cprev, h, w),
                               (N, cprev, 2 * h, 2 * w), method="bilinear")
        h, w = 2 * h, 2 * w
        bridge, bh, bw = bridges.pop()
        br4 = tensor_center_crop(bridge.reshape(N, -1, bh, bw), (h, w))
        y, head = up_block(up4.reshape(N, cprev, h * w),
                           br4.reshape(N, br4.shape[1], h * w),
                           p, H=h, W=w, slope=slope)
        act = y
        head4 = head[:, :n_classes].reshape(N, n_classes, h, w)
        if lvl != 0:
            s = 2 ** lvl
            head4 = jax.image.resize(head4, (N, n_classes, h * s, w * s),
                                     method="bilinear")
        outputs.append(head4)

    # output_all_levels=True: highest -> lowest resolution, center-cropped.
    result = []
    out_size = None
    for o in reversed(outputs):
        if out_size is None:
            out_size = tuple(o.shape[2:])
        result.append(tensor_center_crop(o, out_size))
    return result


# ----------------------------------------------------------------------------
# Deterministic parameter init (PyTorch-shaped), pre-packed for the kernels
# ----------------------------------------------------------------------------
def init_params(key, in_channels, n_classes, depth, wf):
    keys = list(jax.random.split(key, 64))
    ki = iter(keys)

    def conv_init(k, cout, cin, ksz, bias=True):
        k1, k2 = jax.random.split(k)
        fan_in = cin * ksz * ksz
        bound = 1.0 / math.sqrt(fan_in)
        w = jax.random.uniform(k1, (cout, cin, ksz, ksz), jnp.float32, -bound, bound)
        b = jax.random.uniform(k2, (cout,), jnp.float32, -bound, bound) if bias else None
        return w, b

    def pack3x3(w):
        cout, cin = w.shape[0], w.shape[1]
        # (Cout, Cin, 3, 3) -> (Cout, 9*Cin): tap-major (ki, kj) with input
        # channel fastest, matching the stacked taps built in _conv3x3.
        return jnp.transpose(w, (0, 2, 3, 1)).reshape(cout, 9 * cin).astype(jnp.bfloat16)

    params = {"down": [], "up": []}
    prev = in_channels
    for i in range(depth):
        cout = 2 ** (wf + i)
        w1, b1 = conv_init(next(ki), cout, prev, 3)
        w2, b2 = conv_init(next(ki), cout, cout, 3)
        # Packed per-channel params: [b1, g1, be1, b2, g2, be2, -, -]
        # (InstanceNorm2d(affine=True) initializes gamma=1, beta=0.)
        pp = jnp.zeros((cout, 8), jnp.float32)
        pp = pp.at[:, 0].set(b1).at[:, 1].set(1.0).at[:, 3].set(b2).at[:, 4].set(1.0)
        params["down"].append(dict(w1=pack3x3(w1), w2=pack3x3(w2), pp=pp))
        prev = cout

    cpad = max(8, n_classes)
    for i in reversed(range(depth - 1)):
        cout = 2 ** (wf + i)
        wu, bu = conv_init(next(ki), cout, prev, 1)
        w1, b1 = conv_init(next(ki), cout, prev, 3)      # prev == 2 * cout (concat)
        w2, b2 = conv_init(next(ki), cout, cout, 3)
        wo, _ = conv_init(next(ki), n_classes, cout, 1, bias=False)
        wout = jnp.zeros((cpad, cout), jnp.float32).at[:n_classes].set(
            wo.reshape(n_classes, cout))
        # Packed per-channel params: [b_up, b1, g1, be1, b2, g2, be2, -]
        pp = jnp.zeros((cout, 8), jnp.float32)
        pp = pp.at[:, 0].set(bu).at[:, 1].set(b1).at[:, 2].set(1.0)
        pp = pp.at[:, 4].set(b2).at[:, 5].set(1.0)
        params["up"].append(dict(
            w_up=wu.reshape(cout, prev).astype(jnp.bfloat16),
            w1a=pack3x3(w1[:, :cout]),      # applies to the up-projected branch
            w1b=pack3x3(w1[:, cout:]),      # applies to the (cropped) bridge
            w2=pack3x3(w2),
            w_out=wout.astype(jnp.bfloat16),
            pp=pp,
        ))
        prev = cout
    return params


# ----------------------------------------------------------------------------
if __name__ == "__main__":
    depth, wf, in_ch, n_classes = 3, 3, 1, 2
    key = jax.random.PRNGKey(0)
    kx, kp = jax.random.split(key)

    x = jax.random.normal(kx, (2, in_ch, 16, 16), jnp.float32)
    params = init_params(kp, in_ch, n_classes, depth, wf)

    fwd = jax.jit(functools.partial(unet_forward, depth=depth,
                                    n_classes=n_classes, slope=0.01))
    outs = fwd(params, x)
    outs = jax.block_until_ready(outs)

    assert len(outs) == depth - 1
    for o in outs:
        assert o.shape == (2, n_classes, 16, 16), o.shape
        assert o.dtype == jnp.float32
        assert bool(jnp.all(jnp.isfinite(o)))

    print("KERNEL_OK")
</pallas_src>

<mosaic_0001>
module attributes {stable_mosaic.version = 11 : i64} {
  func.func @_down_block_kernel(%arg0: i32, %arg1: memref<1x1x256xf32, #tpu.memory_space<vmem>>, %arg2: memref<8x9xbf16, #tpu.memory_space<vmem>>, %arg3: memref<8x72xbf16, #tpu.memory_space<vmem>>, %arg4: memref<8x8xf32, #tpu.memory_space<vmem>>, %arg5: memref<1x8x256xbf16, #tpu.memory_space<vmem>>, %arg6: memref<1x8x128xbf16, #tpu.memory_space<vmem>>) attributes {dimension_semantics = [#tpu.dimension_semantics<parallel>], iteration_bounds = array<i64: 2>, scalar_prefetch = 0 : i64, scratch_operands = 0 : i64, tpu.core_type = #tpu.core_type<tc>, window_params = [{transform_indices = @transform_0, window_bounds = array<i64: 1, 1, 256>}, {pipeline_mode = #tpu.pipeline_mode<synchronous>, transform_indices = @transform_1, window_bounds = array<i64: 8, 9>}, {pipeline_mode = #tpu.pipeline_mode<synchronous>, transform_indices = @transform_2, window_bounds = array<i64: 8, 72>}, {pipeline_mode = #tpu.pipeline_mode<synchronous>, transform_indices = @transform_3, window_bounds = array<i64: 8, 8>}, {transform_indices = @transform_4, window_bounds = array<i64: 1, 8, 256>}, {transform_indices = @transform_5, window_bounds = array<i64: 1, 8, 128>}]} {
    %0 = tpu.iota {dimensions = array<i32: 1>} : vector<1x256xi32>
    %c16_i32 = arith.constant 16 : i32
    %c0_i32 = arith.constant 0 : i32
    %1 = arith.cmpi eq, %c16_i32, %c0_i32 : i32
    %c1_i32 = arith.constant 1 : i32
    %2 = arith.select %1, %c1_i32, %c16_i32 : i32
    %3 = vector.broadcast %2 : i32 to vector<1x256xi32>
    %4 = arith.remsi %0, %3 : vector<1x256xi32>
    %c0_i32_0 = arith.constant 0 : i32
    %5 = vector.broadcast %c0_i32_0 : i32 to vector<1x256xi32>
    %6 = arith.cmpi ne, %4, %5 : vector<1x256xi32>
    %c0_i32_1 = arith.constant 0 : i32
    %7 = vector.broadcast %c0_i32_1 : i32 to vector<1x256xi32>
    %8 = arith.cmpi slt, %4, %7 : vector<1x256xi32>
    %c0_i32_2 = arith.constant 0 : i32
    %9 = arith.cmpi slt, %2, %c0_i32_2 : i32
    %10 = vector.broadcast %9 : i1 to vector<1x256xi1>
    %11 = vector.broadcast %10 : vector<1x256xi1> to vector<1x256xi1>
    %12 = arith.xori %8, %11 : vector<1x256xi1>
    %13 = arith.andi %12, %6 : vector<1x256xi1>
    %14 = vector.broadcast %2 : i32 to vector<1x256xi32>
    %15 = arith.addi %4, %14 : vector<1x256xi32>
    %16 = arith.select %13, %15, %4 : vector<1x256xi1>, vector<1x256xi32>
    %c1_i32_3 = arith.constant 1 : i32
    %17 = vector.broadcast %c1_i32_3 : i32 to vector<1x256xi32>
    %18 = arith.cmpi sge, %16, %17 : vector<1x256xi32>
    %c14_i32 = arith.constant 14 : i32
    %19 = vector.broadcast %c14_i32 : i32 to vector<1x256xi32>
    %20 = arith.cmpi sle, %16, %19 : vector<1x256xi32>
    %c0 = arith.constant 0 : index
    %c0_4 = arith.constant 0 : index
    %c0_5 = arith.constant 0 : index
    %21 = vector.load %arg1[%c0, %c0_4, %c0_5] : memref<1x1x256xf32, #tpu.memory_space<vmem>>, vector<1x1x256xf32>
    %22 = vector.shape_cast %21 : vector<1x1x256xf32> to vector<1x256xf32>
    %c0_6 = arith.constant 0 : index
    %c0_7 = arith.constant 0 : index
    %23 = vector.load %arg4[%c0_6, %c0_7] : memref<8x8xf32, #tpu.memory_space<vmem>>, vector<8x8xf32>
    %cst = arith.constant 0.000000e+00 : f32
    %24 = vector.broadcast %cst : f32 to vector<1x1xf32>
    %25 = vector.extract_strided_slice %22 {offsets = [0, 0], sizes = [1, 255], strides = [1, 1]} : vector<1x256xf32> to vector<1x255xf32>
    %26 = tpu.concatenate %24, %25 in 1 : vector<1x1xf32>, vector<1x255xf32> -> vector<1x256xf32>
    %cst_8 = arith.constant 0.000000e+00 : f32
    %27 = vector.broadcast %cst_8 : f32 to vector<1x256xf32>
    %28 = arith.select %18, %26, %27 : vector<1x256xi1>, vector<1x256xf32>
    %cst_9 = arith.constant 0.000000e+00 : f32
    %29 = vector.broadcast %cst_9 : f32 to vector<1x1xf32>
    %30 = vector.extract_strided_slice %22 {offsets = [0, 1], sizes = [1, 255], strides = [1, 1]} : vector<1x256xf32> to vector<1x255xf32>
    %31 = tpu.concatenate %30, %29 in 1 : vector<1x255xf32>, vector<1x1xf32> -> vector<1x256xf32>
    %cst_10 = arith.constant 0.000000e+00 : f32
    %32 = vector.broadcast %cst_10 : f32 to vector<1x256xf32>
    %33 = arith.select %20, %31, %32 : vector<1x256xi1>, vector<1x256xf32>
    %c0_11 = arith.constant 0 : index
    %c0_12 = arith.constant 0 : index
    %34 = vector.load %arg2[%c0_11, %c0_12] : memref<8x9xbf16, #tpu.memory_space<vmem>>, vector<8x9xbf16>
    %35 = arith.extf %34 : vector<8x9xbf16> to vector<8x9xf32>
    %cst_13 = arith.constant 0.000000e+00 : f32
    %36 = vector.broadcast %cst_13 : f32 to vector<8x256xf32>
    %cst_14 = arith.constant 0.000000e+00 : f32
    %37 = vector.broadcast %cst_14 : f32 to vector<1x16xf32>
    %38 = vector.extract_strided_slice %28 {offsets = [0, 0], sizes = [1, 240], strides = [1, 1]} : vector<1x256xf32> to vector<1x240xf32>
    %39 = tpu.concatenate %37, %38 in 1 : vector<1x16xf32>, vector<1x240xf32> -> vector<1x256xf32>
    %40 = vector.extract_strided_slice %35 {offsets = [0, 0], sizes = [8, 1], strides = [1, 1]} : vector<8x9xf32> to vector<8x1xf32>
    %41 = vector.broadcast %40 : vector<8x1xf32> to vector<8x256xf32>
    %42 = vector.broadcast %39 : vector<1x256xf32> to vector<8x256xf32>
    %43 = arith.mulf %41, %42 : vector<8x256xf32>
    %44 = arith.addf %36, %43 : vector<8x256xf32>
    %cst_15 = arith.constant 0.000000e+00 : f32
    %45 = vector.broadcast %cst_15 : f32 to vector<1x16xf32>
    %46 = vector.extract_strided_slice %22 {offsets = [0, 0], sizes = [1, 240], strides = [1, 1]} : vector<1x256xf32> to vector<1x240xf32>
    %47 = tpu.concatenate %45, %46 in 1 : vector<1x16xf32>, vector<1x240xf32> -> vector<1x256xf32>
    %48 = vector.extract_strided_slice %35 {offsets = [0, 1], sizes = [8, 1], strides = [1, 1]} : vector<8x9xf32> to vector<8x1xf32>
    %49 = vector.broadcast %48 : vector<8x1xf32> to vector<8x256xf32>
    %50 = vector.broadcast %47 : vector<1x256xf32> to vector<8x256xf32>
    %51 = arith.mulf %49, %50 : vector<8x256xf32>
    %52 = arith.addf %44, %51 : vector<8x256xf32>
    %cst_16 = arith.constant 0.000000e+00 : f32
    %53 = vector.broadcast %cst_16 : f32 to vector<1x16xf32>
    %54 = vector.extract_strided_slice %33 {offsets = [0, 0], sizes = [1, 240], strides = [1, 1]} : vector<1x256xf32> to vector<1x240xf32>
    %55 = tpu.concatenate %53, %54 in 1 : vector<1x16xf32>, vector<1x240xf32> -> vector<1x256xf32>
    %56 = vector.extract_strided_slice %35 {offsets = [0, 2], sizes = [8, 1], strides = [1, 1]} : vector<8x9xf32> to vector<8x1xf32>
    %57 = vector.broadcast %56 : vector<8x1xf32> to vector<8x256xf32>
    %58 = vector.broadcast %55 : vector<1x256xf32> to vector<8x256xf32>
    %59 = arith.mulf %57, %58 : vector<8x256xf32>
    %60 = arith.addf %52, %59 : vector<8x256xf32>
    %61 = vector.extract_strided_slice %35 {offsets = [0, 3], sizes = [8, 1], strides = [1, 1]} : vector<8x9xf32> to vector<8x1xf32>
    %62 = vector.broadcast %61 : vector<8x1xf32> to vector<8x256xf32>
    %63 = vector.broadcast %28 : vector<1x256xf32> to vector<8x256xf32>
    %64 = arith.mulf %62, %63 : vector<8x256xf32>
    %65 = arith.addf %60, %64 : vector<8x256xf32>
    %66 = vector.extract_strided_slice %35 {offsets = [0, 4], sizes = [8, 1], strides = [1, 1]} : vector<8x9xf32> to vector<8x1xf32>
    %67 = vector.broadcast %66 : vector<8x1xf32> to vector<8x256xf32>
    %68 = vector.broadcast %22 : vector<1x256xf32> to vector<8x256xf32>
    %69 = arith.mulf %67, %68 : vector<8x256xf32>
    %70 = arith.addf %65, %69 : vector<8x256xf32>
    %71 = vector.extract_strided_slice %35 {offsets = [0, 5], sizes = [8, 1], strides = [1, 1]} : vector<8x9xf32> to vector<8x1xf32>
    %72 = vector.broadcast %71 : vector<8x1xf32> to vector<8x256xf32>
    %73 = vector.broadcast %33 : vector<1x256xf32> to vector<8x256xf32>
    %74 = arith.mulf %72, %73 : vector<8x256xf32>
    %75 = arith.addf %70, %74 : vector<8x256xf32>
    %cst_17 = arith.constant 0.000000e+00 : f32
    %76 = vector.broadcast %cst_17 : f32 to vector<1x16xf32>
    %77 = vector.extract_strided_slice %28 {offsets = [0, 16], sizes = [1, 240], strides = [1, 1]} : vector<1x256xf32> to vector<1x240xf32>
    %78 = tpu.concatenate %77, %76 in 1 : vector<1x240xf32>, vector<1x16xf32> -> vector<1x256xf32>
    %79 = vector.extract_strided_slice %35 {offsets = [0, 6], sizes = [8, 1], strides = [1, 1]} : vector<8x9xf32> to vector<8x1xf32>
    %80 = vector.broadcast %79 : vector<8x1xf32> to vector<8x256xf32>
    %81 = vector.broadcast %78 : vector<1x256xf32> to vector<8x256xf32>
    %82 = arith.mulf %80, %81 : vector<8x256xf32>
    %83 = arith.addf %75, %82 : vector<8x256xf32>
    %cst_18 = arith.constant 0.000000e+00 : f32
    %84 = vector.broadcast %cst_18 : f32 to vector<1x16xf32>
    %85 = vector.extract_strided_slice %22 {offsets = [0, 16], sizes = [1, 240], strides = [1, 1]} : vector<1x256xf32> to vector<1x240xf32>
    %86 = tpu.concatenate %85, %84 in 1 : vector<1x240xf32>, vector<1x16xf32> -> vector<1x256xf32>
    %87 = vector.extract_strided_slice %35 {offsets = [0, 7], sizes = [8, 1], strides = [1, 1]} : vector<8x9xf32> to vector<8x1xf32>
    %88 = vector.broadcast %87 : vector<8x1xf32> to vector<8x256xf32>
    %89 = vector.broadcast %86 : vector<1x256xf32> to vector<8x256xf32>
    %90 = arith.mulf %88, %89 : vector<8x256xf32>
    %91 = arith.addf %83, %90 : vector<8x256xf32>
    %cst_19 = arith.constant 0.000000e+00 : f32
    %92 = vector.broadcast %cst_19 : f32 to vector<1x16xf32>
    %93 = vector.extract_strided_slice %33 {offsets = [0, 16], sizes = [1, 240], strides = [1, 1]} : vector<1x256xf32> to vector<1x240xf32>
    %94 = tpu.concatenate %93, %92 in 1 : vector<1x240xf32>, vector<1x16xf32> -> vector<1x256xf32>
    %95 = vector.extract_strided_slice %35 {offsets = [0, 8], sizes = [8, 1], strides = [1, 1]} : vector<8x9xf32> to vector<8x1xf32>
    %96 = vector.broadcast %95 : vector<8x1xf32> to vector<8x256xf32>
    %97 = vector.broadcast %94 : vector<1x256xf32> to vector<8x256xf32>
    %98 = arith.mulf %96, %97 : vector<8x256xf32>
    %99 = arith.addf %91, %98 : vector<8x256xf32>
    %100 = vector.extract_strided_slice %23 {offsets = [0, 0], sizes = [8, 1], strides = [1, 1]} : vector<8x8xf32> to vector<8x1xf32>
    %101 = vector.broadcast %100 : vector<8x1xf32> to vector<8x256xf32>
    %102 = arith.addf %99, %101 : vector<8x256xf32>
    %103 = vector.extract_strided_slice %23 {offsets = [0, 1], sizes = [8, 1], strides = [1, 1]} : vector<8x8xf32> to vector<8x1xf32>
    %104 = vector.extract_strided_slice %23 {offsets = [0, 2], sizes = [8, 1], strides = [1, 1]} : vector<8x8xf32> to vector<8x1xf32>
    %cst_20 = arith.constant 0.000000e+00 : f32
    %105 = vector.broadcast %cst_20 : f32 to vector<8x256xf32>
    %106 = arith.cmpf oge, %102, %105 : vector<8x256xf32>
    %cst_21 = arith.constant 0.00999999977 : f32
    %107 = vector.broadcast %cst_21 : f32 to vector<8x256xf32>
    %108 = arith.mulf %107, %102 : vector<8x256xf32>
    %109 = arith.select %106, %102, %108 : vector<8x256xi1>, vector<8x256xf32>
    %cst_22 = arith.constant dense<0.000000e+00> : vector<8xf32>
    %110 = vector.multi_reduction <add>, %109, %cst_22 [1] : vector<8x256xf32> to vector<8xf32>
    %111 = vector.shape_cast %110 : vector<8xf32> to vector<8x1xf32>
    %cst_23 = arith.constant 2.560000e+02 : f32
    %112 = vector.broadcast %cst_23 : f32 to vector<8x1xf32>
    %113 = arith.divf %111, %112 : vector<8x1xf32>
    %114 = vector.broadcast %113 : vector<8x1xf32> to vector<8x256xf32>
    %115 = arith.subf %109, %114 : vector<8x256xf32>
    %116 = arith.mulf %115, %115 : vector<8x256xf32>
    %cst_24 = arith.constant dense<0.000000e+00> : vector<8xf32>
    %117 = vector.multi_reduction <add>, %116, %cst_24 [1] : vector<8x256xf32> to vector<8xf32>
    %118 = vector.shape_cast %117 : vector<8xf32> to vector<8x1xf32>
    %cst_25 = arith.constant 2.560000e+02 : f32
    %119 = vector.broadcast %cst_25 : f32 to vector<8x1xf32>
    %120 = arith.divf %118, %119 : vector<8x1xf32>
    %121 = vector.broadcast %113 : vector<8x1xf32> to vector<8x256xf32>
    %122 = arith.subf %109, %121 : vector<8x256xf32>
    %cst_26 = arith.constant 9.99999974E-6 : f32
    %123 = vector.broadcast %cst_26 : f32 to vector<8x1xf32>
    %124 = arith.addf %120, %123 : vector<8x1xf32>
    %125 = math.rsqrt %124 : vector<8x1xf32>
    %126 = vector.broadcast %125 : vector<8x1xf32> to vector<8x256xf32>
    %127 = arith.mulf %122, %126 : vector<8x256xf32>
    %128 = vector.broadcast %103 : vector<8x1xf32> to vector<8x256xf32>
    %129 = arith.mulf %127, %128 : vector<8x256xf32>
    %130 = vector.broadcast %104 : vector<8x1xf32> to vector<8x256xf32>
    %131 = arith.addf %129, %130 : vector<8x256xf32>
    %cst_27 = arith.constant 0.000000e+00 : f32
    %132 = vector.broadcast %cst_27 : f32 to vector<8x1xf32>
    %133 = vector.extract_strided_slice %131 {offsets = [0, 0], sizes = [8, 255], strides = [1, 1]} : vector<8x256xf32> to vector<8x255xf32>
    %134 = tpu.concatenate %132, %133 in 1 : vector<8x1xf32>, vector<8x255xf32> -> vector<8x256xf32>
    %cst_28 = arith.constant 0.000000e+00 : f32
    %135 = vector.shape_cast %18 : vector<1x256xi1> to vector<1x256xi1>
    %136 = vector.broadcast %135 : vector<1x256xi1> to vector<8x256xi1>
    %137 = vector.broadcast %cst_28 : f32 to vector<8x256xf32>
    %138 = arith.select %136, %134, %137 : vector<8x256xi1>, vector<8x256xf32>
    %cst_29 = arith.constant 0.000000e+00 : f32
    %139 = vector.broadcast %cst_29 : f32 to vector<8x1xf32>
    %140 = vector.extract_strided_slice %131 {offsets = [0, 1], sizes = [8, 255], strides = [1, 1]} : vector<8x256xf32> to vector<8x255xf32>
    %141 = tpu.concatenate %140, %139 in 1 : vector<8x255xf32>, vector<8x1xf32> -> vector<8x256xf32>
    %cst_30 = arith.constant 0.000000e+00 : f32
    %142 = vector.shape_cast %20 : vector<1x256xi1> to vector<1x256xi1>
    %143 = vector.broadcast %142 : vector<1x256xi1> to vector<8x256xi1>
    %144 = vector.broadcast %cst_30 : f32 to vector<8x256xf32>
    %145 = arith.select %143, %141, %144 : vector<8x256xi1>, vector<8x256xf32>
    %146 = tpu.concatenate %138, %131, %145 in 0 : vector<8x256xf32>, vector<8x256xf32>, vector<8x256xf32> -> vector<24x256xf32>
    %cst_31 = arith.constant 0.000000e+00 : f32
    %147 = vector.broadcast %cst_31 : f32 to vector<24x16xf32>
    %148 = vector.extract_strided_slice %146 {offsets = [0, 0], sizes = [24, 240], strides = [1, 1]} : vector<24x256xf32> to vector<24x240xf32>
    %149 = tpu.concatenate %147, %148 in 1 : vector<24x16xf32>, vector<24x240xf32> -> vector<24x256xf32>
    %cst_32 = arith.constant 0.000000e+00 : f32
    %150 = vector.broadcast %cst_32 : f32 to vector<24x16xf32>
    %151 = vector.extract_strided_slice %146 {offsets = [0, 16], sizes = [24, 240], strides = [1, 1]} : vector<24x256xf32> to vector<24x240xf32>
    %152 = tpu.concatenate %151, %150 in 1 : vector<24x240xf32>, vector<24x16xf32> -> vector<24x256xf32>
    %153 = tpu.concatenate %149, %146, %152 in 0 : vector<24x256xf32>, vector<24x256xf32>, vector<24x256xf32> -> vector<72x256xf32>
    %c0_33 = arith.constant 0 : index
    %c0_34 = arith.constant 0 : index
    %154 = vector.load %arg3[%c0_33, %c0_34] : memref<8x72xbf16, #tpu.memory_space<vmem>>, vector<8x72xbf16>
    %155 = arith.truncf %153 : vector<72x256xf32> to vector<72x256xbf16>
    %cst_35 = arith.constant dense<0.000000e+00> : vector<8x256xf32>
    %156 = tpu.matmul %154, %155, %cst_35 {dimension_numbers = #tpu.dot_dimension_numbers<[1], [0], [0], [1], [0, 0, 1, 1], [], []>} : vector<8x72xbf16>, vector<72x256xbf16>, vector<8x256xf32> -> vector<8x256xf32>
    %157 = vector.extract_strided_slice %23 {offsets = [0, 3], sizes = [8, 1], strides = [1, 1]} : vector<8x8xf32> to vector<8x1xf32>
    %158 = vector.broadcast %157 : vector<8x1xf32> to vector<8x256xf32>
    %159 = arith.addf %156, %158 : vector<8x256xf32>
    %160 = vector.extract_strided_slice %23 {offsets = [0, 4], sizes = [8, 1], strides = [1, 1]} : vector<8x8xf32> to vector<8x1xf32>
    %161 = vector.extract_strided_slice %23 {offsets = [0, 5], sizes = [8, 1], strides = [1, 1]} : vector<8x8xf32> to vector<8x1xf32>
    %cst_36 = arith.constant 0.000000e+00 : f32
    %162 = vector.broadcast %cst_36 : f32 to vector<8x256xf32>
    %163 = arith.cmpf oge, %159, %162 : vector<8x256xf32>
    %cst_37 = arith.constant 0.00999999977 : f32
    %164 = vector.broadcast %cst_37 : f32 to vector<8x256xf32>
    %165 = arith.mulf %164, %159 : vector<8x256xf32>
    %166 = arith.select %163, %159, %165 : vector<8x256xi1>, vector<8x256xf32>
    %cst_38 = arith.constant dense<0.000000e+00> : vector<8xf32>
    %167 = vector.multi_reduction <add>, %166, %cst_38 [1] : vector<8x256xf32> to vector<8xf32>
    %168 = vector.shape_cast %167 : vector<8xf32> to vector<8x1xf32>
    %cst_39 = arith.constant 2.560000e+02 : f32
    %169 = vector.broadcast %cst_39 : f32 to vector<8x1xf32>
    %170 = arith.divf %168, %169 : vector<8x1xf32>
    %171 = vector.broadcast %170 : vector<8x1xf32> to vector<8x256xf32>
    %172 = arith.subf %166, %171 : vector<8x256xf32>
    %173 = arith.mulf %172, %172 : vector<8x256xf32>
    %cst_40 = arith.constant dense<0.000000e+00> : vector<8xf32>
    %174 = vector.multi_reduction <add>, %173, %cst_40 [1] : vector<8x256xf32> to vector<8xf32>
    %175 = vector.shape_cast %174 : vector<8xf32> to vector<8x1xf32>
    %cst_41 = arith.constant 2.560000e+02 : f32
    %176 = vector.broadcast %cst_41 : f32 to vector<8x1xf32>
    %177 = arith.divf %175, %176 : vector<8x1xf32>
    %178 = vector.broadcast %170 : vector<8x1xf32> to vector<8x256xf32>
    %179 = arith.subf %166, %178 : vector<8x256xf32>
    %cst_42 = arith.constant 9.99999974E-6 : f32
    %180 = vector.broadcast %cst_42 : f32 to vector<8x1xf32>
    %181 = arith.addf %177, %180 : vector<8x1xf32>
    %182 = math.rsqrt %181 : vector<8x1xf32>
    %183 = vector.broadcast %182 : vector<8x1xf32> to vector<8x256xf32>
    %184 = arith.mulf %179, %183 : vector<8x256xf32>
    %185 = vector.broadcast %160 : vector<8x1xf32> to vector<8x256xf32>
    %186 = arith.mulf %184, %185 : vector<8x256xf32>
    %187 = vector.broadcast %161 : vector<8x1xf32> to vector<8x256xf32>
    %188 = arith.addf %186, %187 : vector<8x256xf32>
    %189 = arith.truncf %188 : vector<8x256xf32> to vector<8x256xbf16>
    %c0_43 = arith.constant 0 : index
    %c0_44 = arith.constant 0 : index
    %c0_45 = arith.constant 0 : index
    %190 = vector.load %arg5[%c0_43, %c0_44, %c0_45] : memref<1x8x256xbf16, #tpu.memory_space<vmem>>, vector<1x8x256xbf16>
    %191 = vector.shape_cast %190 : vector<1x8x256xbf16> to vector<8x256xbf16>
    %192 = vector.shape_cast %189 : vector<8x256xbf16> to vector<1x8x256xbf16>
    tpu.vector_store %arg5[%c0_43, %c0_44, %c0_45], %192 {strides = array<i32>} : memref<1x8x256xbf16, #tpu.memory_space<vmem>>, vector<1x8x256xbf16>,
    %cst_46 = arith.constant 0.000000e+00 : f32
    %193 = vector.broadcast %cst_46 : f32 to vector<8x1xf32>
    %194 = vector.extract_strided_slice %188 {offsets = [0, 1], sizes = [8, 255], strides = [1, 1]} : vector<8x256xf32> to vector<8x255xf32>
    %195 = tpu.concatenate %194, %193 in 1 : vector<8x255xf32>, vector<8x1xf32> -> vector<8x256xf32>
    %196 = arith.maximumf %188, %195 : vector<8x256xf32>
    %cst_47 = arith.constant 0.000000e+00 : f32
    %197 = vector.broadcast %cst_47 : f32 to vector<8x16xf32>
    %198 = vector.extract_strided_slice %196 {offsets = [0, 16], sizes = [8, 240], strides = [1, 1]} : vector<8x256xf32> to vector<8x240xf32>
    %199 = tpu.concatenate %198, %197 in 1 : vector<8x240xf32>, vector<8x16xf32> -> vector<8x256xf32>
    %200 = arith.maximumf %196, %199 : vector<8x256xf32>
    %201 = vector.extract_strided_slice %200 {offsets = [0, 0], sizes = [8, 16], strides = [1, 1]} : vector<8x256xf32> to vector<8x16xf32>
    %202 = vector.extract_strided_slice %200 {offsets = [0, 32], sizes = [8, 16], strides = [1, 1]} : vector<8x256xf32> to vector<8x16xf32>
    %203 = vector.extract_strided_slice %200 {offsets = [0, 64], sizes = [8, 16], strides = [1, 1]} : vector<8x256xf32> to vector<8x16xf32>
    %204 = vector.extract_strided_slice %200 {offsets = [0, 96], sizes = [8, 16], strides = [1, 1]} : vector<8x256xf32> to vector<8x16xf32>
    %205 = vector.extract_strided_slice %200 {offsets = [0, 128], sizes = [8, 16], strides = [1, 1]} : vector<8x256xf32> to vector<8x16xf32>
    %206 = vector.extract_strided_slice %200 {offsets = [0, 160], sizes = [8, 16], strides = [1, 1]} : vector<8x256xf32> to vector<8x16xf32>
    %207 = vector.extract_strided_slice %200 {offsets = [0, 192], sizes = [8, 16], strides = [1, 1]} : vector<8x256xf32> to vector<8x16xf32>
    %208 = vector.extract_strided_slice %200 {offsets = [0, 224], sizes = [8, 16], strides = [1, 1]} : vector<8x256xf32> to vector<8x16xf32>
    %209 = tpu.concatenate %201, %202, %203, %204, %205, %206, %207, %208 in 1 : vector<8x16xf32>, vector<8x16xf32>, vector<8x16xf32>, vector<8x16xf32>, vector<8x16xf32>, vector<8x16xf32>, vector<8x16xf32>, vector<8x16xf32> -> vector<8x128xf32>
    %210 = arith.truncf %209 : vector<8x128xf32> to vector<8x128xbf16>
    %c0_48 = arith.constant 0 : index
    %c0_49 = arith.constant 0 : index
    %c0_50 = arith.constant 0 : index
    %211 = vector.load %arg6[%c0_48, %c0_49, %c0_50] : memref<1x8x128xbf16, #tpu.memory_space<vmem>>, vector<1x8x128xbf16>
    %212 = vector.shape_cast %211 : vector<1x8x128xbf16> to vector<8x128xbf16>
    %213 = vector.shape_cast %210 : vector<8x128xbf16> to vector<1x8x128xbf16>
    tpu.vector_store %arg6[%c0_48, %c0_49, %c0_50], %213 {strides = array<i32>} : memref<1x8x128xbf16, #tpu.memory_space<vmem>>, vector<1x8x128xbf16>,
    return
  }
  func.func @transform_0(%arg0: i32) -> (i32, i32, i32) {
    %c0_i32 = arith.constant 0 : i32
    %c0_i32_0 = arith.constant 0 : i32
    %c0_i32_1 = arith.constant 0 : i32
    return %arg0, %c0_i32, %c0_i32_0 : i32, i32, i32
  }
  func.func @transform_1(%arg0: i32) -> (i32, i32) {
    %c0_i32 = arith.constant 0 : i32
    %c0_i32_0 = arith.constant 0 : i32
    %c0_i32_1 = arith.constant 0 : i32
    return %c0_i32, %c0_i32_0 : i32, i32
  }
  func.func @transform_2(%arg0: i32) -> (i32, i32) {
    %c0_i32 = arith.constant 0 : i32
    %c0_i32_0 = arith.constant 0 : i32
    %c0_i32_1 = arith.constant 0 : i32
    return %c0_i32, %c0_i32_0 : i32, i32
  }
  func.func @transform_3(%arg0: i32) -> (i32, i32) {
    %c0_i32 = arith.constant 0 : i32
    %c0_i32_0 = arith.constant 0 : i32
    %c0_i32_1 = arith.constant 0 : i32
    return %c0_i32, %c0_i32_0 : i32, i32
  }
  func.func @transform_4(%arg0: i32) -> (i32, i32, i32) {
    %c0_i32 = arith.constant 0 : i32
    %c0_i32_0 = arith.constant 0 : i32
    %c0_i32_1 = arith.constant 0 : i32
    return %arg0, %c0_i32, %c0_i32_0 : i32, i32, i32
  }
  func.func @transform_5(%arg0: i32) -> (i32, i32, i32) {
    %c0_i32 = arith.constant 0 : i32
    %c0_i32_0 = arith.constant 0 : i32
    %c0_i32_1 = arith.constant 0 : i32
    return %arg0, %c0_i32, %c0_i32_0 : i32, i32, i32
  }
}

module attributes {stable_mosaic.version = 11 : i64} {
  func.func @_down_block_kernel(%arg0: i32, %arg1: memref<1x8x64xbf16, #tpu.memory_space<vmem>>, %arg2: memref<16x72xbf16, #tpu.memory_space<vmem>>, %arg3: memref<16x144xbf16, #tpu.memory_space<vmem>>, %arg4: memref<16x8xf32, #tpu.memory_space<vmem>>, %arg5: memref<1x16x64xbf16, #tpu.memory_space<vmem>>, %arg6: memref<1x16x32xbf16, #tpu.memory_space<vmem>>) attributes {dimension_semantics = [#tpu.dimension_semantics<parallel>], iteration_bounds = array<i64: 2>, scalar_prefetch = 0 : i64, scratch_operands = 0 : i64, tpu.core_type = #tpu.core_type<tc>, window_params = [{transform_indices = @transform_0, window_bounds = array<i64: 1, 8, 64>}, {pipeline_mode = #tpu.pipeline_mode<synchronous>, transform_indices = @transform_1, window_bounds = array<i64: 16, 72>}, {pipeline_mode = #tpu.pipeline_mode<synchronous>, transform_indices = @transform_2, window_bounds = array<i64: 16, 144>}, {pipeline_mode = #tpu.pipeline_mode<synchronous>, transform_indices = @transform_3, window_bounds = array<i64: 16, 8>}, {transform_indices = @transform_4, window_bounds = array<i64: 1, 16, 64>}, {transform_indices = @transform_5, window_bounds = array<i64: 1, 16, 32>}]} {
    %0 = tpu.iota {dimensions = array<i32: 1>} : vector<1x64xi32>
    %c8_i32 = arith.constant 8 : i32
    %c0_i32 = arith.constant 0 : i32
    %1 = arith.cmpi eq, %c8_i32, %c0_i32 : i32
    %c1_i32 = arith.constant 1 : i32
    %2 = arith.select %1, %c1_i32, %c8_i32 : i32
    %3 = vector.broadcast %2 : i32 to vector<1x64xi32>
    %4 = arith.remsi %0, %3 : vector<1x64xi32>
    %c0_i32_0 = arith.constant 0 : i32
    %5 = vector.broadcast %c0_i32_0 : i32 to vector<1x64xi32>
    %6 = arith.cmpi ne, %4, %5 : vector<1x64xi32>
    %c0_i32_1 = arith.constant 0 : i32
    %7 = vector.broadcast %c0_i32_1 : i32 to vector<1x64xi32>
    %8 = arith.cmpi slt, %4, %7 : vector<1x64xi32>
    %c0_i32_2 = arith.constant 0 : i32
    %9 = arith.cmpi slt, %2, %c0_i32_2 : i32
    %10 = vector.broadcast %9 : i1 to vector<1x64xi1>
    %11 = vector.broadcast %10 : vector<1x64xi1> to vector<1x64xi1>
    %12 = arith.xori %8, %11 : vector<1x64xi1>
    %13 = arith.andi %12, %6 : vector<1x64xi1>
    %14 = vector.broadcast %2 : i32 to vector<1x64xi32>
    %15 = arith.addi %4, %14 : vector<1x64xi32>
    %16 = arith.select %13, %15, %4 : vector<1x64xi1>, vector<1x64xi32>
    %c1_i32_3 = arith.constant 1 : i32
    %17 = vector.broadcast %c1_i32_3 : i32 to vector<1x64xi32>
    %18 = arith.cmpi sge, %16, %17 : vector<1x64xi32>
    %c6_i32 = arith.constant 6 : i32
    %19 = vector.broadcast %c6_i32 : i32 to vector<1x64xi32>
    %20 = arith.cmpi sle, %16, %19 : vector<1x64xi32>
    %c0 = arith.constant 0 : index
    %c0_4 = arith.constant 0 : index
    %c0_5 = arith.constant 0 : index
    %21 = vector.load %arg1[%c0, %c0_4, %c0_5] : memref<1x8x64xbf16, #tpu.memory_space<vmem>>, vector<1x8x64xbf16>
    %22 = vector.shape_cast %21 : vector<1x8x64xbf16> to vector<8x64xbf16>
    %23 = arith.extf %22 : vector<8x64xbf16> to vector<8x64xf32>
    %c0_6 = arith.constant 0 : index
    %c0_7 = arith.constant 0 : index
    %24 = vector.load %arg4[%c0_6, %c0_7] : memref<16x8xf32, #tpu.memory_space<vmem>>, vector<16x8xf32>
    %cst = arith.constant 0.000000e+00 : f32
    %25 = vector.broadcast %cst : f32 to vector<8x1xf32>
    %26 = vector.extract_strided_slice %23 {offsets = [0, 0], sizes = [8, 63], strides = [1, 1]} : vector<8x64xf32> to vector<8x63xf32>
    %27 = tpu.concatenate %25, %26 in 1 : vector<8x1xf32>, vector<8x63xf32> -> vector<8x64xf32>
    %cst_8 = arith.constant 0.000000e+00 : f32
    %28 = vector.shape_cast %18 : vector<1x64xi1> to vector<1x64xi1>
    %29 = vector.broadcast %28 : vector<1x64xi1> to vector<8x64xi1>
    %30 = vector.broadcast %cst_8 : f32 to vector<8x64xf32>
    %31 = arith.select %29, %27, %30 : vector<8x64xi1>, vector<8x64xf32>
    %cst_9 = arith.constant 0.000000e+00 : f32
    %32 = vector.broadcast %cst_9 : f32 to vector<8x1xf32>
    %33 = vector.extract_strided_slice %23 {offsets = [0, 1], sizes = [8, 63], strides = [1, 1]} : vector<8x64xf32> to vector<8x63xf32>
    %34 = tpu.concatenate %33, %32 in 1 : vector<8x63xf32>, vector<8x1xf32> -> vector<8x64xf32>
    %cst_10 = arith.constant 0.000000e+00 : f32
    %35 = vector.shape_cast %20 : vector<1x64xi1> to vector<1x64xi1>
    %36 = vector.broadcast %35 : vector<1x64xi1> to vector<8x64xi1>
    %37 = vector.broadcast %cst_10 : f32 to vector<8x64xf32>
    %38 = arith.select %36, %34, %37 : vector<8x64xi1>, vector<8x64xf32>
    %39 = tpu.concatenate %31, %23, %38 in 0 : vector<8x64xf32>, vector<8x64xf32>, vector<8x64xf32> -> vector<24x64xf32>
    %cst_11 = arith.constant 0.000000e+00 : f32
    %40 = vector.broadcast %cst_11 : f32 to vector<24x8xf32>
    %41 = vector.extract_strided_slice %39 {offsets = [0, 0], sizes = [24, 56], strides = [1, 1]} : vector<24x64xf32> to vector<24x56xf32>
    %42 = tpu.concatenate %40, %41 in 1 : vector<24x8xf32>, vector<24x56xf32> -> vector<24x64xf32>
    %cst_12 = arith.constant 0.000000e+00 : f32
    %43 = vector.broadcast %cst_12 : f32 to vector<24x8xf32>
    %44 = vector.extract_strided_slice %39 {offsets = [0, 8], sizes = [24, 56], strides = [1, 1]} : vector<24x64xf32> to vector<24x56xf32>
    %45 = tpu.concatenate %44, %43 in 1 : vector<24x56xf32>, vector<24x8xf32> -> vector<24x64xf32>
    %46 = tpu.concatenate %42, %39, %45 in 0 : vector<24x64xf32>, vector<24x64xf32>, vector<24x64xf32> -> vector<72x64xf32>
    %c0_13 = arith.constant 0 : index
    %c0_14 = arith.constant 0 : index
    %47 = vector.load %arg2[%c0_13, %c0_14] : memref<16x72xbf16, #tpu.memory_space<vmem>>, vector<16x72xbf16>
    %48 = arith.truncf %46 : vector<72x64xf32> to vector<72x64xbf16>
    %cst_15 = arith.constant dense<0.000000e+00> : vector<16x64xf32>
    %49 = tpu.matmul %47, %48, %cst_15 {dimension_numbers = #tpu.dot_dimension_numbers<[1], [0], [0], [1], [0, 0, 1, 1], [], []>} : vector<16x72xbf16>, vector<72x64xbf16>, vector<16x64xf32> -> vector<16x64xf32>
    %50 = vector.extract_strided_slice %24 {offsets = [0, 0], sizes = [16, 1], strides = [1, 1]} : vector<16x8xf32> to vector<16x1xf32>
    %51 = vector.broadcast %50 : vector<16x1xf32> to vector<16x64xf32>
    %52 = arith.addf %49, %51 : vector<16x64xf32>
    %53 = vector.extract_strided_slice %24 {offsets = [0, 1], sizes = [16, 1], strides = [1, 1]} : vector<16x8xf32> to vector<16x1xf32>
    %54 = vector.extract_strided_slice %24 {offsets = [0, 2], sizes = [16, 1], strides = [1, 1]} : vector<16x8xf32> to vector<16x1xf32>
    %cst_16 = arith.constant 0.000000e+00 : f32
    %55 = vector.broadcast %cst_16 : f32 to vector<16x64xf32>
    %56 = arith.cmpf oge, %52, %55 : vector<16x64xf32>
    %cst_17 = arith.constant 0.00999999977 : f32
    %57 = vector.broadcast %cst_17 : f32 to vector<16x64xf32>
    %58 = arith.mulf %57, %52 : vector<16x64xf32>
    %59 = arith.select %56, %52, %58 : vector<16x64xi1>, vector<16x64xf32>
    %cst_18 = arith.constant dense<0.000000e+00> : vector<16xf32>
    %60 = vector.multi_reduction <add>, %59, %cst_18 [1] : vector<16x64xf32> to vector<16xf32>
    %61 = vector.shape_cast %60 : vector<16xf32> to vector<16x1xf32>
    %cst_19 = arith.constant 6.400000e+01 : f32
    %62 = vector.broadcast %cst_19 : f32 to vector<16x1xf32>
    %63 = arith.divf %61, %62 : vector<16x1xf32>
    %64 = vector.broadcast %63 : vector<16x1xf32> to vector<16x64xf32>
    %65 = arith.subf %59, %64 : vector<16x64xf32>
    %66 = arith.mulf %65, %65 : vector<16x64xf32>
    %cst_20 = arith.constant dense<0.000000e+00> : vector<16xf32>
    %67 = vector.multi_reduction <add>, %66, %cst_20 [1] : vector<16x64xf32> to vector<16xf32>
    %68 = vector.shape_cast %67 : vector<16xf32> to vector<16x1xf32>
    %cst_21 = arith.constant 6.400000e+01 : f32
    %69 = vector.broadcast %cst_21 : f32 to vector<16x1xf32>
    %70 = arith.divf %68, %69 : vector<16x1xf32>
    %71 = vector.broadcast %63 : vector<16x1xf32> to vector<16x64xf32>
    %72 = arith.subf %59, %71 : vector<16x64xf32>
    %cst_22 = arith.constant 9.99999974E-6 : f32
    %73 = vector.broadcast %cst_22 : f32 to vector<16x1xf32>
    %74 = arith.addf %70, %73 : vector<16x1xf32>
    %75 = math.rsqrt %74 : vector<16x1xf32>
    %76 = vector.broadcast %75 : vector<16x1xf32> to vector<16x64xf32>
    %77 = arith.mulf %72, %76 : vector<16x64xf32>
    %78 = vector.broadcast %53 : vector<16x1xf32> to vector<16x64xf32>
    %79 = arith.mulf %77, %78 : vector<16x64xf32>
    %80 = vector.broadcast %54 : vector<16x1xf32> to vector<16x64xf32>
    %81 = arith.addf %79, %80 : vector<16x64xf32>
    %cst_23 = arith.constant 0.000000e+00 : f32
    %82 = vector.broadcast %cst_23 : f32 to vector<16x1xf32>
    %83 = vector.extract_strided_slice %81 {offsets = [0, 0], sizes = [16, 63], strides = [1, 1]} : vector<16x64xf32> to vector<16x63xf32>
    %84 = tpu.concatenate %82, %83 in 1 : vector<16x1xf32>, vector<16x63xf32> -> vector<16x64xf32>
    %cst_24 = arith.constant 0.000000e+00 : f32
    %85 = vector.shape_cast %18 : vector<1x64xi1> to vector<1x64xi1>
    %86 = vector.broadcast %85 : vector<1x64xi1> to vector<16x64xi1>
    %87 = vector.broadcast %cst_24 : f32 to vector<16x64xf32>
    %88 = arith.select %86, %84, %87 : vector<16x64xi1>, vector<16x64xf32>
    %cst_25 = arith.constant 0.000000e+00 : f32
    %89 = vector.broadcast %cst_25 : f32 to vector<16x1xf32>
    %90 = vector.extract_strided_slice %81 {offsets = [0, 1], sizes = [16, 63], strides = [1, 1]} : vector<16x64xf32> to vector<16x63xf32>
    %91 = tpu.concatenate %90, %89 in 1 : vector<16x63xf32>, vector<16x1xf32> -> vector<16x64xf32>
    %cst_26 = arith.constant 0.000000e+00 : f32
    %92 = vector.shape_cast %20 : vector<1x64xi1> to vector<1x64xi1>
    %93 = vector.broadcast %92 : vector<1x64xi1> to vector<16x64xi1>
    %94 = vector.broadcast %cst_26 : f32 to vector<16x64xf32>
    %95 = arith.select %93, %91, %94 : vector<16x64xi1>, vector<16x64xf32>
    %96 = tpu.concatenate %88, %81, %95 in 0 : vector<16x64xf32>, vector<16x64xf32>, vector<16x64xf32> -> vector<48x64xf32>
    %cst_27 = arith.constant 0.000000e+00 : f32
    %97 = vector.broadcast %cst_27 : f32 to vector<48x8xf32>
    %98 = vector.extract_strided_slice %96 {offsets = [0, 0], sizes = [48, 56], strides = [1, 1]} : vector<48x64xf32> to vector<48x56xf32>
    %99 = tpu.concatenate %97, %98 in 1 : vector<48x8xf32>, vector<48x56xf32> -> vector<48x64xf32>
    %cst_28 = arith.constant 0.000000e+00 : f32
    %100 = vector.broadcast %cst_28 : f32 to vector<48x8xf32>
    %101 = vector.extract_strided_slice %96 {offsets = [0, 8], sizes = [48, 56], strides = [1, 1]} : vector<48x64xf32> to vector<48x56xf32>
    %102 = tpu.concatenate %101, %100 in 1 : vector<48x56xf32>, vector<48x8xf32> -> vector<48x64xf32>
    %103 = tpu.concatenate %99, %96, %102 in 0 : vector<48x64xf32>, vector<48x64xf32>, vector<48x64xf32> -> vector<144x64xf32>
    %c0_29 = arith.constant 0 : index
    %c0_30 = arith.constant 0 : index
    %104 = vector.load %arg3[%c0_29, %c0_30] : memref<16x144xbf16, #tpu.memory_space<vmem>>, vector<16x144xbf16>
    %105 = arith.truncf %103 : vector<144x64xf32> to vector<144x64xbf16>
    %cst_31 = arith.constant dense<0.000000e+00> : vector<16x64xf32>
    %106 = tpu.matmul %104, %105, %cst_31 {dimension_numbers = #tpu.dot_dimension_numbers<[1], [0], [0], [1], [0, 0, 1, 1], [], []>} : vector<16x144xbf16>, vector<144x64xbf16>, vector<16x64xf32> -> vector<16x64xf32>
    %107 = vector.extract_strided_slice %24 {offsets = [0, 3], sizes = [16, 1], strides = [1, 1]} : vector<16x8xf32> to vector<16x1xf32>
    %108 = vector.broadcast %107 : vector<16x1xf32> to vector<16x64xf32>
    %109 = arith.addf %106, %108 : vector<16x64xf32>
    %110 = vector.extract_strided_slice %24 {offsets = [0, 4], sizes = [16, 1], strides = [1, 1]} : vector<16x8xf32> to vector<16x1xf32>
    %111 = vector.extract_strided_slice %24 {offsets = [0, 5], sizes = [16, 1], strides = [1, 1]} : vector<16x8xf32> to vector<16x1xf32>
    %cst_32 = arith.constant 0.000000e+00 : f32
    %112 = vector.broadcast %cst_32 : f32 to vector<16x64xf32>
    %113 = arith.cmpf oge, %109, %112 : vector<16x64xf32>
    %cst_33 = arith.constant 0.00999999977 : f32
    %114 = vector.broadcast %cst_33 : f32 to vector<16x64xf32>
    %115 = arith.mulf %114, %109 : vector<16x64xf32>
    %116 = arith.select %113, %109, %115 : vector<16x64xi1>, vector<16x64xf32>
    %cst_34 = arith.constant dense<0.000000e+00> : vector<16xf32>
    %117 = vector.multi_reduction <add>, %116, %cst_34 [1] : vector<16x64xf32> to vector<16xf32>
    %118 = vector.shape_cast %117 : vector<16xf32> to vector<16x1xf32>
    %cst_35 = arith.constant 6.400000e+01 : f32
    %119 = vector.broadcast %cst_35 : f32 to vector<16x1xf32>
    %120 = arith.divf %118, %119 : vector<16x1xf32>
    %121 = vector.broadcast %120 : vector<16x1xf32> to vector<16x64xf32>
    %122 = arith.subf %116, %121 : vector<16x64xf32>
    %123 = arith.mulf %122, %122 : vector<16x64xf32>
    %cst_36 = arith.constant dense<0.000000e+00> : vector<16xf32>
    %124 = vector.multi_reduction <add>, %123, %cst_36 [1] : vector<16x64xf32> to vector<16xf32>
    %125 = vector.shape_cast %124 : vector<16xf32> to vector<16x1xf32>
    %cst_37 = arith.constant 6.400000e+01 : f32
    %126 = vector.broadcast %cst_37 : f32 to vector<16x1xf32>
    %127 = arith.divf %125, %126 : vector<16x1xf32>
    %128 = vector.broadcast %120 : vector<16x1xf32> to vector<16x64xf32>
    %129 = arith.subf %116, %128 : vector<16x64xf32>
    %cst_38 = arith.constant 9.99999974E-6 : f32
    %130 = vector.broadcast %cst_38 : f32 to vector<16x1xf32>
    %131 = arith.addf %127, %130 : vector<16x1xf32>
    %132 = math.rsqrt %131 : vector<16x1xf32>
    %133 = vector.broadcast %132 : vector<16x1xf32> to vector<16x64xf32>
    %134 = arith.mulf %129, %133 : vector<16x64xf32>
    %135 = vector.broadcast %110 : vector<16x1xf32> to vector<16x64xf32>
    %136 = arith.mulf %134, %135 : vector<16x64xf32>
    %137 = vector.broadcast %111 : vector<16x1xf32> to vector<16x64xf32>
    %138 = arith.addf %136, %137 : vector<16x64xf32>
    %139 = arith.truncf %138 : vector<16x64xf32> to vector<16x64xbf16>
    %c0_39 = arith.constant 0 : index
    %c0_40 = arith.constant 0 : index
    %c0_41 = arith.constant 0 : index
    %140 = vector.load %arg5[%c0_39, %c0_40, %c0_41] : memref<1x16x64xbf16, #tpu.memory_space<vmem>>, vector<1x16x64xbf16>
    %141 = vector.shape_cast %140 : vector<1x16x64xbf16> to vector<16x64xbf16>
    %142 = vector.shape_cast %139 : vector<16x64xbf16> to vector<1x16x64xbf16>
    tpu.vector_store %arg5[%c0_39, %c0_40, %c0_41], %142 {strides = array<i32>} : memref<1x16x64xbf16, #tpu.memory_space<vmem>>, vector<1x16x64xbf16>,
    %cst_42 = arith.constant 0.000000e+00 : f32
    %143 = vector.broadcast %cst_42 : f32 to vector<16x1xf32>
    %144 = vector.extract_strided_slice %138 {offsets = [0, 1], sizes = [16, 63], strides = [1, 1]} : vector<16x64xf32> to vector<16x63xf32>
    %145 = tpu.concatenate %144, %143 in 1 : vector<16x63xf32>, vector<16x1xf32> -> vector<16x64xf32>
    %146 = arith.maximumf %138, %145 : vector<16x64xf32>
    %cst_43 = arith.constant 0.000000e+00 : f32
    %147 = vector.broadcast %cst_43 : f32 to vector<16x8xf32>
    %148 = vector.extract_strided_slice %146 {offsets = [0, 8], sizes = [16, 56], strides = [1, 1]} : vector<16x64xf32> to vector<16x56xf32>
    %149 = tpu.concatenate %148, %147 in 1 : vector<16x56xf32>, vector<16x8xf32> -> vector<16x64xf32>
    %150 = arith.maximumf %146, %149 : vector<16x64xf32>
    %151 = vector.extract_strided_slice %150 {offsets = [0, 0], sizes = [16, 8], strides = [1, 1]} : vector<16x64xf32> to vector<16x8xf32>
    %152 = vector.extract_strided_slice %150 {offsets = [0, 16], sizes = [16, 8], strides = [1, 1]} : vector<16x64xf32> to vector<16x8xf32>
    %153 = vector.extract_strided_slice %150 {offsets = [0, 32], sizes = [16, 8], strides = [1, 1]} : vector<16x64xf32> to vector<16x8xf32>
    %154 = vector.extract_strided_slice %150 {offsets = [0, 48], sizes = [16, 8], strides = [1, 1]} : vector<16x64xf32> to vector<16x8xf32>
    %155 = tpu.concatenate %151, %152, %153, %154 in 1 : vector<16x8xf32>, vector<16x8xf32>, vector<16x8xf32>, vector<16x8xf32> -> vector<16x32xf32>
    %156 = arith.truncf %155 : vector<16x32xf32> to vector<16x32xbf16>
    %c0_44 = arith.constant 0 : index
    %c0_45 = arith.constant 0 : index
    %c0_46 = arith.constant 0 : index
    %157 = vector.load %arg6[%c0_44, %c0_45, %c0_46] : memref<1x16x32xbf16, #tpu.memory_space<vmem>>, vector<1x16x32xbf16>
    %158 = vector.shape_cast %157 : vector<1x16x32xbf16> to vector<16x32xbf16>
    %159 = vector.shape_cast %156 : vector<16x32xbf16> to vector<1x16x32xbf16>
    tpu.vector_store %arg6[%c0_44, %c0_45, %c0_46], %159 {strides = array<i32>} : memref<1x16x32xbf16, #tpu.memory_space<vmem>>, vector<1x16x32xbf16>,
    return
  }
  func.func @transform_0(%arg0: i32) -> (i32, i32, i32) {
    %c0_i32 = arith.constant 0 : i32
    %c0_i32_0 = arith.constant 0 : i32
    %c0_i32_1 = arith.constant 0 : i32
    return %arg0, %c0_i32, %c0_i32_0 : i32, i32, i32
  }
  func.func @transform_1(%arg0: i32) -> (i32, i32) {
    %c0_i32 = arith.constant 0 : i32
    %c0_i32_0 = arith.constant 0 : i32
    %c0_i32_1 = arith.constant 0 : i32
    return %c0_i32, %c0_i32_0 : i32, i32
  }
  func.func @transform_2(%arg0: i32) -> (i32, i32) {
    %c0_i32 = arith.constant 0 : i32
    %c0_i32_0 = arith.constant 0 : i32
    %c0_i32_1 = arith.constant 0 : i32
    return %c0_i32, %c0_i32_0 : i32, i32
  }
  func.func @transform_3(%arg0: i32) -> (i32, i32) {
    %c0_i32 = arith.constant 0 : i32
    %c0_i32_0 = arith.constant 0 : i32
    %c0_i32_1 = arith.constant 0 : i32
    return %c0_i32, %c0_i32_0 : i32, i32
  }
  func.func @transform_4(%arg0: i32) -> (i32, i32, i32) {
    %c0_i32 = arith.constant 0 : i32
    %c0_i32_0 = arith.constant 0 : i32
    %c0_i32_1 = arith.constant 0 : i32
    return %arg0, %c0_i32, %c0_i32_0 : i32, i32, i32
  }
  func.func @transform_5(%arg0: i32) -> (i32, i32, i32) {
    %c0_i32 = arith.constant 0 : i32
    %c0_i32_0 = arith.constant 0 : i32
    %c0_i32_1 = arith.constant 0 : i32
    return %arg0, %c0_i32, %c0_i32_0 : i32, i32, i32
  }
}

module attributes {stable_mosaic.version = 11 : i64} {
  func.func @_down_block_kernel(%arg0: i32, %arg1: memref<1x16x16xbf16, #tpu.memory_space<vmem>>, %arg2: memref<32x144xbf16, #tpu.memory_space<vmem>>, %arg3: memref<32x288xbf16, #tpu.memory_space<vmem>>, %arg4: memref<32x8xf32, #tpu.memory_space<vmem>>, %arg5: memref<1x32x16xbf16, #tpu.memory_space<vmem>>) attributes {dimension_semantics = [#tpu.dimension_semantics<parallel>], iteration_bounds = array<i64: 2>, scalar_prefetch = 0 : i64, scratch_operands = 0 : i64, tpu.core_type = #tpu.core_type<tc>, window_params = [{transform_indices = @transform_0, window_bounds = array<i64: 1, 16, 16>}, {pipeline_mode = #tpu.pipeline_mode<synchronous>, transform_indices = @transform_1, window_bounds = array<i64: 32, 144>}, {pipeline_mode = #tpu.pipeline_mode<synchronous>, transform_indices = @transform_2, window_bounds = array<i64: 32, 288>}, {pipeline_mode = #tpu.pipeline_mode<synchronous>, transform_indices = @transform_3, window_bounds = array<i64: 32, 8>}, {transform_indices = @transform_4, window_bounds = array<i64: 1, 32, 16>}]} {
    %0 = tpu.iota {dimensions = array<i32: 1>} : vector<1x16xi32>
    %c4_i32 = arith.constant 4 : i32
    %c0_i32 = arith.constant 0 : i32
    %1 = arith.cmpi eq, %c4_i32, %c0_i32 : i32
    %c1_i32 = arith.constant 1 : i32
    %2 = arith.select %1, %c1_i32, %c4_i32 : i32
    %3 = vector.broadcast %2 : i32 to vector<1x16xi32>
    %4 = arith.remsi %0, %3 : vector<1x16xi32>
    %c0_i32_0 = arith.constant 0 : i32
    %5 = vector.broadcast %c0_i32_0 : i32 to vector<1x16xi32>
    %6 = arith.cmpi ne, %4, %5 : vector<1x16xi32>
    %c0_i32_1 = arith.constant 0 : i32
    %7 = vector.broadcast %c0_i32_1 : i32 to vector<1x16xi32>
    %8 = arith.cmpi slt, %4, %7 : vector<1x16xi32>
    %c0_i32_2 = arith.constant 0 : i32
    %9 = arith.cmpi slt, %2, %c0_i32_2 : i32
    %10 = vector.broadcast %9 : i1 to vector<1x16xi1>
    %11 = vector.broadcast %10 : vector<1x16xi1> to vector<1x16xi1>
    %12 = arith.xori %8, %11 : vector<1x16xi1>
    %13 = arith.andi %12, %6 : vector<1x16xi1>
    %14 = vector.broadcast %2 : i32 to vector<1x16xi32>
    %15 = arith.addi %4, %14 : vector<1x16xi32>
    %16 = arith.select %13, %15, %4 : vector<1x16xi1>, vector<1x16xi32>
    %c1_i32_3 = arith.constant 1 : i32
    %17 = vector.broadcast %c1_i32_3 : i32 to vector<1x16xi32>
    %18 = arith.cmpi sge, %16, %17 : vector<1x16xi32>
    %c2_i32 = arith.constant 2 : i32
    %19 = vector.broadcast %c2_i32 : i32 to vector<1x16xi32>
    %20 = arith.cmpi sle, %16, %19 : vector<1x16xi32>
    %c0 = arith.constant 0 : index
    %c0_4 = arith.constant 0 : index
    %c0_5 = arith.constant 0 : index
    %21 = vector.load %arg1[%c0, %c0_4, %c0_5] : memref<1x16x16xbf16, #tpu.memory_space<vmem>>, vector<1x16x16xbf16>
    %22 = vector.shape_cast %21 : vector<1x16x16xbf16> to vector<16x16xbf16>
    %23 = arith.extf %22 : vector<16x16xbf16> to vector<16x16xf32>
    %c0_6 = arith.constant 0 : index
    %c0_7 = arith.constant 0 : index
    %24 = vector.load %arg4[%c0_6, %c0_7] : memref<32x8xf32, #tpu.memory_space<vmem>>, vector<32x8xf32>
    %cst = arith.constant 0.000000e+00 : f32
    %25 = vector.broadcast %cst : f32 to vector<16x1xf32>
    %26 = vector.extract_strided_slice %23 {offsets = [0, 0], sizes = [16, 15], strides = [1, 1]} : vector<16x16xf32> to vector<16x15xf32>
    %27 = tpu.concatenate %25, %26 in 1 : vector<16x1xf32>, vector<16x15xf32> -> vector<16x16xf32>
    %cst_8 = arith.constant 0.000000e+00 : f32
    %28 = vector.shape_cast %18 : vector<1x16xi1> to vector<1x16xi1>
    %29 = vector.broadcast %28 : vector<1x16xi1> to vector<16x16xi1>
    %30 = vector.broadcast %cst_8 : f32 to vector<16x16xf32>
    %31 = arith.select %29, %27, %30 : vector<16x16xi1>, vector<16x16xf32>
    %cst_9 = arith.constant 0.000000e+00 : f32
    %32 = vector.broadcast %cst_9 : f32 to vector<16x1xf32>
    %33 = vector.extract_strided_slice %23 {offsets = [0, 1], sizes = [16, 15], strides = [1, 1]} : vector<16x16xf32> to vector<16x15xf32>
    %34 = tpu.concatenate %33, %32 in 1 : vector<16x15xf32>, vector<16x1xf32> -> vector<16x16xf32>
    %cst_10 = arith.constant 0.000000e+00 : f32
    %35 = vector.shape_cast %20 : vector<1x16xi1> to vector<1x16xi1>
    %36 = vector.broadcast %35 : vector<1x16xi1> to vector<16x16xi1>
    %37 = vector.broadcast %cst_10 : f32 to vector<16x16xf32>
    %38 = arith.select %36, %34, %37 : vector<16x16xi1>, vector<16x16xf32>
    %39 = tpu.concatenate %31, %23, %38 in 0 : vector<16x16xf32>, vector<16x16xf32>, vector<16x16xf32> -> vector<48x16xf32>
    %cst_11 = arith.constant 0.000000e+00 : f32
    %40 = vector.broadcast %cst_11 : f32 to vector<48x4xf32>
    %41 = vector.extract_strided_slice %39 {offsets = [0, 0], sizes = [48, 12], strides = [1, 1]} : vector<48x16xf32> to vector<48x12xf32>
    %42 = tpu.concatenate %40, %41 in 1 : vector<48x4xf32>, vector<48x12xf32> -> vector<48x16xf32>
    %cst_12 = arith.constant 0.000000e+00 : f32
    %43 = vector.broadcast %cst_12 : f32 to vector<48x4xf32>
    %44 = vector.extract_strided_slice %39 {offsets = [0, 4], sizes = [48, 12], strides = [1, 1]} : vector<48x16xf32> to vector<48x12xf32>
    %45 = tpu.concatenate %44, %43 in 1 : vector<48x12xf32>, vector<48x4xf32> -> vector<48x16xf32>
    %46 = tpu.concatenate %42, %39, %45 in 0 : vector<48x16xf32>, vector<48x16xf32>, vector<48x16xf32> -> vector<144x16xf32>
    %c0_13 = arith.constant 0 : index
    %c0_14 = arith.constant 0 : index
    %47 = vector.load %arg2[%c0_13, %c0_14] : memref<32x144xbf16, #tpu.memory_space<vmem>>, vector<32x144xbf16>
    %48 = arith.truncf %46 : vector<144x16xf32> to vector<144x16xbf16>
    %cst_15 = arith.constant dense<0.000000e+00> : vector<32x16xf32>
    %49 = tpu.matmul %47, %48, %cst_15 {dimension_numbers = #tpu.dot_dimension_numbers<[1], [0], [0], [1], [0, 0, 1, 1], [], []>} : vector<32x144xbf16>, vector<144x16xbf16>, vector<32x16xf32> -> vector<32x16xf32>
    %50 = vector.extract_strided_slice %24 {offsets = [0, 0], sizes = [32, 1], strides = [1, 1]} : vector<32x8xf32> to vector<32x1xf32>
    %51 = vector.broadcast %50 : vector<32x1xf32> to vector<32x16xf32>
    %52 = arith.addf %49, %51 : vector<32x16xf32>
    %53 = vector.extract_strided_slice %24 {offsets = [0, 1], sizes = [32, 1], strides = [1, 1]} : vector<32x8xf32> to vector<32x1xf32>
    %54 = vector.extract_strided_slice %24 {offsets = [0, 2], sizes = [32, 1], strides = [1, 1]} : vector<32x8xf32> to vector<32x1xf32>
    %cst_16 = arith.constant 0.000000e+00 : f32
    %55 = vector.broadcast %cst_16 : f32 to vector<32x16xf32>
    %56 = arith.cmpf oge, %52, %55 : vector<32x16xf32>
    %cst_17 = arith.constant 0.00999999977 : f32
    %57 = vector.broadcast %cst_17 : f32 to vector<32x16xf32>
    %58 = arith.mulf %57, %52 : vector<32x16xf32>
    %59 = arith.select %56, %52, %58 : vector<32x16xi1>, vector<32x16xf32>
    %cst_18 = arith.constant dense<0.000000e+00> : vector<32xf32>
    %60 = vector.multi_reduction <add>, %59, %cst_18 [1] : vector<32x16xf32> to vector<32xf32>
    %61 = vector.shape_cast %60 : vector<32xf32> to vector<32x1xf32>
    %cst_19 = arith.constant 1.600000e+01 : f32
    %62 = vector.broadcast %cst_19 : f32 to vector<32x1xf32>
    %63 = arith.divf %61, %62 : vector<32x1xf32>
    %64 = vector.broadcast %63 : vector<32x1xf32> to vector<32x16xf32>
    %65 = arith.subf %59, %64 : vector<32x16xf32>
    %66 = arith.mulf %65, %65 : vector<32x16xf32>
    %cst_20 = arith.constant dense<0.000000e+00> : vector<32xf32>
    %67 = vector.multi_reduction <add>, %66, %cst_20 [1] : vector<32x16xf32> to vector<32xf32>
    %68 = vector.shape_cast %67 : vector<32xf32> to vector<32x1xf32>
    %cst_21 = arith.constant 1.600000e+01 : f32
    %69 = vector.broadcast %cst_21 : f32 to vector<32x1xf32>
    %70 = arith.divf %68, %69 : vector<32x1xf32>
    %71 = vector.broadcast %63 : vector<32x1xf32> to vector<32x16xf32>
    %72 = arith.subf %59, %71 : vector<32x16xf32>
    %cst_22 = arith.constant 9.99999974E-6 : f32
    %73 = vector.broadcast %cst_22 : f32 to vector<32x1xf32>
    %74 = arith.addf %70, %73 : vector<32x1xf32>
    %75 = math.rsqrt %74 : vector<32x1xf32>
    %76 = vector.broadcast %75 : vector<32x1xf32> to vector<32x16xf32>
    %77 = arith.mulf %72, %76 : vector<32x16xf32>
    %78 = vector.broadcast %53 : vector<32x1xf32> to vector<32x16xf32>
    %79 = arith.mulf %77, %78 : vector<32x16xf32>
    %80 = vector.broadcast %54 : vector<32x1xf32> to vector<32x16xf32>
    %81 = arith.addf %79, %80 : vector<32x16xf32>
    %cst_23 = arith.constant 0.000000e+00 : f32
    %82 = vector.broadcast %cst_23 : f32 to vector<32x1xf32>
    %83 = vector.extract_strided_slice %81 {offsets = [0, 0], sizes = [32, 15], strides = [1, 1]} : vector<32x16xf32> to vector<32x15xf32>
    %84 = tpu.concatenate %82, %83 in 1 : vector<32x1xf32>, vector<32x15xf32> -> vector<32x16xf32>
    %cst_24 = arith.constant 0.000000e+00 : f32
    %85 = vector.shape_cast %18 : vector<1x16xi1> to vector<1x16xi1>
    %86 = vector.broadcast %85 : vector<1x16xi1> to vector<32x16xi1>
    %87 = vector.broadcast %cst_24 : f32 to vector<32x16xf32>
    %88 = arith.select %86, %84, %87 : vector<32x16xi1>, vector<32x16xf32>
    %cst_25 = arith.constant 0.000000e+00 : f32
    %89 = vector.broadcast %cst_25 : f32 to vector<32x1xf32>
    %90 = vector.extract_strided_slice %81 {offsets = [0, 1], sizes = [32, 15], strides = [1, 1]} : vector<32x16xf32> to vector<32x15xf32>
    %91 = tpu.concatenate %90, %89 in 1 : vector<32x15xf32>, vector<32x1xf32> -> vector<32x16xf32>
    %cst_26 = arith.constant 0.000000e+00 : f32
    %92 = vector.shape_cast %20 : vector<1x16xi1> to vector<1x16xi1>
    %93 = vector.broadcast %92 : vector<1x16xi1> to vector<32x16xi1>
    %94 = vector.broadcast %cst_26 : f32 to vector<32x16xf32>
    %95 = arith.select %93, %91, %94 : vector<32x16xi1>, vector<32x16xf32>
    %96 = tpu.concatenate %88, %81, %95 in 0 : vector<32x16xf32>, vector<32x16xf32>, vector<32x16xf32> -> vector<96x16xf32>
    %cst_27 = arith.constant 0.000000e+00 : f32
    %97 = vector.broadcast %cst_27 : f32 to vector<96x4xf32>
    %98 = vector.extract_strided_slice %96 {offsets = [0, 0], sizes = [96, 12], strides = [1, 1]} : vector<96x16xf32> to vector<96x12xf32>
    %99 = tpu.concatenate %97, %98 in 1 : vector<96x4xf32>, vector<96x12xf32> -> vector<96x16xf32>
    %cst_28 = arith.constant 0.000000e+00 : f32
    %100 = vector.broadcast %cst_28 : f32 to vector<96x4xf32>
    %101 = vector.extract_strided_slice %96 {offsets = [0, 4], sizes = [96, 12], strides = [1, 1]} : vector<96x16xf32> to vector<96x12xf32>
    %102 = tpu.concatenate %101, %100 in 1 : vector<96x12xf32>, vector<96x4xf32> -> vector<96x16xf32>
    %103 = tpu.concatenate %99, %96, %102 in 0 : vector<96x16xf32>, vector<96x16xf32>, vector<96x16xf32> -> vector<288x16xf32>
    %c0_29 = arith.constant 0 : index
    %c0_30 = arith.constant 0 : index
    %104 = vector.load %arg3[%c0_29, %c0_30] : memref<32x288xbf16, #tpu.memory_space<vmem>>, vector<32x288xbf16>
    %105 = arith.truncf %103 : vector<288x16xf32> to vector<288x16xbf16>
    %cst_31 = arith.constant dense<0.000000e+00> : vector<32x16xf32>
    %106 = tpu.matmul %104, %105, %cst_31 {dimension_numbers = #tpu.dot_dimension_numbers<[1], [0], [0], [1], [0, 0, 1, 1], [], []>} : vector<32x288xbf16>, vector<288x16xbf16>, vector<32x16xf32> -> vector<32x16xf32>
    %107 = vector.extract_strided_slice %24 {offsets = [0, 3], sizes = [32, 1], strides = [1, 1]} : vector<32x8xf32> to vector<32x1xf32>
    %108 = vector.broadcast %107 : vector<32x1xf32> to vector<32x16xf32>
    %109 = arith.addf %106, %108 : vector<32x16xf32>
    %110 = vector.extract_strided_slice %24 {offsets = [0, 4], sizes = [32, 1], strides = [1, 1]} : vector<32x8xf32> to vector<32x1xf32>
    %111 = vector.extract_strided_slice %24 {offsets = [0, 5], sizes = [32, 1], strides = [1, 1]} : vector<32x8xf32> to vector<32x1xf32>
    %cst_32 = arith.constant 0.000000e+00 : f32
    %112 = vector.broadcast %cst_32 : f32 to vector<32x16xf32>
    %113 = arith.cmpf oge, %109, %112 : vector<32x16xf32>
    %cst_33 = arith.constant 0.00999999977 : f32
    %114 = vector.broadcast %cst_33 : f32 to vector<32x16xf32>
    %115 = arith.mulf %114, %109 : vector<32x16xf32>
    %116 = arith.select %113, %109, %115 : vector<32x16xi1>, vector<32x16xf32>
    %cst_34 = arith.constant dense<0.000000e+00> : vector<32xf32>
    %117 = vector.multi_reduction <add>, %116, %cst_34 [1] : vector<32x16xf32> to vector<32xf32>
    %118 = vector.shape_cast %117 : vector<32xf32> to vector<32x1xf32>
    %cst_35 = arith.constant 1.600000e+01 : f32
    %119 = vector.broadcast %cst_35 : f32 to vector<32x1xf32>
    %120 = arith.divf %118, %119 : vector<32x1xf32>
    %121 = vector.broadcast %120 : vector<32x1xf32> to vector<32x16xf32>
    %122 = arith.subf %116, %121 : vector<32x16xf32>
    %123 = arith.mulf %122, %122 : vector<32x16xf32>
    %cst_36 = arith.constant dense<0.000000e+00> : vector<32xf32>
    %124 = vector.multi_reduction <add>, %123, %cst_36 [1] : vector<32x16xf32> to vector<32xf32>
    %125 = vector.shape_cast %124 : vector<32xf32> to vector<32x1xf32>
    %cst_37 = arith.constant 1.600000e+01 : f32
    %126 = vector.broadcast %cst_37 : f32 to vector<32x1xf32>
    %127 = arith.divf %125, %126 : vector<32x1xf32>
    %128 = vector.broadcast %120 : vector<32x1xf32> to vector<32x16xf32>
    %129 = arith.subf %116, %128 : vector<32x16xf32>
    %cst_38 = arith.constant 9.99999974E-6 : f32
    %130 = vector.broadcast %cst_38 : f32 to vector<32x1xf32>
    %131 = arith.addf %127, %130 : vector<32x1xf32>
    %132 = math.rsqrt %131 : vector<32x1xf32>
    %133 = vector.broadcast %132 : vector<32x1xf32> to vector<32x16xf32>
    %134 = arith.mulf %129, %133 : vector<32x16xf32>
    %135 = vector.broadcast %110 : vector<32x1xf32> to vector<32x16xf32>
    %136 = arith.mulf %134, %135 : vector<32x16xf32>
    %137 = vector.broadcast %111 : vector<32x1xf32> to vector<32x16xf32>
    %138 = arith.addf %136, %137 : vector<32x16xf32>
    %139 = arith.truncf %138 : vector<32x16xf32> to vector<32x16xbf16>
    %c0_39 = arith.constant 0 : index
    %c0_40 = arith.constant 0 : index
    %c0_41 = arith.constant 0 : index
    %140 = vector.load %arg5[%c0_39, %c0_40, %c0_41] : memref<1x32x16xbf16, #tpu.memory_space<vmem>>, vector<1x32x16xbf16>
    %141 = vector.shape_cast %140 : vector<1x32x16xbf16> to vector<32x16xbf16>
    %142 = vector.shape_cast %139 : vector<32x16xbf16> to vector<1x32x16xbf16>
    tpu.vector_store %arg5[%c0_39, %c0_40, %c0_41], %142 {strides = array<i32>} : memref<1x32x16xbf16, #tpu.memory_space<vmem>>, vector<1x32x16xbf16>,
    return
  }
  func.func @transform_0(%arg0: i32) -> (i32, i32, i32) {
    %c0_i32 = arith.constant 0 : i32
    %c0_i32_0 = arith.constant 0 : i32
    %c0_i32_1 = arith.constant 0 : i32
    return %arg0, %c0_i32, %c0_i32_0 : i32, i32, i32
  }
  func.func @transform_1(%arg0: i32) -> (i32, i32) {
    %c0_i32 = arith.constant 0 : i32
    %c0_i32_0 = arith.constant 0 : i32
    %c0_i32_1 = arith.constant 0 : i32
    return %c0_i32, %c0_i32_0 : i32, i32
  }
  func.func @transform_2(%arg0: i32) -> (i32, i32) {
    %c0_i32 = arith.constant 0 : i32
    %c0_i32_0 = arith.constant 0 : i32
    %c0_i32_1 = arith.constant 0 : i32
    return %c0_i32, %c0_i32_0 : i32, i32
  }
  func.func @transform_3(%arg0: i32) -> (i32, i32) {
    %c0_i32 = arith.constant 0 : i32
    %c0_i32_0 = arith.constant 0 : i32
    %c0_i32_1 = arith.constant 0 : i32
    return %c0_i32, %c0_i32_0 : i32, i32
  }
  func.func @transform_4(%arg0: i32) -> (i32, i32, i32) {
    %c0_i32 = arith.constant 0 : i32
    %c0_i32_0 = arith.constant 0 : i32
    %c0_i32_1 = arith.constant 0 : i32
    return %arg0, %c0_i32, %c0_i32_0 : i32, i32, i32
  }
}

module attributes {stable_mosaic.version = 11 : i64} {
  func.func @_up_block_kernel(%arg0: i32, %arg1: memref<1x32x64xbf16, #tpu.memory_space<vmem>>, %arg2: memref<1x16x64xbf16, #tpu.memory_space<vmem>>, %arg3: memref<16x32xbf16, #tpu.memory_space<vmem>>, %arg4: memref<16x144xbf16, #tpu.memory_space<vmem>>, %arg5: memref<16x144xbf16, #tpu.memory_space<vmem>>, %arg6: memref<16x144xbf16, #tpu.memory_space<vmem>>, %arg7: memref<8x16xbf16, #tpu.memory_space<vmem>>, %arg8: memref<16x8xf32, #tpu.memory_space<vmem>>, %arg9: memref<1x16x64xbf16, #tpu.memory_space<vmem>>, %arg10: memref<1x8x64xf32, #tpu.memory_space<vmem>>) attributes {dimension_semantics = [#tpu.dimension_semantics<parallel>], iteration_bounds = array<i64: 2>, scalar_prefetch = 0 : i64, scratch_operands = 0 : i64, tpu.core_type = #tpu.core_type<tc>, window_params = [{transform_indices = @transform_0, window_bounds = array<i64: 1, 32, 64>}, {transform_indices = @transform_1, window_bounds = array<i64: 1, 16, 64>}, {pipeline_mode = #tpu.pipeline_mode<synchronous>, transform_indices = @transform_2, window_bounds = array<i64: 16, 32>}, {pipeline_mode = #tpu.pipeline_mode<synchronous>, transform_indices = @transform_3, window_bounds = array<i64: 16, 144>}, {pipeline_mode = #tpu.pipeline_mode<synchronous>, transform_indices = @transform_4, window_bounds = array<i64: 16, 144>}, {pipeline_mode = #tpu.pipeline_mode<synchronous>, transform_indices = @transform_5, window_bounds = array<i64: 16, 144>}, {pipeline_mode = #tpu.pipeline_mode<synchronous>, transform_indices = @transform_6, window_bounds = array<i64: 8, 16>}, {pipeline_mode = #tpu.pipeline_mode<synchronous>, transform_indices = @transform_7, window_bounds = array<i64: 16, 8>}, {transform_indices = @transform_8, window_bounds = array<i64: 1, 16, 64>}, {transform_indices = @transform_9, window_bounds = array<i64: 1, 8, 64>}]} {
    %0 = tpu.iota {dimensions = array<i32: 1>} : vector<1x64xi32>
    %c8_i32 = arith.constant 8 : i32
    %c0_i32 = arith.constant 0 : i32
    %1 = arith.cmpi eq, %c8_i32, %c0_i32 : i32
    %c1_i32 = arith.constant 1 : i32
    %2 = arith.select %1, %c1_i32, %c8_i32 : i32
    %3 = vector.broadcast %2 : i32 to vector<1x64xi32>
    %4 = arith.remsi %0, %3 : vector<1x64xi32>
    %c0_i32_0 = arith.constant 0 : i32
    %5 = vector.broadcast %c0_i32_0 : i32 to vector<1x64xi32>
    %6 = arith.cmpi ne, %4, %5 : vector<1x64xi32>
    %c0_i32_1 = arith.constant 0 : i32
    %7 = vector.broadcast %c0_i32_1 : i32 to vector<1x64xi32>
    %8 = arith.cmpi slt, %4, %7 : vector<1x64xi32>
    %c0_i32_2 = arith.constant 0 : i32
    %9 = arith.cmpi slt, %2, %c0_i32_2 : i32
    %10 = vector.broadcast %9 : i1 to vector<1x64xi1>
    %11 = vector.broadcast %10 : vector<1x64xi1> to vector<1x64xi1>
    %12 = arith.xori %8, %11 : vector<1x64xi1>
    %13 = arith.andi %12, %6 : vector<1x64xi1>
    %14 = vector.broadcast %2 : i32 to vector<1x64xi32>
    %15 = arith.addi %4, %14 : vector<1x64xi32>
    %16 = arith.select %13, %15, %4 : vector<1x64xi1>, vector<1x64xi32>
    %c1_i32_3 = arith.constant 1 : i32
    %17 = vector.broadcast %c1_i32_3 : i32 to vector<1x64xi32>
    %18 = arith.cmpi sge, %16, %17 : vector<1x64xi32>
    %c6_i32 = arith.constant 6 : i32
    %19 = vector.broadcast %c6_i32 : i32 to vector<1x64xi32>
    %20 = arith.cmpi sle, %16, %19 : vector<1x64xi32>
    %c0 = arith.constant 0 : index
    %c0_4 = arith.constant 0 : index
    %21 = vector.load %arg8[%c0, %c0_4] : memref<16x8xf32, #tpu.memory_space<vmem>>, vector<16x8xf32>
    %c0_5 = arith.constant 0 : index
    %c0_6 = arith.constant 0 : index
    %c0_7 = arith.constant 0 : index
    %22 = vector.load %arg2[%c0_5, %c0_6, %c0_7] : memref<1x16x64xbf16, #tpu.memory_space<vmem>>, vector<1x16x64xbf16>
    %23 = vector.shape_cast %22 : vector<1x16x64xbf16> to vector<16x64xbf16>
    %24 = arith.extf %23 : vector<16x64xbf16> to vector<16x64xf32>
    %c0_8 = arith.constant 0 : index
    %c0_9 = arith.constant 0 : index
    %25 = vector.load %arg3[%c0_8, %c0_9] : memref<16x32xbf16, #tpu.memory_space<vmem>>, vector<16x32xbf16>
    %c0_10 = arith.constant 0 : index
    %c0_11 = arith.constant 0 : index
    %c0_12 = arith.constant 0 : index
    %26 = vector.load %arg1[%c0_10, %c0_11, %c0_12] : memref<1x32x64xbf16, #tpu.memory_space<vmem>>, vector<1x32x64xbf16>
    %27 = vector.shape_cast %26 : vector<1x32x64xbf16> to vector<32x64xbf16>
    %cst = arith.constant dense<0.000000e+00> : vector<16x64xf32>
    %28 = tpu.matmul %25, %27, %cst {dimension_numbers = #tpu.dot_dimension_numbers<[1], [0], [0], [1], [0, 0, 1, 1], [], []>} : vector<16x32xbf16>, vector<32x64xbf16>, vector<16x64xf32> -> vector<16x64xf32>
    %29 = vector.extract_strided_slice %21 {offsets = [0, 0], sizes = [16, 1], strides = [1, 1]} : vector<16x8xf32> to vector<16x1xf32>
    %30 = vector.broadcast %29 : vector<16x1xf32> to vector<16x64xf32>
    %31 = arith.addf %28, %30 : vector<16x64xf32>
    %cst_13 = arith.constant 0.000000e+00 : f32
    %32 = vector.broadcast %cst_13 : f32 to vector<16x1xf32>
    %33 = vector.extract_strided_slice %31 {offsets = [0, 0], sizes = [16, 63], strides = [1, 1]} : vector<16x64xf32> to vector<16x63xf32>
    %34 = tpu.concatenate %32, %33 in 1 : vector<16x1xf32>, vector<16x63xf32> -> vector<16x64xf32>
    %cst_14 = arith.constant 0.000000e+00 : f32
    %35 = vector.shape_cast %18 : vector<1x64xi1> to vector<1x64xi1>
    %36 = vector.broadcast %35 : vector<1x64xi1> to vector<16x64xi1>
    %37 = vector.broadcast %cst_14 : f32 to vector<16x64xf32>
    %38 = arith.select %36, %34, %37 : vector<16x64xi1>, vector<16x64xf32>
    %cst_15 = arith.constant 0.000000e+00 : f32
    %39 = vector.broadcast %cst_15 : f32 to vector<16x1xf32>
    %40 = vector.extract_strided_slice %31 {offsets = [0, 1], sizes = [16, 63], strides = [1, 1]} : vector<16x64xf32> to vector<16x63xf32>
    %41 = tpu.concatenate %40, %39 in 1 : vector<16x63xf32>, vector<16x1xf32> -> vector<16x64xf32>
    %cst_16 = arith.constant 0.000000e+00 : f32
    %42 = vector.shape_cast %20 : vector<1x64xi1> to vector<1x64xi1>
    %43 = vector.broadcast %42 : vector<1x64xi1> to vector<16x64xi1>
    %44 = vector.broadcast %cst_16 : f32 to vector<16x64xf32>
    %45 = arith.select %43, %41, %44 : vector<16x64xi1>, vector<16x64xf32>
    %46 = tpu.concatenate %38, %31, %45 in 0 : vector<16x64xf32>, vector<16x64xf32>, vector<16x64xf32> -> vector<48x64xf32>
    %cst_17 = arith.constant 0.000000e+00 : f32
    %47 = vector.broadcast %cst_17 : f32 to vector<48x8xf32>
    %48 = vector.extract_strided_slice %46 {offsets = [0, 0], sizes = [48, 56], strides = [1, 1]} : vector<48x64xf32> to vector<48x56xf32>
    %49 = tpu.concatenate %47, %48 in 1 : vector<48x8xf32>, vector<48x56xf32> -> vector<48x64xf32>
    %cst_18 = arith.constant 0.000000e+00 : f32
    %50 = vector.broadcast %cst_18 : f32 to vector<48x8xf32>
    %51 = vector.extract_strided_slice %46 {offsets = [0, 8], sizes = [48, 56], strides = [1, 1]} : vector<48x64xf32> to vector<48x56xf32>
    %52 = tpu.concatenate %51, %50 in 1 : vector<48x56xf32>, vector<48x8xf32> -> vector<48x64xf32>
    %53 = tpu.concatenate %49, %46, %52 in 0 : vector<48x64xf32>, vector<48x64xf32>, vector<48x64xf32> -> vector<144x64xf32>
    %c0_19 = arith.constant 0 : index
    %c0_20 = arith.constant 0 : index
    %54 = vector.load %arg4[%c0_19, %c0_20] : memref<16x144xbf16, #tpu.memory_space<vmem>>, vector<16x144xbf16>
    %55 = arith.truncf %53 : vector<144x64xf32> to vector<144x64xbf16>
    %cst_21 = arith.constant dense<0.000000e+00> : vector<16x64xf32>
    %56 = tpu.matmul %54, %55, %cst_21 {dimension_numbers = #tpu.dot_dimension_numbers<[1], [0], [0], [1], [0, 0, 1, 1], [], []>} : vector<16x144xbf16>, vector<144x64xbf16>, vector<16x64xf32> -> vector<16x64xf32>
    %cst_22 = arith.constant 0.000000e+00 : f32
    %57 = vector.broadcast %cst_22 : f32 to vector<16x1xf32>
    %58 = vector.extract_strided_slice %24 {offsets = [0, 0], sizes = [16, 63], strides = [1, 1]} : vector<16x64xf32> to vector<16x63xf32>
    %59 = tpu.concatenate %57, %58 in 1 : vector<16x1xf32>, vector<16x63xf32> -> vector<16x64xf32>
    %cst_23 = arith.constant 0.000000e+00 : f32
    %60 = vector.shape_cast %18 : vector<1x64xi1> to vector<1x64xi1>
    %61 = vector.broadcast %60 : vector<1x64xi1> to vector<16x64xi1>
    %62 = vector.broadcast %cst_23 : f32 to vector<16x64xf32>
    %63 = arith.select %61, %59, %62 : vector<16x64xi1>, vector<16x64xf32>
    %cst_24 = arith.constant 0.000000e+00 : f32
    %64 = vector.broadcast %cst_24 : f32 to vector<16x1xf32>
    %65 = vector.extract_strided_slice %24 {offsets = [0, 1], sizes = [16, 63], strides = [1, 1]} : vector<16x64xf32> to vector<16x63xf32>
    %66 = tpu.concatenate %65, %64 in 1 : vector<16x63xf32>, vector<16x1xf32> -> vector<16x64xf32>
    %cst_25 = arith.constant 0.000000e+00 : f32
    %67 = vector.shape_cast %20 : vector<1x64xi1> to vector<1x64xi1>
    %68 = vector.broadcast %67 : vector<1x64xi1> to vector<16x64xi1>
    %69 = vector.broadcast %cst_25 : f32 to vector<16x64xf32>
    %70 = arith.select %68, %66, %69 : vector<16x64xi1>, vector<16x64xf32>
    %71 = tpu.concatenate %63, %24, %70 in 0 : vector<16x64xf32>, vector<16x64xf32>, vector<16x64xf32> -> vector<48x64xf32>
    %cst_26 = arith.constant 0.000000e+00 : f32
    %72 = vector.broadcast %cst_26 : f32 to vector<48x8xf32>
    %73 = vector.extract_strided_slice %71 {offsets = [0, 0], sizes = [48, 56], strides = [1, 1]} : vector<48x64xf32> to vector<48x56xf32>
    %74 = tpu.concatenate %72, %73 in 1 : vector<48x8xf32>, vector<48x56xf32> -> vector<48x64xf32>
    %cst_27 = arith.constant 0.000000e+00 : f32
    %75 = vector.broadcast %cst_27 : f32 to vector<48x8xf32>
    %76 = vector.extract_strided_slice %71 {offsets = [0, 8], sizes = [48, 56], strides = [1, 1]} : vector<48x64xf32> to vector<48x56xf32>
    %77 = tpu.concatenate %76, %75 in 1 : vector<48x56xf32>, vector<48x8xf32> -> vector<48x64xf32>
    %78 = tpu.concatenate %74, %71, %77 in 0 : vector<48x64xf32>, vector<48x64xf32>, vector<48x64xf32> -> vector<144x64xf32>
    %c0_28 = arith.constant 0 : index
    %c0_29 = arith.constant 0 : index
    %79 = vector.load %arg5[%c0_28, %c0_29] : memref<16x144xbf16, #tpu.memory_space<vmem>>, vector<16x144xbf16>
    %80 = arith.truncf %78 : vector<144x64xf32> to vector<144x64xbf16>
    %cst_30 = arith.constant dense<0.000000e+00> : vector<16x64xf32>
    %81 = tpu.matmul %79, %80, %cst_30 {dimension_numbers = #tpu.dot_dimension_numbers<[1], [0], [0], [1], [0, 0, 1, 1], [], []>} : vector<16x144xbf16>, vector<144x64xbf16>, vector<16x64xf32> -> vector<16x64xf32>
    %82 = arith.addf %56, %81 : vector<16x64xf32>
    %83 = vector.extract_strided_slice %21 {offsets = [0, 1], sizes = [16, 1], strides = [1, 1]} : vector<16x8xf32> to vector<16x1xf32>
    %84 = vector.broadcast %83 : vector<16x1xf32> to vector<16x64xf32>
    %85 = arith.addf %82, %84 : vector<16x64xf32>
    %86 = vector.extract_strided_slice %21 {offsets = [0, 2], sizes = [16, 1], strides = [1, 1]} : vector<16x8xf32> to vector<16x1xf32>
    %87 = vector.extract_strided_slice %21 {offsets = [0, 3], sizes = [16, 1], strides = [1, 1]} : vector<16x8xf32> to vector<16x1xf32>
    %cst_31 = arith.constant 0.000000e+00 : f32
    %88 = vector.broadcast %cst_31 : f32 to vector<16x64xf32>
    %89 = arith.cmpf oge, %85, %88 : vector<16x64xf32>
    %cst_32 = arith.constant 0.00999999977 : f32
    %90 = vector.broadcast %cst_32 : f32 to vector<16x64xf32>
    %91 = arith.mulf %90, %85 : vector<16x64xf32>
    %92 = arith.select %89, %85, %91 : vector<16x64xi1>, vector<16x64xf32>
    %cst_33 = arith.constant dense<0.000000e+00> : vector<16xf32>
    %93 = vector.multi_reduction <add>, %92, %cst_33 [1] : vector<16x64xf32> to vector<16xf32>
    %94 = vector.shape_cast %93 : vector<16xf32> to vector<16x1xf32>
    %cst_34 = arith.constant 6.400000e+01 : f32
    %95 = vector.broadcast %cst_34 : f32 to vector<16x1xf32>
    %96 = arith.divf %94, %95 : vector<16x1xf32>
    %97 = vector.broadcast %96 : vector<16x1xf32> to vector<16x64xf32>
    %98 = arith.subf %92, %97 : vector<16x64xf32>
    %99 = arith.mulf %98, %98 : vector<16x64xf32>
    %cst_35 = arith.constant dense<0.000000e+00> : vector<16xf32>
    %100 = vector.multi_reduction <add>, %99, %cst_35 [1] : vector<16x64xf32> to vector<16xf32>
    %101 = vector.shape_cast %100 : vector<16xf32> to vector<16x1xf32>
    %cst_36 = arith.constant 6.400000e+01 : f32
    %102 = vector.broadcast %cst_36 : f32 to vector<16x1xf32>
    %103 = arith.divf %101, %102 : vector<16x1xf32>
    %104 = vector.broadcast %96 : vector<16x1xf32> to vector<16x64xf32>
    %105 = arith.subf %92, %104 : vector<16x64xf32>
    %cst_37 = arith.constant 9.99999974E-6 : f32
    %106 = vector.broadcast %cst_37 : f32 to vector<16x1xf32>
    %107 = arith.addf %103, %106 : vector<16x1xf32>
    %108 = math.rsqrt %107 : vector<16x1xf32>
    %109 = vector.broadcast %108 : vector<16x1xf32> to vector<16x64xf32>
    %110 = arith.mulf %105, %109 : vector<16x64xf32>
    %111 = vector.broadcast %86 : vector<16x1xf32> to vector<16x64xf32>
    %112 = arith.mulf %110, %111 : vector<16x64xf32>
    %113 = vector.broadcast %87 : vector<16x1xf32> to vector<16x64xf32>
    %114 = arith.addf %112, %113 : vector<16x64xf32>
    %cst_38 = arith.constant 0.000000e+00 : f32
    %115 = vector.broadcast %cst_38 : f32 to vector<16x1xf32>
    %116 = vector.extract_strided_slice %114 {offsets = [0, 0], sizes = [16, 63], strides = [1, 1]} : vector<16x64xf32> to vector<16x63xf32>
    %117 = tpu.concatenate %115, %116 in 1 : vector<16x1xf32>, vector<16x63xf32> -> vector<16x64xf32>
    %cst_39 = arith.constant 0.000000e+00 : f32
    %118 = vector.shape_cast %18 : vector<1x64xi1> to vector<1x64xi1>
    %119 = vector.broadcast %118 : vector<1x64xi1> to vector<16x64xi1>
    %120 = vector.broadcast %cst_39 : f32 to vector<16x64xf32>
    %121 = arith.select %119, %117, %120 : vector<16x64xi1>, vector<16x64xf32>
    %cst_40 = arith.constant 0.000000e+00 : f32
    %122 = vector.broadcast %cst_40 : f32 to vector<16x1xf32>
    %123 = vector.extract_strided_slice %114 {offsets = [0, 1], sizes = [16, 63], strides = [1, 1]} : vector<16x64xf32> to vector<16x63xf32>
    %124 = tpu.concatenate %123, %122 in 1 : vector<16x63xf32>, vector<16x1xf32> -> vector<16x64xf32>
    %cst_41 = arith.constant 0.000000e+00 : f32
    %125 = vector.shape_cast %20 : vector<1x64xi1> to vector<1x64xi1>
    %126 = vector.broadcast %125 : vector<1x64xi1> to vector<16x64xi1>
    %127 = vector.broadcast %cst_41 : f32 to vector<16x64xf32>
    %128 = arith.select %126, %124, %127 : vector<16x64xi1>, vector<16x64xf32>
    %129 = tpu.concatenate %121, %114, %128 in 0 : vector<16x64xf32>, vector<16x64xf32>, vector<16x64xf32> -> vector<48x64xf32>
    %cst_42 = arith.constant 0.000000e+00 : f32
    %130 = vector.broadcast %cst_42 : f32 to vector<48x8xf32>
    %131 = vector.extract_strided_slice %129 {offsets = [0, 0], sizes = [48, 56], strides = [1, 1]} : vector<48x64xf32> to vector<48x56xf32>
    %132 = tpu.concatenate %130, %131 in 1 : vector<48x8xf32>, vector<48x56xf32> -> vector<48x64xf32>
    %cst_43 = arith.constant 0.000000e+00 : f32
    %133 = vector.broadcast %cst_43 : f32 to vector<48x8xf32>
    %134 = vector.extract_strided_slice %129 {offsets = [0, 8], sizes = [48, 56], strides = [1, 1]} : vector<48x64xf32> to vector<48x56xf32>
    %135 = tpu.concatenate %134, %133 in 1 : vector<48x56xf32>, vector<48x8xf32> -> vector<48x64xf32>
    %136 = tpu.concatenate %132, %129, %135 in 0 : vector<48x64xf32>, vector<48x64xf32>, vector<48x64xf32> -> vector<144x64xf32>
    %c0_44 = arith.constant 0 : index
    %c0_45 = arith.constant 0 : index
    %137 = vector.load %arg6[%c0_44, %c0_45] : memref<16x144xbf16, #tpu.memory_space<vmem>>, vector<16x144xbf16>
    %138 = arith.truncf %136 : vector<144x64xf32> to vector<144x64xbf16>
    %cst_46 = arith.constant dense<0.000000e+00> : vector<16x64xf32>
    %139 = tpu.matmul %137, %138, %cst_46 {dimension_numbers = #tpu.dot_dimension_numbers<[1], [0], [0], [1], [0, 0, 1, 1], [], []>} : vector<16x144xbf16>, vector<144x64xbf16>, vector<16x64xf32> -> vector<16x64xf32>
    %140 = vector.extract_strided_slice %21 {offsets = [0, 4], sizes = [16, 1], strides = [1, 1]} : vector<16x8xf32> to vector<16x1xf32>
    %141 = vector.broadcast %140 : vector<16x1xf32> to vector<16x64xf32>
    %142 = arith.addf %139, %141 : vector<16x64xf32>
    %143 = vector.extract_strided_slice %21 {offsets = [0, 5], sizes = [16, 1], strides = [1, 1]} : vector<16x8xf32> to vector<16x1xf32>
    %144 = vector.extract_strided_slice %21 {offsets = [0, 6], sizes = [16, 1], strides = [1, 1]} : vector<16x8xf32> to vector<16x1xf32>
    %cst_47 = arith.constant 0.000000e+00 : f32
    %145 = vector.broadcast %cst_47 : f32 to vector<16x64xf32>
    %146 = arith.cmpf oge, %142, %145 : vector<16x64xf32>
    %cst_48 = arith.constant 0.00999999977 : f32
    %147 = vector.broadcast %cst_48 : f32 to vector<16x64xf32>
    %148 = arith.mulf %147, %142 : vector<16x64xf32>
    %149 = arith.select %146, %142, %148 : vector<16x64xi1>, vector<16x64xf32>
    %cst_49 = arith.constant dense<0.000000e+00> : vector<16xf32>
    %150 = vector.multi_reduction <add>, %149, %cst_49 [1] : vector<16x64xf32> to vector<16xf32>
    %151 = vector.shape_cast %150 : vector<16xf32> to vector<16x1xf32>
    %cst_50 = arith.constant 6.400000e+01 : f32
    %152 = vector.broadcast %cst_50 : f32 to vector<16x1xf32>
    %153 = arith.divf %151, %152 : vector<16x1xf32>
    %154 = vector.broadcast %153 : vector<16x1xf32> to vector<16x64xf32>
    %155 = arith.subf %149, %154 : vector<16x64xf32>
    %156 = arith.mulf %155, %155 : vector<16x64xf32>
    %cst_51 = arith.constant dense<0.000000e+00> : vector<16xf32>
    %157 = vector.multi_reduction <add>, %156, %cst_51 [1] : vector<16x64xf32> to vector<16xf32>
    %158 = vector.shape_cast %157 : vector<16xf32> to vector<16x1xf32>
    %cst_52 = arith.constant 6.400000e+01 : f32
    %159 = vector.broadcast %cst_52 : f32 to vector<16x1xf32>
    %160 = arith.divf %158, %159 : vector<16x1xf32>
    %161 = vector.broadcast %153 : vector<16x1xf32> to vector<16x64xf32>
    %162 = arith.subf %149, %161 : vector<16x64xf32>
    %cst_53 = arith.constant 9.99999974E-6 : f32
    %163 = vector.broadcast %cst_53 : f32 to vector<16x1xf32>
    %164 = arith.addf %160, %163 : vector<16x1xf32>
    %165 = math.rsqrt %164 : vector<16x1xf32>
    %166 = vector.broadcast %165 : vector<16x1xf32> to vector<16x64xf32>
    %167 = arith.mulf %162, %166 : vector<16x64xf32>
    %168 = vector.broadcast %143 : vector<16x1xf32> to vector<16x64xf32>
    %169 = arith.mulf %167, %168 : vector<16x64xf32>
    %170 = vector.broadcast %144 : vector<16x1xf32> to vector<16x64xf32>
    %171 = arith.addf %169, %170 : vector<16x64xf32>
    %172 = arith.truncf %171 : vector<16x64xf32> to vector<16x64xbf16>
    %c0_54 = arith.constant 0 : index
    %c0_55 = arith.constant 0 : index
    %c0_56 = arith.constant 0 : index
    %173 = vector.load %arg9[%c0_54, %c0_55, %c0_56] : memref<1x16x64xbf16, #tpu.memory_space<vmem>>, vector<1x16x64xbf16>
    %174 = vector.shape_cast %173 : vector<1x16x64xbf16> to vector<16x64xbf16>
    %175 = vector.shape_cast %172 : vector<16x64xbf16> to vector<1x16x64xbf16>
    tpu.vector_store %arg9[%c0_54, %c0_55, %c0_56], %175 {strides = array<i32>} : memref<1x16x64xbf16, #tpu.memory_space<vmem>>, vector<1x16x64xbf16>,
    %c0_57 = arith.constant 0 : index
    %c0_58 = arith.constant 0 : index
    %176 = vector.load %arg7[%c0_57, %c0_58] : memref<8x16xbf16, #tpu.memory_space<vmem>>, vector<8x16xbf16>
    %177 = arith.truncf %171 : vector<16x64xf32> to vector<16x64xbf16>
    %cst_59 = arith.constant dense<0.000000e+00> : vector<8x64xf32>
    %178 = tpu.matmul %176, %177, %cst_59 {dimension_numbers = #tpu.dot_dimension_numbers<[1], [0], [0], [1], [0, 0, 1, 1], [], []>} : vector<8x16xbf16>, vector<16x64xbf16>, vector<8x64xf32> -> vector<8x64xf32>
    %c0_60 = arith.constant 0 : index
    %c0_61 = arith.constant 0 : index
    %c0_62 = arith.constant 0 : index
    %179 = vector.load %arg10[%c0_60, %c0_61, %c0_62] : memref<1x8x64xf32, #tpu.memory_space<vmem>>, vector<1x8x64xf32>
    %180 = vector.shape_cast %179 : vector<1x8x64xf32> to vector<8x64xf32>
    %181 = vector.shape_cast %178 : vector<8x64xf32> to vector<1x8x64xf32>
    tpu.vector_store %arg10[%c0_60, %c0_61, %c0_62], %181 {strides = array<i32>} : memref<1x8x64xf32, #tpu.memory_space<vmem>>, vector<1x8x64xf32>,
    return
  }
  func.func @transform_0(%arg0: i32) -> (i32, i32, i32) {
    %c0_i32 = arith.constant 0 : i32
    %c0_i32_0 = arith.constant 0 : i32
    %c0_i32_1 = arith.constant 0 : i32
    return %arg0, %c0_i32, %c0_i32_0 : i32, i32, i32
  }
  func.func @transform_1(%arg0: i32) -> (i32, i32, i32) {
    %c0_i32 = arith.constant 0 : i32
    %c0_i32_0 = arith.constant 0 : i32
    %c0_i32_1 = arith.constant 0 : i32
    return %arg0, %c0_i32, %c0_i32_0 : i32, i32, i32
  }
  func.func @transform_2(%arg0: i32) -> (i32, i32) {
    %c0_i32 = arith.constant 0 : i32
    %c0_i32_0 = arith.constant 0 : i32
    %c0_i32_1 = arith.constant 0 : i32
    return %c0_i32, %c0_i32_0 : i32, i32
  }
  func.func @transform_3(%arg0: i32) -> (i32, i32) {
    %c0_i32 = arith.constant 0 : i32
    %c0_i32_0 = arith.constant 0 : i32
    %c0_i32_1 = arith.constant 0 : i32
    return %c0_i32, %c0_i32_0 : i32, i32
  }
  func.func @transform_4(%arg0: i32) -> (i32, i32) {
    %c0_i32 = arith.constant 0 : i32
    %c0_i32_0 = arith.constant 0 : i32
    %c0_i32_1 = arith.constant 0 : i32
    return %c0_i32, %c0_i32_0 : i32, i32
  }
  func.func @transform_5(%arg0: i32) -> (i32, i32) {
    %c0_i32 = arith.constant 0 : i32
    %c0_i32_0 = arith.constant 0 : i32
    %c0_i32_1 = arith.constant 0 : i32
    return %c0_i32, %c0_i32_0 : i32, i32
  }
  func.func @transform_6(%arg0: i32) -> (i32, i32) {
    %c0_i32 = arith.constant 0 : i32
    %c0_i32_0 = arith.constant 0 : i32
    %c0_i32_1 = arith.constant 0 : i32
    return %c0_i32, %c0_i32_0 : i32, i32
  }
  func.func @transform_7(%arg0: i32) -> (i32, i32) {
    %c0_i32 = arith.constant 0 : i32
    %c0_i32_0 = arith.constant 0 : i32
    %c0_i32_1 = arith.constant 0 : i32
    return %c0_i32, %c0_i32_0 : i32, i32
  }
  func.func @transform_8(%arg0: i32) -> (i32, i32, i32) {
    %c0_i32 = arith.constant 0 : i32
    %c0_i32_0 = arith.constant 0 : i32
    %c0_i32_1 = arith.constant 0 : i32
    return %arg0, %c0_i32, %c0_i32_0 : i32, i32, i32
  }
  func.func @transform_9(%arg0: i32) -> (i32, i32, i32) {
    %c0_i32 = arith.constant 0 : i32
    %c0_i32_0 = arith.constant 0 : i32
    %c0_i32_1 = arith.constant 0 : i32
    return %arg0, %c0_i32, %c0_i32_0 : i32, i32, i32
  }
}

module attributes {stable_mosaic.version = 11 : i64} {
  func.func @_up_block_kernel(%arg0: i32, %arg1: memref<1x16x256xbf16, #tpu.memory_space<vmem>>, %arg2: memref<1x8x256xbf16, #tpu.memory_space<vmem>>, %arg3: memref<8x16xbf16, #tpu.memory_space<vmem>>, %arg4: memref<8x72xbf16, #tpu.memory_space<vmem>>, %arg5: memref<8x72xbf16, #tpu.memory_space<vmem>>, %arg6: memref<8x72xbf16, #tpu.memory_space<vmem>>, %arg7: memref<8x8xbf16, #tpu.memory_space<vmem>>, %arg8: memref<8x8xf32, #tpu.memory_space<vmem>>, %arg9: memref<1x8x256xbf16, #tpu.memory_space<vmem>>, %arg10: memref<1x8x256xf32, #tpu.memory_space<vmem>>) attributes {dimension_semantics = [#tpu.dimension_semantics<parallel>], iteration_bounds = array<i64: 2>, scalar_prefetch = 0 : i64, scratch_operands = 0 : i64, tpu.core_type = #tpu.core_type<tc>, window_params = [{transform_indices = @transform_0, window_bounds = array<i64: 1, 16, 256>}, {transform_indices = @transform_1, window_bounds = array<i64: 1, 8, 256>}, {pipeline_mode = #tpu.pipeline_mode<synchronous>, transform_indices = @transform_2, window_bounds = array<i64: 8, 16>}, {pipeline_mode = #tpu.pipeline_mode<synchronous>, transform_indices = @transform_3, window_bounds = array<i64: 8, 72>}, {pipeline_mode = #tpu.pipeline_mode<synchronous>, transform_indices = @transform_4, window_bounds = array<i64: 8, 72>}, {pipeline_mode = #tpu.pipeline_mode<synchronous>, transform_indices = @transform_5, window_bounds = array<i64: 8, 72>}, {pipeline_mode = #tpu.pipeline_mode<synchronous>, transform_indices = @transform_6, window_bounds = array<i64: 8, 8>}, {pipeline_mode = #tpu.pipeline_mode<synchronous>, transform_indices = @transform_7, window_bounds = array<i64: 8, 8>}, {transform_indices = @transform_8, window_bounds = array<i64: 1, 8, 256>}, {transform_indices = @transform_9, window_bounds = array<i64: 1, 8, 256>}]} {
    %0 = tpu.iota {dimensions = array<i32: 1>} : vector<1x256xi32>
    %c16_i32 = arith.constant 16 : i32
    %c0_i32 = arith.constant 0 : i32
    %1 = arith.cmpi eq, %c16_i32, %c0_i32 : i32
    %c1_i32 = arith.constant 1 : i32
    %2 = arith.select %1, %c1_i32, %c16_i32 : i32
    %3 = vector.broadcast %2 : i32 to vector<1x256xi32>
    %4 = arith.remsi %0, %3 : vector<1x256xi32>
    %c0_i32_0 = arith.constant 0 : i32
    %5 = vector.broadcast %c0_i32_0 : i32 to vector<1x256xi32>
    %6 = arith.cmpi ne, %4, %5 : vector<1x256xi32>
    %c0_i32_1 = arith.constant 0 : i32
    %7 = vector.broadcast %c0_i32_1 : i32 to vector<1x256xi32>
    %8 = arith.cmpi slt, %4, %7 : vector<1x256xi32>
    %c0_i32_2 = arith.constant 0 : i32
    %9 = arith.cmpi slt, %2, %c0_i32_2 : i32
    %10 = vector.broadcast %9 : i1 to vector<1x256xi1>
    %11 = vector.broadcast %10 : vector<1x256xi1> to vector<1x256xi1>
    %12 = arith.xori %8, %11 : vector<1x256xi1>
    %13 = arith.andi %12, %6 : vector<1x256xi1>
    %14 = vector.broadcast %2 : i32 to vector<1x256xi32>
    %15 = arith.addi %4, %14 : vector<1x256xi32>
    %16 = arith.select %13, %15, %4 : vector<1x256xi1>, vector<1x256xi32>
    %c1_i32_3 = arith.constant 1 : i32
    %17 = vector.broadcast %c1_i32_3 : i32 to vector<1x256xi32>
    %18 = arith.cmpi sge, %16, %17 : vector<1x256xi32>
    %c14_i32 = arith.constant 14 : i32
    %19 = vector.broadcast %c14_i32 : i32 to vector<1x256xi32>
    %20 = arith.cmpi sle, %16, %19 : vector<1x256xi32>
    %c0 = arith.constant 0 : index
    %c0_4 = arith.constant 0 : index
    %21 = vector.load %arg8[%c0, %c0_4] : memref<8x8xf32, #tpu.memory_space<vmem>>, vector<8x8xf32>
    %c0_5 = arith.constant 0 : index
    %c0_6 = arith.constant 0 : index
    %c0_7 = arith.constant 0 : index
    %22 = vector.load %arg2[%c0_5, %c0_6, %c0_7] : memref<1x8x256xbf16, #tpu.memory_space<vmem>>, vector<1x8x256xbf16>
    %23 = vector.shape_cast %22 : vector<1x8x256xbf16> to vector<8x256xbf16>
    %24 = arith.extf %23 : vector<8x256xbf16> to vector<8x256xf32>
    %c0_8 = arith.constant 0 : index
    %c0_9 = arith.constant 0 : index
    %25 = vector.load %arg3[%c0_8, %c0_9] : memref<8x16xbf16, #tpu.memory_space<vmem>>, vector<8x16xbf16>
    %c0_10 = arith.constant 0 : index
    %c0_11 = arith.constant 0 : index
    %c0_12 = arith.constant 0 : index
    %26 = vector.load %arg1[%c0_10, %c0_11, %c0_12] : memref<1x16x256xbf16, #tpu.memory_space<vmem>>, vector<1x16x256xbf16>
    %27 = vector.shape_cast %26 : vector<1x16x256xbf16> to vector<16x256xbf16>
    %cst = arith.constant dense<0.000000e+00> : vector<8x256xf32>
    %28 = tpu.matmul %25, %27, %cst {dimension_numbers = #tpu.dot_dimension_numbers<[1], [0], [0], [1], [0, 0, 1, 1], [], []>} : vector<8x16xbf16>, vector<16x256xbf16>, vector<8x256xf32> -> vector<8x256xf32>
    %29 = vector.extract_strided_slice %21 {offsets = [0, 0], sizes = [8, 1], strides = [1, 1]} : vector<8x8xf32> to vector<8x1xf32>
    %30 = vector.broadcast %29 : vector<8x1xf32> to vector<8x256xf32>
    %31 = arith.addf %28, %30 : vector<8x256xf32>
    %cst_13 = arith.constant 0.000000e+00 : f32
    %32 = vector.broadcast %cst_13 : f32 to vector<8x1xf32>
    %33 = vector.extract_strided_slice %31 {offsets = [0, 0], sizes = [8, 255], strides = [1, 1]} : vector<8x256xf32> to vector<8x255xf32>
    %34 = tpu.concatenate %32, %33 in 1 : vector<8x1xf32>, vector<8x255xf32> -> vector<8x256xf32>
    %cst_14 = arith.constant 0.000000e+00 : f32
    %35 = vector.shape_cast %18 : vector<1x256xi1> to vector<1x256xi1>
    %36 = vector.broadcast %35 : vector<1x256xi1> to vector<8x256xi1>
    %37 = vector.broadcast %cst_14 : f32 to vector<8x256xf32>
    %38 = arith.select %36, %34, %37 : vector<8x256xi1>, vector<8x256xf32>
    %cst_15 = arith.constant 0.000000e+00 : f32
    %39 = vector.broadcast %cst_15 : f32 to vector<8x1xf32>
    %40 = vector.extract_strided_slice %31 {offsets = [0, 1], sizes = [8, 255], strides = [1, 1]} : vector<8x256xf32> to vector<8x255xf32>
    %41 = tpu.concatenate %40, %39 in 1 : vector<8x255xf32>, vector<8x1xf32> -> vector<8x256xf32>
    %cst_16 = arith.constant 0.000000e+00 : f32
    %42 = vector.shape_cast %20 : vector<1x256xi1> to vector<1x256xi1>
    %43 = vector.broadcast %42 : vector<1x256xi1> to vector<8x256xi1>
    %44 = vector.broadcast %cst_16 : f32 to vector<8x256xf32>
    %45 = arith.select %43, %41, %44 : vector<8x256xi1>, vector<8x256xf32>
    %46 = tpu.concatenate %38, %31, %45 in 0 : vector<8x256xf32>, vector<8x256xf32>, vector<8x256xf32> -> vector<24x256xf32>
    %cst_17 = arith.constant 0.000000e+00 : f32
    %47 = vector.broadcast %cst_17 : f32 to vector<24x16xf32>
    %48 = vector.extract_strided_slice %46 {offsets = [0, 0], sizes = [24, 240], strides = [1, 1]} : vector<24x256xf32> to vector<24x240xf32>
    %49 = tpu.concatenate %47, %48 in 1 : vector<24x16xf32>, vector<24x240xf32> -> vector<24x256xf32>
    %cst_18 = arith.constant 0.000000e+00 : f32
    %50 = vector.broadcast %cst_18 : f32 to vector<24x16xf32>
    %51 = vector.extract_strided_slice %46 {offsets = [0, 16], sizes = [24, 240], strides = [1, 1]} : vector<24x256xf32> to vector<24x240xf32>
    %52 = tpu.concatenate %51, %50 in 1 : vector<24x240xf32>, vector<24x16xf32> -> vector<24x256xf32>
    %53 = tpu.concatenate %49, %46, %52 in 0 : vector<24x256xf32>, vector<24x256xf32>, vector<24x256xf32> -> vector<72x256xf32>
    %c0_19 = arith.constant 0 : index
    %c0_20 = arith.constant 0 : index
    %54 = vector.load %arg4[%c0_19, %c0_20] : memref<8x72xbf16, #tpu.memory_space<vmem>>, vector<8x72xbf16>
    %55 = arith.truncf %53 : vector<72x256xf32> to vector<72x256xbf16>
    %cst_21 = arith.constant dense<0.000000e+00> : vector<8x256xf32>
    %56 = tpu.matmul %54, %55, %cst_21 {dimension_numbers = #tpu.dot_dimension_numbers<[1], [0], [0], [1], [0, 0, 1, 1], [], []>} : vector<8x72xbf16>, vector<72x256xbf16>, vector<8x256xf32> -> vector<8x256xf32>
    %cst_22 = arith.constant 0.000000e+00 : f32
    %57 = vector.broadcast %cst_22 : f32 to vector<8x1xf32>
    %58 = vector.extract_strided_slice %24 {offsets = [0, 0], sizes = [8, 255], strides = [1, 1]} : vector<8x256xf32> to vector<8x255xf32>
    %59 = tpu.concatenate %57, %58 in 1 : vector<8x1xf32>, vector<8x255xf32> -> vector<8x256xf32>
    %cst_23 = arith.constant 0.000000e+00 : f32
    %60 = vector.shape_cast %18 : vector<1x256xi1> to vector<1x256xi1>
    %61 = vector.broadcast %60 : vector<1x256xi1> to vector<8x256xi1>
    %62 = vector.broadcast %cst_23 : f32 to vector<8x256xf32>
    %63 = arith.select %61, %59, %62 : vector<8x256xi1>, vector<8x256xf32>
    %cst_24 = arith.constant 0.000000e+00 : f32
    %64 = vector.broadcast %cst_24 : f32 to vector<8x1xf32>
    %65 = vector.extract_strided_slice %24 {offsets = [0, 1], sizes = [8, 255], strides = [1, 1]} : vector<8x256xf32> to vector<8x255xf32>
    %66 = tpu.concatenate %65, %64 in 1 : vector<8x255xf32>, vector<8x1xf32> -> vector<8x256xf32>
    %cst_25 = arith.constant 0.000000e+00 : f32
    %67 = vector.shape_cast %20 : vector<1x256xi1> to vector<1x256xi1>
    %68 = vector.broadcast %67 : vector<1x256xi1> to vector<8x256xi1>
    %69 = vector.broadcast %cst_25 : f32 to vector<8x256xf32>
    %70 = arith.select %68, %66, %69 : vector<8x256xi1>, vector<8x256xf32>
    %71 = tpu.concatenate %63, %24, %70 in 0 : vector<8x256xf32>, vector<8x256xf32>, vector<8x256xf32> -> vector<24x256xf32>
    %cst_26 = arith.constant 0.000000e+00 : f32
    %72 = vector.broadcast %cst_26 : f32 to vector<24x16xf32>
    %73 = vector.extract_strided_slice %71 {offsets = [0, 0], sizes = [24, 240], strides = [1, 1]} : vector<24x256xf32> to vector<24x240xf32>
    %74 = tpu.concatenate %72, %73 in 1 : vector<24x16xf32>, vector<24x240xf32> -> vector<24x256xf32>
    %cst_27 = arith.constant 0.000000e+00 : f32
    %75 = vector.broadcast %cst_27 : f32 to vector<24x16xf32>
    %76 = vector.extract_strided_slice %71 {offsets = [0, 16], sizes = [24, 240], strides = [1, 1]} : vector<24x256xf32> to vector<24x240xf32>
    %77 = tpu.concatenate %76, %75 in 1 : vector<24x240xf32>, vector<24x16xf32> -> vector<24x256xf32>
    %78 = tpu.concatenate %74, %71, %77 in 0 : vector<24x256xf32>, vector<24x256xf32>, vector<24x256xf32> -> vector<72x256xf32>
    %c0_28 = arith.constant 0 : index
    %c0_29 = arith.constant 0 : index
    %79 = vector.load %arg5[%c0_28, %c0_29] : memref<8x72xbf16, #tpu.memory_space<vmem>>, vector<8x72xbf16>
    %80 = arith.truncf %78 : vector<72x256xf32> to vector<72x256xbf16>
    %cst_30 = arith.constant dense<0.000000e+00> : vector<8x256xf32>
    %81 = tpu.matmul %79, %80, %cst_30 {dimension_numbers = #tpu.dot_dimension_numbers<[1], [0], [0], [1], [0, 0, 1, 1], [], []>} : vector<8x72xbf16>, vector<72x256xbf16>, vector<8x256xf32> -> vector<8x256xf32>
    %82 = arith.addf %56, %81 : vector<8x256xf32>
    %83 = vector.extract_strided_slice %21 {offsets = [0, 1], sizes = [8, 1], strides = [1, 1]} : vector<8x8xf32> to vector<8x1xf32>
    %84 = vector.broadcast %83 : vector<8x1xf32> to vector<8x256xf32>
    %85 = arith.addf %82, %84 : vector<8x256xf32>
    %86 = vector.extract_strided_slice %21 {offsets = [0, 2], sizes = [8, 1], strides = [1, 1]} : vector<8x8xf32> to vector<8x1xf32>
    %87 = vector.extract_strided_slice %21 {offsets = [0, 3], sizes = [8, 1], strides = [1, 1]} : vector<8x8xf32> to vector<8x1xf32>
    %cst_31 = arith.constant 0.000000e+00 : f32
    %88 = vector.broadcast %cst_31 : f32 to vector<8x256xf32>
    %89 = arith.cmpf oge, %85, %88 : vector<8x256xf32>
    %cst_32 = arith.constant 0.00999999977 : f32
    %90 = vector.broadcast %cst_32 : f32 to vector<8x256xf32>
    %91 = arith.mulf %90, %85 : vector<8x256xf32>
    %92 = arith.select %89, %85, %91 : vector<8x256xi1>, vector<8x256xf32>
    %cst_33 = arith.constant dense<0.000000e+00> : vector<8xf32>
    %93 = vector.multi_reduction <add>, %92, %cst_33 [1] : vector<8x256xf32> to vector<8xf32>
    %94 = vector.shape_cast %93 : vector<8xf32> to vector<8x1xf32>
    %cst_34 = arith.constant 2.560000e+02 : f32
    %95 = vector.broadcast %cst_34 : f32 to vector<8x1xf32>
    %96 = arith.divf %94, %95 : vector<8x1xf32>
    %97 = vector.broadcast %96 : vector<8x1xf32> to vector<8x256xf32>
    %98 = arith.subf %92, %97 : vector<8x256xf32>
    %99 = arith.mulf %98, %98 : vector<8x256xf32>
    %cst_35 = arith.constant dense<0.000000e+00> : vector<8xf32>
    %100 = vector.multi_reduction <add>, %99, %cst_35 [1] : vector<8x256xf32> to vector<8xf32>
    %101 = vector.shape_cast %100 : vector<8xf32> to vector<8x1xf32>
    %cst_36 = arith.constant 2.560000e+02 : f32
    %102 = vector.broadcast %cst_36 : f32 to vector<8x1xf32>
    %103 = arith.divf %101, %102 : vector<8x1xf32>
    %104 = vector.broadcast %96 : vector<8x1xf32> to vector<8x256xf32>
    %105 = arith.subf %92, %104 : vector<8x256xf32>
    %cst_37 = arith.constant 9.99999974E-6 : f32
    %106 = vector.broadcast %cst_37 : f32 to vector<8x1xf32>
    %107 = arith.addf %103, %106 : vector<8x1xf32>
    %108 = math.rsqrt %107 : vector<8x1xf32>
    %109 = vector.broadcast %108 : vector<8x1xf32> to vector<8x256xf32>
    %110 = arith.mulf %105, %109 : vector<8x256xf32>
    %111 = vector.broadcast %86 : vector<8x1xf32> to vector<8x256xf32>
    %112 = arith.mulf %110, %111 : vector<8x256xf32>
    %113 = vector.broadcast %87 : vector<8x1xf32> to vector<8x256xf32>
    %114 = arith.addf %112, %113 : vector<8x256xf32>
    %cst_38 = arith.constant 0.000000e+00 : f32
    %115 = vector.broadcast %cst_38 : f32 to vector<8x1xf32>
    %116 = vector.extract_strided_slice %114 {offsets = [0, 0], sizes = [8, 255], strides = [1, 1]} : vector<8x256xf32> to vector<8x255xf32>
    %117 = tpu.concatenate %115, %116 in 1 : vector<8x1xf32>, vector<8x255xf32> -> vector<8x256xf32>
    %cst_39 = arith.constant 0.000000e+00 : f32
    %118 = vector.shape_cast %18 : vector<1x256xi1> to vector<1x256xi1>
    %119 = vector.broadcast %118 : vector<1x256xi1> to vector<8x256xi1>
    %120 = vector.broadcast %cst_39 : f32 to vector<8x256xf32>
    %121 = arith.select %119, %117, %120 : vector<8x256xi1>, vector<8x256xf32>
    %cst_40 = arith.constant 0.000000e+00 : f32
    %122 = vector.broadcast %cst_40 : f32 to vector<8x1xf32>
    %123 = vector.extract_strided_slice %114 {offsets = [0, 1], sizes = [8, 255], strides = [1, 1]} : vector<8x256xf32> to vector<8x255xf32>
    %124 = tpu.concatenate %123, %122 in 1 : vector<8x255xf32>, vector<8x1xf32> -> vector<8x256xf32>
    %cst_41 = arith.constant 0.000000e+00 : f32
    %125 = vector.shape_cast %20 : vector<1x256xi1> to vector<1x256xi1>
    %126 = vector.broadcast %125 : vector<1x256xi1> to vector<8x256xi1>
    %127 = vector.broadcast %cst_41 : f32 to vector<8x256xf32>
    %128 = arith.select %126, %124, %127 : vector<8x256xi1>, vector<8x256xf32>
    %129 = tpu.concatenate %121, %114, %128 in 0 : vector<8x256xf32>, vector<8x256xf32>, vector<8x256xf32> -> vector<24x256xf32>
    %cst_42 = arith.constant 0.000000e+00 : f32
    %130 = vector.broadcast %cst_42 : f32 to vector<24x16xf32>
    %131 = vector.extract_strided_slice %129 {offsets = [0, 0], sizes = [24, 240], strides = [1, 1]} : vector<24x256xf32> to vector<24x240xf32>
    %132 = tpu.concatenate %130, %131 in 1 : vector<24x16xf32>, vector<24x240xf32> -> vector<24x256xf32>
    %cst_43 = arith.constant 0.000000e+00 : f32
    %133 = vector.broadcast %cst_43 : f32 to vector<24x16xf32>
    %134 = vector.extract_strided_slice %129 {offsets = [0, 16], sizes = [24, 240], strides = [1, 1]} : vector<24x256xf32> to vector<24x240xf32>
    %135 = tpu.concatenate %134, %133 in 1 : vector<24x240xf32>, vector<24x16xf32> -> vector<24x256xf32>
    %136 = tpu.concatenate %132, %129, %135 in 0 : vector<24x256xf32>, vector<24x256xf32>, vector<24x256xf32> -> vector<72x256xf32>
    %c0_44 = arith.constant 0 : index
    %c0_45 = arith.constant 0 : index
    %137 = vector.load %arg6[%c0_44, %c0_45] : memref<8x72xbf16, #tpu.memory_space<vmem>>, vector<8x72xbf16>
    %138 = arith.truncf %136 : vector<72x256xf32> to vector<72x256xbf16>
    %cst_46 = arith.constant dense<0.000000e+00> : vector<8x256xf32>
    %139 = tpu.matmul %137, %138, %cst_46 {dimension_numbers = #tpu.dot_dimension_numbers<[1], [0], [0], [1], [0, 0, 1, 1], [], []>} : vector<8x72xbf16>, vector<72x256xbf16>, vector<8x256xf32> -> vector<8x256xf32>
    %140 = vector.extract_strided_slice %21 {offsets = [0, 4], sizes = [8, 1], strides = [1, 1]} : vector<8x8xf32> to vector<8x1xf32>
    %141 = vector.broadcast %140 : vector<8x1xf32> to vector<8x256xf32>
    %142 = arith.addf %139, %141 : vector<8x256xf32>
    %143 = vector.extract_strided_slice %21 {offsets = [0, 5], sizes = [8, 1], strides = [1, 1]} : vector<8x8xf32> to vector<8x1xf32>
    %144 = vector.extract_strided_slice %21 {offsets = [0, 6], sizes = [8, 1], strides = [1, 1]} : vector<8x8xf32> to vector<8x1xf32>
    %cst_47 = arith.constant 0.000000e+00 : f32
    %145 = vector.broadcast %cst_47 : f32 to vector<8x256xf32>
    %146 = arith.cmpf oge, %142, %145 : vector<8x256xf32>
    %cst_48 = arith.constant 0.00999999977 : f32
    %147 = vector.broadcast %cst_48 : f32 to vector<8x256xf32>
    %148 = arith.mulf %147, %142 : vector<8x256xf32>
    %149 = arith.select %146, %142, %148 : vector<8x256xi1>, vector<8x256xf32>
    %cst_49 = arith.constant dense<0.000000e+00> : vector<8xf32>
    %150 = vector.multi_reduction <add>, %149, %cst_49 [1] : vector<8x256xf32> to vector<8xf32>
    %151 = vector.shape_cast %150 : vector<8xf32> to vector<8x1xf32>
    %cst_50 = arith.constant 2.560000e+02 : f32
    %152 = vector.broadcast %cst_50 : f32 to vector<8x1xf32>
    %153 = arith.divf %151, %152 : vector<8x1xf32>
    %154 = vector.broadcast %153 : vector<8x1xf32> to vector<8x256xf32>
    %155 = arith.subf %149, %154 : vector<8x256xf32>
    %156 = arith.mulf %155, %155 : vector<8x256xf32>
    %cst_51 = arith.constant dense<0.000000e+00> : vector<8xf32>
    %157 = vector.multi_reduction <add>, %156, %cst_51 [1] : vector<8x256xf32> to vector<8xf32>
    %158 = vector.shape_cast %157 : vector<8xf32> to vector<8x1xf32>
    %cst_52 = arith.constant 2.560000e+02 : f32
    %159 = vector.broadcast %cst_52 : f32 to vector<8x1xf32>
    %160 = arith.divf %158, %159 : vector<8x1xf32>
    %161 = vector.broadcast %153 : vector<8x1xf32> to vector<8x256xf32>
    %162 = arith.subf %149, %161 : vector<8x256xf32>
    %cst_53 = arith.constant 9.99999974E-6 : f32
    %163 = vector.broadcast %cst_53 : f32 to vector<8x1xf32>
    %164 = arith.addf %160, %163 : vector<8x1xf32>
    %165 = math.rsqrt %164 : vector<8x1xf32>
    %166 = vector.broadcast %165 : vector<8x1xf32> to vector<8x256xf32>
    %167 = arith.mulf %162, %166 : vector<8x256xf32>
    %168 = vector.broadcast %143 : vector<8x1xf32> to vector<8x256xf32>
    %169 = arith.mulf %167, %168 : vector<8x256xf32>
    %170 = vector.broadcast %144 : vector<8x1xf32> to vector<8x256xf32>
    %171 = arith.addf %169, %170 : vector<8x256xf32>
    %172 = arith.truncf %171 : vector<8x256xf32> to vector<8x256xbf16>
    %c0_54 = arith.constant 0 : index
    %c0_55 = arith.constant 0 : index
    %c0_56 = arith.constant 0 : index
    %173 = vector.load %arg9[%c0_54, %c0_55, %c0_56] : memref<1x8x256xbf16, #tpu.memory_space<vmem>>, vector<1x8x256xbf16>
    %174 = vector.shape_cast %173 : vector<1x8x256xbf16> to vector<8x256xbf16>
    %175 = vector.shape_cast %172 : vector<8x256xbf16> to vector<1x8x256xbf16>
    tpu.vector_store %arg9[%c0_54, %c0_55, %c0_56], %175 {strides = array<i32>} : memref<1x8x256xbf16, #tpu.memory_space<vmem>>, vector<1x8x256xbf16>,
    %c0_57 = arith.constant 0 : index
    %c0_58 = arith.constant 0 : index
    %176 = vector.load %arg7[%c0_57, %c0_58] : memref<8x8xbf16, #tpu.memory_space<vmem>>, vector<8x8xbf16>
    %177 = arith.truncf %171 : vector<8x256xf32> to vector<8x256xbf16>
    %cst_59 = arith.constant dense<0.000000e+00> : vector<8x256xf32>
    %178 = tpu.matmul %176, %177, %cst_59 {dimension_numbers = #tpu.dot_dimension_numbers<[1], [0], [0], [1], [0, 0, 1, 1], [], []>} : vector<8x8xbf16>, vector<8x256xbf16>, vector<8x256xf32> -> vector<8x256xf32>
    %c0_60 = arith.constant 0 : index
    %c0_61 = arith.constant 0 : index
    %c0_62 = arith.constant 0 : index
    %179 = vector.load %arg10[%c0_60, %c0_61, %c0_62] : memref<1x8x256xf32, #tpu.memory_space<vmem>>, vector<1x8x256xf32>
    %180 = vector.shape_cast %179 : vector<1x8x256xf32> to vector<8x256xf32>
    %181 = vector.shape_cast %178 : vector<8x256xf32> to vector<1x8x256xf32>
    tpu.vector_store %arg10[%c0_60, %c0_61, %c0_62], %181 {strides = array<i32>} : memref<1x8x256xf32, #tpu.memory_space<vmem>>, vector<1x8x256xf32>,
    return
  }
  func.func @transform_0(%arg0: i32) -> (i32, i32, i32) {
    %c0_i32 = arith.constant 0 : i32
    %c0_i32_0 = arith.constant 0 : i32
    %c0_i32_1 = arith.constant 0 : i32
    return %arg0, %c0_i32, %c0_i32_0 : i32, i32, i32
  }
  func.func @transform_1(%arg0: i32) -> (i32, i32, i32) {
    %c0_i32 = arith.constant 0 : i32
    %c0_i32_0 = arith.constant 0 : i32
    %c0_i32_1 = arith.constant 0 : i32
    return %arg0, %c0_i32, %c0_i32_0 : i32, i32, i32
  }
  func.func @transform_2(%arg0: i32) -> (i32, i32) {
    %c0_i32 = arith.constant 0 : i32
    %c0_i32_0 = arith.constant 0 : i32
    %c0_i32_1 = arith.constant 0 : i32
    return %c0_i32, %c0_i32_0 : i32, i32
  }
  func.func @transform_3(%arg0: i32) -> (i32, i32) {
    %c0_i32 = arith.constant 0 : i32
    %c0_i32_0 = arith.constant 0 : i32
    %c0_i32_1 = arith.constant 0 : i32
    return %c0_i32, %c0_i32_0 : i32, i32
  }
  func.func @transform_4(%arg0: i32) -> (i32, i32) {
    %c0_i32 = arith.constant 0 : i32
    %c0_i32_0 = arith.constant 0 : i32
    %c0_i32_1 = arith.constant 0 : i32
    return %c0_i32, %c0_i32_0 : i32, i32
  }
  func.func @transform_5(%arg0: i32) -> (i32, i32) {
    %c0_i32 = arith.constant 0 : i32
    %c0_i32_0 = arith.constant 0 : i32
    %c0_i32_1 = arith.constant 0 : i32
    return %c0_i32, %c0_i32_0 : i32, i32
  }
  func.func @transform_6(%arg0: i32) -> (i32, i32) {
    %c0_i32 = arith.constant 0 : i32
    %c0_i32_0 = arith.constant 0 : i32
    %c0_i32_1 = arith.constant 0 : i32
    return %c0_i32, %c0_i32_0 : i32, i32
  }
  func.func @transform_7(%arg0: i32) -> (i32, i32) {
    %c0_i32 = arith.constant 0 : i32
    %c0_i32_0 = arith.constant 0 : i32
    %c0_i32_1 = arith.constant 0 : i32
    return %c0_i32, %c0_i32_0 : i32, i32
  }
  func.func @transform_8(%arg0: i32) -> (i32, i32, i32) {
    %c0_i32 = arith.constant 0 : i32
    %c0_i32_0 = arith.constant 0 : i32
    %c0_i32_1 = arith.constant 0 : i32
    return %arg0, %c0_i32, %c0_i32_0 : i32, i32, i32
  }
  func.func @transform_9(%arg0: i32) -> (i32, i32, i32) {
    %c0_i32 = arith.constant 0 : i32
    %c0_i32_0 = arith.constant 0 : i32
    %c0_i32_1 = arith.constant 0 : i32
    return %arg0, %c0_i32, %c0_i32_0 : i32, i32, i32
  }
}

</mosaic_0001>

<bundles_post_ra>
// kernel: unet_forward.6
= control target key start
LH: loop header
LB: loop body
LE: loop exit
PB: predicated region body
PF: predicated region fallthrough
CT: control target
= control target key end

     0   :  { %s1052_s18 = smov 0   ;;  %s1220_s0 = inlined_call_operand.vmem [shape: bf16[2,8,64], index: 0, kind: input, shape index: {}]   ;;  %s1221_s1 = inlined_call_operand.vmem [shape: bf16[16,72], index: 1, kind: input, shape index: {}]   ;;  %s1222_s2 = inlined_call_operand.vmem [shape: bf16[16,144], index: 2, kind: input, shape index: {}]   ;;  %s1223_s3 = inlined_call_operand.vmem [shape: f32[16,8], index: 3, kind: input, shape index: {}]   ;;  %s1224_s4 = inlined_call_operand.vmem [shape: bf16[2,16,64], index: 4, kind: output, shape index: {0}]   ;;  %s1225_s5 = inlined_call_operand.vmem [shape: bf16[2,16,32], index: 5, kind: output, shape index: {1}]  }
   0x1 LB: > { %s786_s19 = sadd.s32 4294967295, %s1005_s18   ;;  %p790_p0 = scmp.ge.s32.totalorder %s1005_s18, 1  ;;  %s1005_s18 = sphi %s1052_s18, %s16_s18  }
   0x2   : > { %p189_p1 = scmp.lt.s32.totalorder %s1005_s18, 3 }
   0x4   : > { %p190_p2 = pnand %p790_p0, %p189_p1 }
   0x5   : > { %p221_p3 = scmp.lt.s32.totalorder (!%p190_p2), %s786_s19, 1  ;;  %s1007_s24 = smov (!%p190_p2), 127  }
   0x6   : > { %193 = sbr.rel (%p190_p2) target bundleno = 1942 (0x796), region = 36  ;;  %s1008_s25 = smov (!%p190_p2), 1  }
   0x7   : > { %s1010_s26 = smov (!%p190_p2), 8   ;;  %s1011_s27 = smov (!%p190_p2), 120  }
   0x8   : > { %s1020_s17 = smov (!%p190_p2), 112  }
   0xb   : > { %s1235_s19 = smov (!%p221_p3, %s786_s19), 1  ;;  %v236_v2 = vlaneseq  ;;  %v1009_v4 = vmov 0.0   ;;  %vm268_vm0 = vcmask 515072   ;;  %vm260_vm2 = vcmask 7168   ;;  %v1089_v15 = vld [vmem:[%s1223_s3] sm:$0xff]  ;;  %v1094_v16 = vld [vmem:[%s1223_s3 + $0x8] sm:$0xff] }
   0xc   : > { %s791_s20 = sshll.u32 %s1235_s19, 2  ;;  %864 = vmatprep.subr.bf16.mxu0 %v1009_v4  ;;  %vm1012_vm4 = vmmov 0   ;;  %v1013_v17 = vmov 0   ;;  %vm297_vm5 = vcmask 457728   ;;  %vm327_vm6 = vcmask 1043456   ;;  %v987_v35 = vld [vmem:[%s1221_s1] sm:$0xff]  }
   0xd   : > { %s224_s23 = scalar_lea.vmem %s1220_s0, %s791_s20  ;;  %v237_v3 = vand.u32 127, %v236_v2  ;;  %874 = vmatprep.mubr.msk.bf16.mxu0 %vm1012_vm4, %v1009_v4  ;;  %911 = vset.pattern.permute.xlu0 %v1013_v17  ;;  %vm1104_vm7 = vmpackc.low %vm297_vm5, %vm297_vm5  ;;  %vm284_vm8 = vcmask 64512   ;;  %vm1014_vm9 = vmmov 1   ;;  %vm323_vm14 = vcmask 588800   ;;  %s852_s13 = sshll.u32 %s1235_s19, 3 }
   0xe   : > { %v252_v0 = vld [vmem:[%s224_s23] sm:$0xf]  ;;  %912 = vset.pattern.permute.xlu1 %v1013_v17  ;;  %532 = vmatprep.subr.bf16.mxu1 %v1013_v17  ;;  %vm803_vm11 = vmneg %vm284_vm8  ;;  %v1015_v36 = vmov 1   ;;  %vm378_vm4 = vcmask 523264   ;;  %v1016_v51 = vmov 2   ;;  %s229_s16 = scalar_lea.vmem %s1224_s4, %s852_s13  ;;  %s1021_s20 = smov 104  }
   0xf   : > { %v253_v1 = vunpack.c.l.bf16 %v252_v0  ;;  %v242_v5 = vand.u32 7, %v237_v3  ;;  %vm1115_vm13 = vmpackc.low %vm803_vm11, %vm803_vm11  ;;  %s234_s23 = scalar_lea.vmem %s1225_s5, %s852_s13 }
  0x11   : > { %265 = vrot.lane.b32.xlu0 %v253_v1, %s1007_s24  ;;  %vm1068_vm1 = vcmp.le.s32.totalorder %v242_v5, 6  ;;  %vm1077_vm3 = vcmp.ge.s32.totalorder %v242_v5, 1 }
  0x12   : > { %vm800_vm10 = vmpackc.low %vm1068_vm1, %vm1014_vm9 }
  0x13   : > { %vm804_vm12 = vmpackc.low %vm1077_vm3, %vm803_vm11 }
  0x14   : > { %vm821_vm9 = vmpackc.low %vm1068_vm1, %vm1068_vm1 }
  0x15   : > { %257 = vrot.lane.b32.xlu0 %v253_v1, %s1008_s25 }
  0x83   : > { %v266_v7 = vpop.permute.xlu0 %265 }
  0x84   : > { %v269_v8 = vsel %vm268_vm0, %v266_v7, 0.0 }
  0x85   : > { %v272_v9 = vsel %vm1068_vm1, %v269_v8, 0.0  ;;  %v801_v27 = vpack.c.bf16 %v269_v8, %v253_v1 }
  0x86   : > { %279 = vrot.lane.b32.xlu0 %v272_v9, %s1010_s26  ;;  %292 = vrot.lane.b32.xlu1 %v272_v9, %s1011_s27 }
  0x87   : > { %v258_v11 = vpop.permute.xlu0 %257 }
  0x88   : > { %v261_v12 = vsel %vm260_vm2, 0.0, %v258_v11 }
  0x89   : > { %v264_v13 = vsel %vm1077_vm3, %v261_v12, 0.0 }
  0x8a   : > { %v901_v14 = vpack.i.bf16 %v253_v1, %v264_v13  ;;  %310 = vperm.xlu0 %911, %v1089_v15  }
  0x8c   : > { %902 = vrot.lane.b32.xlu1 %v901_v14, %s1011_s27 }
  0x8e   : > { %913 = vset.pattern.permute.xlu0 %v1015_v36 }
  0x90   : > { %907 = vrot.lane.b32.xlu1 %v901_v14, %s1010_s26 }
  0x94   : > { %315 = vperm.xlu1 %912, %v1094_v16  }
  0x98   : > { %914 = vset.pattern.permute.xlu1 %v1015_v36 }
  0xf8   : > { %v293_v18 = vpop.permute.xlu1 %292  ;;  %v280_v28 = vpop.permute.xlu0 %279 }
  0xf9   : > { %v300_v19 = vsel %vm297_vm5, %v293_v18, 0.0  ;;  %v805_v30 = vpack.c.bf16 %v261_v12, %v280_v28 }
  0xfa   : > { %v307_v20 = vpack.c.bf16 %v300_v19, %v300_v19 }
  0xfc   : > { %v329_v21 = vsel %vm327_vm6, %v307_v20, 0 }
  0xfd   : > { %865 = vmatpush3.bf16.msra.mxu0 %v329_v21 }
  0xfe   : > { %v903_v22 = vpop.permute.xlu1 %902  ;;  %866 = vmatprep.subr.bf16.mxu0 %v1009_v4 }
  0xff   : > { %v905_v23 = vunpack.i.h.bf16 %v903_v22  ;;  %v904_v24 = vunpack.i.l.bf16 %v903_v22 }
 0x101   : > { %v798_v26 = vpack.c.bf16 %v905_v23, %v904_v24 }
 0x102   : > { %v908_v29 = vpop.permute.xlu1 %907 }
 0x103   : > { %867 = vmatpush3.bf16.msk.msra.mxu0 %vm1104_vm7, %v798_v26  ;;  %v910_v31 = vunpack.i.h.bf16 %v908_v29  ;;  %v909_v32 = vunpack.i.l.bf16 %v908_v29 }
 0x104   : > { %868 = vmatprep.subr.bf16.mxu0 %v1009_v4 }
 0x105   : > { %v810_v34 = vpack.c.bf16 %v910_v31, %v909_v32  ;;  %v311_v37 = vpop.permute.xlu0 %310 }
 0x107   : > { %869 = vmatpush3.bf16.msk.msra.mxu0 %vm800_vm10, %v801_v27  ;;  %vm824_vm10 = vmpackc.low %vm1077_vm3, %vm1077_vm3 }
 0x108   : > { %870 = vmatprep.subr.bf16.mxu0 %v1009_v4 }
 0x10b   : > { %871 = vmatpush3.bf16.msk.msra.mxu0 %vm804_vm12, %v805_v30 }
 0x10c   : > { %872 = vmatprep.subr.bf16.mxu0 %v1009_v4 }
 0x10f   : > { %873 = vmatpush3.bf16.msk.msra.mxu0 %vm1115_vm13, %v810_v34  ;;  %v316_v41 = vpop.permute.xlu1 %315 }
 0x112   : > { %875 = vmatmul.mubr.msk.bf16.vlgmr.msra.gmra.mxu0 %vm323_vm14, %v987_v35 }
 0x1d2   : > { %v365_v38 = vpop.f32.mrf.mxu0 }
 0x1d3   : > { %v366_v39 = vadd.f32 %v365_v38, %v311_v37 }
 0x1d4   : > { %v876_v40 = vpop.f32.mrf.mxu0 }
 0x1d5   : > { %v374_v42 = vmul.f32 0.01, %v366_v39  ;;  %vm372_vm15 = vcmp.ge.f32.partialorder %v366_v39, 0.0 }
 0x1d6   : > { %v368_v43 = vpop.f32.mrf.mxu0 }
 0x1d7   : > { %v369_v44 = vadd.f32 %v368_v43, %v316_v41  ;;  %v376_v45 = vsel %vm372_vm15, %v366_v39, %v374_v42 }
 0x1d8   : > { %v877_v46 = vpop.f32.mrf.mxu0  ;;  %v379_v47 = vsel %vm378_vm4, %v376_v45, 0.0 }
 0x1d9   : > { %v375_v48 = vmul.f32 0.01, %v369_v44  ;;  %380 = vadd.xlane.f32.xlu1 %v379_v47  ;;  %vm373_vm6 = vcmp.ge.f32.partialorder %v369_v44, 0.0  ;;  %v990_v47 = vld [vmem:[%s1222_s2 + $0x4] ss:$8 sps:$4 sm:$0xff]  }
 0x1db   : > { %v377_v49 = vsel %vm373_vm6, %v369_v44, %v375_v48  ;;  %v1017_v48 = vmov 3  }
 0x1dc   : > { %v382_v50 = vsel %vm378_vm4, %v377_v49, 0.0 }
 0x1dd   : > { %383 = vadd.xlane.f32.xlu0 %v382_v50 }
 0x1ea   : > { %411 = vperm.xlu1 %914, %v1094_v16  }
 0x1ee   : > { %915 = vset.pattern.permute.xlu1 %v1016_v51 }
 0x1ef   : > { %417 = vperm.xlu1 %915, %v1089_v15  }
 0x262   : > { %v381_v52 = vpop.xlane.xlu1 %380 }
 0x263   : > { %v386_v53 = vmul.f32 0.015625, %v381_v52 }
 0x265   : > { %v388_v54 = vsub.f32 %v376_v45, %v386_v53 }
 0x266   : > { %v384_v55 = vpop.xlane.xlu0 %383  ;;  %v412_v62 = vpop.permute.xlu1 %411 }
 0x267   : > { %v387_v56 = vmul.f32 0.015625, %v384_v55  ;;  %v390_v57 = vmul.f32 %v388_v54, %v388_v54 }
 0x269   : > { %v389_v58 = vsub.f32 %v377_v49, %v387_v56  ;;  %v392_v59 = vsel %vm378_vm4, %v390_v57, 0.0 }
 0x26a   : > { %393 = vadd.xlane.f32.xlu0 %v392_v59  ;;  %v418_v63 = vpop.permute.xlu1 %417 }
 0x26b   : > { %v391_v60 = vmul.f32 %v389_v58, %v389_v58 }
 0x26d   : > { %v395_v61 = vsel %vm378_vm4, %v391_v60, 0.0 }
 0x26e   : > { %396 = vadd.xlane.f32.xlu1 %v395_v61 }
 0x27f   : > { %421 = vperm.xlu1 %915, %v1094_v16  }
 0x280   : > { %407 = vperm.xlu0 %913, %v1089_v15  }
 0x283   : > { %956 = vset.pattern.permute.xlu1 %v1017_v48 }
 0x284   : > { %957 = vset.pattern.permute.xlu0 %v1017_v48 }
 0x2f3   : > { %v394_v0 = vpop.xlane.xlu0 %393 }
 0x2f4   : > { %v398_v1 = vmul.f32 0.015625, %v394_v0 }
 0x2f6   : > { %v400_v2 = vadd.f32 1e-05, %v398_v1 }
 0x2f7   : > { %v397_v3 = vpop.xlane.xlu1 %396 }
 0x2f8   : > { %991 = vrsqrt.f32 %v400_v2  ;;  %v399_v4 = vmul.f32 0.015625, %v397_v3  ;;  %v988_v3 = vld [vmem:[%s1222_s2] ss:$8 sps:$4 sm:$0xff]  }
 0x2fa   : > { %v401_v5 = vadd.f32 1e-05, %v399_v4  ;;  %v1018_v4 = vmov 4  }
 0x2fb   : > { %v408_v9 = vpop.permute.xlu0 %407  ;;  %v422_v18 = vpop.permute.xlu1 %421 }
 0x2fc   : > { %993 = vrsqrt.f32 %v401_v5 }
 0x305   : > { %v992_v7 = vpop.eup %991 }
 0x306   : > { %v404_v8 = vmul.f32 %v992_v7, %v388_v54 }
 0x308   : > { %v414_v13 = vmul.f32 %v408_v9, %v404_v8 }
 0x309   : > { %v994_v11 = vpop.eup %993 }
 0x30a   : > { %v405_v12 = vmul.f32 %v994_v11, %v389_v58  ;;  %v424_v20 = vadd.f32 %v418_v63, %v414_v13 }
 0x30c   : > { %v415_v14 = vmul.f32 %v412_v62, %v405_v12 }
 0x30e   : > { %v425_v19 = vadd.f32 %v422_v18, %v415_v14 }
 0x310   : > { %v941_v21 = vpack.i.bf16 %v425_v19, %v424_v20  ;;  %v506_v22 = vpack.c.bf16 %v425_v19, %v424_v20 }
 0x312   : > { %942 = vrot.lane.b32.xlu0 %v941_v21, %s1010_s26  ;;  %917 = vrot.lane.b32.xlu1 %v941_v21, %s1008_s25 }
 0x316   : > { %922 = vrot.lane.b32.xlu1 %v941_v21, %s1007_s24 }
 0x31a   : > { %927 = vrot.lane.b32.xlu1 %v941_v21, %s1011_s27  ;;  %v1019_v21 = vmov 5  }
 0x384   : > { %v918_v23 = vpop.permute.xlu1 %917  ;;  %v943_v56 = vpop.permute.xlu0 %942 }
 0x385   : > { %v920_v24 = vunpack.i.h.bf16 %v918_v23  ;;  %v919_v26 = vunpack.i.l.bf16 %v918_v23  ;;  %v945_v6 = vunpack.i.h.bf16 %v943_v56  ;;  %v944_v57 = vunpack.i.l.bf16 %v943_v56 }
 0x387   : > { %v435_v27 = vsel %vm260_vm2, 0.0, %v920_v24  ;;  %v434_v28 = vsel %vm260_vm2, 0.0, %v919_v26  ;;  %vm528_vm2 = vcmask 130048   ;;  %v835_v60 = vpack.c.bf16 %v945_v6, %v944_v57 }
 0x388   : > { %v437_v29 = vsel %vm1077_vm3, %v435_v27, 0.0  ;;  %v436_v30 = vsel %vm1077_vm3, %v434_v28, 0.0  ;;  %v825_v31 = vpack.c.bf16 %v435_v27, %v434_v28  ;;  %v923_v32 = vpop.permute.xlu1 %922  ;;  %845 = vmatprep.mubr.msk.bf16.mxu1 %vm528_vm2, %v990_v47 }
 0x389   : > { %v925_v34 = vunpack.i.h.bf16 %v923_v32  ;;  %v924_v35 = vunpack.i.l.bf16 %v923_v32  ;;  %v931_v36 = vpack.i.bf16 %v437_v29, %v436_v30 }
 0x38b   : > { %v445_v37 = vsel %vm268_vm0, %v925_v34, 0.0  ;;  %v444_v38 = vsel %vm268_vm0, %v924_v35, 0.0  ;;  %932 = vrot.lane.b32.xlu1 %v931_v36, %s1011_s27 }
 0x38c   : > { %v447_v39 = vsel %vm1068_vm1, %v445_v37, 0.0  ;;  %v446_v40 = vsel %vm1068_vm1, %v444_v38, 0.0  ;;  %v822_v41 = vpack.c.bf16 %v445_v37, %v444_v38  ;;  %v928_v42 = vpop.permute.xlu1 %927 }
 0x38d   : > { %v930_v43 = vunpack.i.h.bf16 %v928_v42  ;;  %v929_v44 = vunpack.i.l.bf16 %v928_v42  ;;  %v951_v45 = vpack.i.bf16 %v447_v39, %v446_v40 }
 0x38f   : > { %v816_v46 = vpack.c.bf16 %v930_v43, %v929_v44  ;;  %952 = vrot.lane.b32.xlu0 %v951_v45, %s1011_s27  ;;  %937 = vrot.lane.b32.xlu1 %v951_v45, %s1010_s26 }
 0x391   : > { %817 = vmatpush1.bf16.msk.msra.mxu1 %vm1104_vm7, %v816_v46 }
 0x392   : > { %534 = vmatprep.subr.bf16.mxu1 %v1013_v17 }
 0x393   : > { %947 = vrot.lane.b32.xlu1 %v931_v36, %s1010_s26  ;;  %516 = vperm.xlu0 %957, %v1094_v16  }
 0x397   : > { %512 = vperm.xlu1 %956, %v1089_v15   ;;  %959 = vset.pattern.permute.xlu0 %v1018_v4 }
 0x39b   : > { %958 = vset.pattern.permute.xlu1 %v1018_v4 }
 0x3fd   : > { %v933_v49 = vpop.permute.xlu1 %932 }
 0x3fe   : > { %v935_v50 = vunpack.i.h.bf16 %v933_v49  ;;  %v934_v51 = vunpack.i.l.bf16 %v933_v49 }
 0x400   : > { %v819_v52 = vpack.c.bf16 %v935_v50, %v934_v51 }
 0x401   : > { %v938_v53 = vpop.permute.xlu1 %937  ;;  %v953_v62 = vpop.permute.xlu0 %952 }
 0x402   : > { %820 = vmatpush1.bf16.msk.msra.mxu1 %vm1104_vm7, %v819_v52  ;;  %v940_v54 = vunpack.i.h.bf16 %v938_v53  ;;  %v939_v55 = vunpack.i.l.bf16 %v938_v53  ;;  %v955_v63 = vunpack.i.h.bf16 %v953_v62  ;;  %v954_v0 = vunpack.i.l.bf16 %v953_v62 }
 0x403   : > { %536 = vmatprep.subr.bf16.mxu1 %v1013_v17 }
 0x404   : > { %v830_v58 = vpack.c.bf16 %v940_v54, %v939_v55  ;;  %v843_v2 = vpack.c.bf16 %v955_v63, %v954_v0 }
 0x405   : > { %v948_v59 = vpop.permute.xlu1 %947 }
 0x406   : > { %823 = vmatpush1.bf16.msk.msra.mxu1 %vm821_vm9, %v822_v41  ;;  %v950_v61 = vunpack.i.h.bf16 %v948_v59  ;;  %v949_v10 = vunpack.i.l.bf16 %v948_v59 }
 0x407   : > { %538 = vmatprep.subr.bf16.mxu1 %v1013_v17 }
 0x408   : > { %v840_v1 = vpack.c.bf16 %v950_v61, %v949_v10 }
 0x40a   : > { %539 = vmatpush1.bf16.msra.mxu1 %v506_v22 }
 0x40b   : > { %540 = vmatprep.subr.bf16.mxu1 %v1013_v17 }
 0x40e   : > { %826 = vmatpush1.bf16.msk.msra.mxu1 %vm824_vm10, %v825_v31  ;;  %v517_v33 = vpop.permute.xlu0 %516 }
 0x40f   : > { %542 = vmatprep.subr.bf16.mxu1 %v1013_v17 }
 0x412   : > { %831 = vmatpush1.bf16.msk.msra.mxu1 %vm1115_vm13, %v830_v58  ;;  %v513_v5 = vpop.permute.xlu1 %512 }
 0x413   : > { %544 = vmatprep.subr.bf16.mxu1 %v1013_v17 }
 0x416   : > { %836 = vmatpush1.bf16.msk.msra.mxu1 %vm1115_vm13, %v835_v60 }
 0x417   : > { %546 = vmatprep.subr.bf16.mxu1 %v1013_v17 }
 0x41a   : > { %841 = vmatpush1.bf16.msk.msra.mxu1 %vm1115_vm13, %v840_v1 }
 0x41b   : > { %562 = vmatprep.subr.bf16.mxu1 %v1013_v17 }
 0x41e   : > { %844 = vmatpush2.bf16.msk.msra.mxu1 %vm1104_vm7, %v843_v2  ;;  %vm633_vm7 = vcmask 519168  }
 0x421   : > { %565 = vmatmul.mubr.bf16.vlgmr.msra.gmra.mxu1 %v988_v3 }
 0x4e1   : > { %v566_v7 = vpop.f32.mrf.mxu1 }
 0x4e2   : > { %v567_v8 = vadd.f32 %v566_v7, %v513_v5 }
 0x4e3   : > { %v568_v9 = vpop.f32.mrf.mxu1 }
 0x4e4   : > { %v575_v11 = vmul.f32 0.01, %v567_v8  ;;  %vm573_vm1 = vcmp.ge.f32.partialorder %v567_v8, 0.0 }
 0x4e5   : > { %v569_v17 = vpop.f32.mrf.mxu1 }
 0x4e6   : > { %v570_v12 = vadd.f32 %v569_v17, %v517_v33  ;;  %v577_v13 = vsel %vm573_vm1, %v567_v8, %v575_v11 }
 0x4e7   : > { %v571_v14 = vpop.f32.mrf.mxu1  ;;  %v579_v18 = vsel %vm378_vm4, %v577_v13, 0.0 }
 0x4e8   : > { %v576_v19 = vmul.f32 0.01, %v570_v12  ;;  %580 = vadd.xlane.f32.xlu1 %v579_v18  ;;  %vm574_vm3 = vcmp.ge.f32.partialorder %v570_v12, 0.0 }
 0x4ea   : > { %v578_v25 = vsel %vm574_vm3, %v570_v12, %v576_v19 }
 0x4eb   : > { %v582_v20 = vsel %vm378_vm4, %v578_v25, 0.0 }
 0x4ec   : > { %583 = vadd.xlane.f32.xlu0 %v582_v20 }
 0x4f9   : > { %606 = vperm.xlu1 %958, %v1089_v15  }
 0x4fd   : > { %960 = vset.pattern.permute.xlu1 %v1019_v21 }
 0x571   : > { %v581_v22 = vpop.xlane.xlu1 %580 }
 0x572   : > { %v585_v23 = vmul.f32 0.015625, %v581_v22 }
 0x574   : > { %v587_v24 = vsub.f32 %v577_v13, %v585_v23 }
 0x575   : > { %v584_v26 = vpop.xlane.xlu0 %583  ;;  %v607_v34 = vpop.permute.xlu1 %606 }
 0x576   : > { %v586_v27 = vmul.f32 0.015625, %v584_v26  ;;  %v589_v28 = vmul.f32 %v587_v24, %v587_v24 }
 0x578   : > { %v588_v29 = vsub.f32 %v578_v25, %v586_v27  ;;  %v591_v30 = vsel %vm378_vm4, %v589_v28, 0.0 }
 0x579   : > { %592 = vadd.xlane.f32.xlu1 %v591_v30 }
 0x57a   : > { %v590_v31 = vmul.f32 %v588_v29, %v588_v29 }
 0x57c   : > { %v594_v32 = vsel %vm378_vm4, %v590_v31, 0.0 }
 0x57d   : > { %595 = vadd.xlane.f32.xlu0 %v594_v32 }
 0x58a   : > { %616 = vperm.xlu1 %960, %v1089_v15  }
 0x58e   : > { %620 = vperm.xlu1 %960, %v1094_v16  }
 0x593   : > { %610 = vperm.xlu0 %959, %v1094_v16  }
 0x597   : > { %986 = vset.pattern.permute.xlu0 %v1019_v21 }
 0x602   : > { %v593_v35 = vpop.xlane.xlu1 %592 }
 0x603   : > { %v597_v36 = vmul.f32 0.015625, %v593_v35 }
 0x605   : > { %v599_v37 = vadd.f32 1e-05, %v597_v36 }
 0x606   : > { %v596_v38 = vpop.xlane.xlu0 %595  ;;  %v617_v43 = vpop.permute.xlu1 %616 }
 0x607   : > { %995 = vrsqrt.f32 %v599_v37  ;;  %v598_v39 = vmul.f32 0.015625, %v596_v38 }
 0x609   : > { %v600_v40 = vadd.f32 1e-05, %v598_v39 }
 0x60a   : > { %v621_v49 = vpop.permute.xlu1 %620 }
 0x60b   : > { %997 = vrsqrt.f32 %v600_v40 }
 0x60e   : > { %v611_v45 = vpop.permute.xlu0 %610 }
 0x614   : > { %v996_v41 = vpop.eup %995 }
 0x615   : > { %v603_v42 = vmul.f32 %v996_v41, %v587_v24 }
 0x617   : > { %v613_v15 = vmul.f32 %v607_v34, %v603_v42 }
 0x618   : > { %v998_v44 = vpop.eup %997 }
 0x619   : > { %v623_v46 = vadd.f32 %v617_v43, %v613_v15  ;;  %v604_v16 = vmul.f32 %v998_v44, %v588_v29 }
 0x61b   : > { %v854_v47 = vpack.c.bf16 %v623_v46, %v623_v46  ;;  %v614_v48 = vmul.f32 %v611_v45, %v604_v16 }
 0x61d   : > { %634 = vst.msk [vmem:[%s229_s16] sm:$0xf] %vm633_vm7, %v854_v47  ;;  %v624_v50 = vadd.f32 %v621_v49, %v614_v48 }
 0x61f   : > { %v855_v51 = vpack.c.bf16 %v624_v50, %v624_v50  ;;  %v961_v52 = vpack.i.bf16 %v624_v50, %v623_v46 }
 0x621   : > { %635 = vst.msk [vmem:[%s229_s16 + $0x4] sm:$0xf] %vm633_vm7, %v855_v51  ;;  %962 = vrot.lane.b32.xlu1 %v961_v52, %s1007_s24 }
 0x693   : > { %v963_v53 = vpop.permute.xlu1 %962 }
 0x694   : > { %v965_v54 = vunpack.i.h.bf16 %v963_v53  ;;  %v964_v55 = vunpack.i.l.bf16 %v963_v53 }
 0x696   : > { %v645_v56 = vsel %vm268_vm0, %v965_v54, 0.0  ;;  %v644_v6 = vsel %vm268_vm0, %v964_v55, 0.0  ;;  %vm684_vm0 = vcmask 195584  }
 0x697   : > { %v647_v57 = vmax.f32 %v624_v50, %v645_v56  ;;  %v646_v58 = vmax.f32 %v623_v46, %v644_v6 }
 0x699   : > { %v966_v59 = vpack.i.bf16 %v647_v57, %v646_v58 }
 0x69b   : > { %967 = vrot.lane.b32.xlu1 %v966_v59, %s1011_s27 }
 0x70d   : > { %v968_v60 = vpop.permute.xlu1 %967 }
 0x70e   : > { %v970_v61 = vunpack.i.h.bf16 %v968_v60  ;;  %v969_v10 = vunpack.i.l.bf16 %v968_v60 }
 0x710   : > { %v657_v62 = vsel %vm297_vm5, %v970_v61, 0.0  ;;  %v656_v63 = vsel %vm297_vm5, %v969_v10, 0.0  ;;  %vm695_vm5 = vcmask 257024  }
 0x711   : > { %v659_v0 = vmax.f32 %v647_v57, %v657_v62  ;;  %v658_v1 = vmax.f32 %v646_v58, %v656_v63 }
 0x713   : > { %v971_v2 = vpack.i.bf16 %v659_v0, %v658_v1 }
 0x715   : > { %972 = vrot.lane.b32.xlu1 %v971_v2, %s1011_s27 }
 0x719   : > { %977 = vrot.lane.b32.xlu1 %v971_v2, %s1020_s17 }
 0x71d   : > { %982 = vrot.lane.b32.xlu1 %v971_v2, %s1021_s20 }
 0x787   : > { %v973_v3 = vpop.permute.xlu1 %972 }
 0x788   : > { %v975_v5 = vunpack.i.h.bf16 %v973_v3  ;;  %v974_v7 = vunpack.i.l.bf16 %v973_v3 }
 0x78a   : > { %v681_v11 = vsel %vm284_vm8, %v659_v0, %v975_v5  ;;  %v680_v17 = vsel %vm284_vm8, %v658_v1, %v974_v7 }
 0x78b   : > { %v978_v4 = vpop.permute.xlu1 %977 }
 0x78c   : > { %v980_v8 = vunpack.i.h.bf16 %v978_v4  ;;  %v979_v9 = vunpack.i.l.bf16 %v978_v4 }
 0x78e   : > { %v682_v14 = vsel %vm528_vm2, %v680_v17, %v979_v9  ;;  %v683_v18 = vsel %vm528_vm2, %v681_v11, %v980_v8 }
 0x78f   : > { %v983_v33 = vpop.permute.xlu1 %982 }
 0x790   : > { %v985_v12 = vunpack.i.h.bf16 %v983_v33  ;;  %v984_v13 = vunpack.i.l.bf16 %v983_v33 }
 0x792   : > { %v685_v19 = vsel %vm684_vm0, %v682_v14, %v984_v13  ;;  %v686_v25 = vsel %vm684_vm0, %v683_v18, %v985_v12 }
 0x793   : > { %v856_v20 = vpack.c.bf16 %v685_v19, %v685_v19  ;;  %v857_v21 = vpack.c.bf16 %v686_v25, %v686_v25 }
 0x795   : > { %696 = vst.msk [vmem:[%s234_s23] sm:$0xf] %vm695_vm5, %v856_v20  ;;  %697 = vst.msk [vmem:[%s234_s23 + $0x4] sm:$0xf] %vm695_vm5, %v857_v21 }
 0x796 PF: > { %s16_s18 = sadd.s32 1, %s1005_s18  }
 0x797   : > { %p13_p4 = scmp.ge.s32.totalorder %s16_s18, 4  }
 0x799   :  { %15 = sbr.rel (!%p13_p4) target bundleno = 1 (0x1), region = 78 }

// kernel: unet_forward.7
= control target key start
LH: loop header
LB: loop body
LE: loop exit
PB: predicated region body
PF: predicated region fallthrough
CT: control target
= control target key end

     0   :  { %s1414_s15 = smov 0   ;;  %s1744_s0 = inlined_call_operand.vmem [shape: bf16[2,16,16], index: 0, kind: input, shape index: {}]   ;;  %s1745_s1 = inlined_call_operand.vmem [shape: bf16[32,144], index: 1, kind: input, shape index: {}]   ;;  %s1746_s2 = inlined_call_operand.vmem [shape: bf16[32,288], index: 2, kind: input, shape index: {}]   ;;  %s1747_s3 = inlined_call_operand.vmem [shape: f32[32,8], index: 3, kind: input, shape index: {}]   ;;  %s1748_s4 = inlined_call_operand.vmem [shape: bf16[2,32,16], index: 4, kind: output, shape index: {}]  }
   0x1 LB: > { %s1022_s16 = sadd.s32 4294967295, %s1377_s15   ;;  %p1026_p0 = scmp.ge.s32.totalorder %s1377_s15, 1  ;;  %s1377_s15 = sphi %s1414_s15, %s14_s15  }
   0x2   : > { %p162_p1 = scmp.lt.s32.totalorder %s1377_s15, 3 }
   0x4   : > { %p163_p2 = pnand %p1026_p0, %p162_p1 }
   0x5   : > { %p188_p3 = scmp.lt.s32.totalorder (!%p163_p2), %s1022_s16, 1  ;;  %s1379_s21 = smov (!%p163_p2), 1  }
   0x6   : > { %166 = sbr.rel (%p163_p2) target bundleno = 1689 (0x699), region = 36  ;;  %s1380_s22 = smov (!%p163_p2), 124  }
   0x7   : > { %s1382_s23 = smov (!%p163_p2), 127   ;;  %s1383_s24 = smov (!%p163_p2), 4  }
   0xb   : > { %s1762_s16 = smov (!%p188_p3, %s1022_s16), 1  ;;  %v1381_v4 = vmov 0   ;;  %v199_v5 = vlaneseq  ;;  %vm298_vm0 = vcmask 97280   ;;  %vm231_vm2 = vcmask 7168   ;;  %v1342_v33 = vld [vmem:[%s1745_s1 + $0x4] ss:$8 sps:$4 sm:$0xff]  }
   0xc   : > { %s1142_s17 = sshll.u32 %s1762_s16, 3  ;;  %363 = vmatprep.subr.bf16.mxu0 %v1381_v4  ;;  %1247 = vset.pattern.permute.xlu1 %v1381_v4  ;;  %vm1442_vm3 = vmpackc.low %vm298_vm0, %vm298_vm0  ;;  %vm244_vm4 = vcmask 121856   ;;  %vm356_vm6 = vcmask 130048   ;;  %v1477_v34 = vld [vmem:[%s1747_s3 + $0x18] sm:$0xff]  ;;  %v1482_v35 = vld [vmem:[%s1747_s3 + $0x10] sm:$0xff]  ;;  %vm273_vm8 = vcmask 31744  }
   0xd   : > { %s192_s20 = scalar_lea.vmem %s1744_s0, %s1142_s17  ;;  %1246 = vset.pattern.permute.xlu0 %v1381_v4  ;;  %v200_v6 = vand.u32 127, %v199_v5  ;;  %1066 = vmatprep.mubr.msk.bf16.mxu0 %vm356_vm6, %v1342_v33  ;;  %v1489_v36 = vld [vmem:[%s1747_s3] sm:$0xff]  ;;  %v1494_v37 = vld [vmem:[%s1747_s3 + $0x8] sm:$0xff]  ;;  %vm1048_vm10 = vmneg %vm273_vm8  ;;  %vm737_vm0 = vcmask 261120   ;;  %s1143_s29 = sshll.u32 %s1762_s16, 4 }
   0xe   : > { %v1428_v0 = vld [vmem:[%s192_s20] sm:$0xff]   ;;  %vm1523_vm11 = vmpackc.low %vm1048_vm10, %vm1048_vm10  ;;  %v1343_v62 = vld [vmem:[%s1745_s1 + $0x14] ss:$8 sps:$4 sm:$0xff]   ;;  %s197_s6 = scalar_lea.vmem %s1748_s4, %s1143_s29 }
   0xf   : > { %v217_v1 = vunpack.c.l.bf16 %v1428_v0  ;;  %v218_v2 = vunpack.c.h.bf16 %v1428_v0  ;;  %v205_v7 = vand.u32 3, %v200_v6  ;;  %v1340_v61 = vld [vmem:[%s1745_s1] ss:$8 sps:$4 sm:$0xff]   ;;  %v1345_v63 = vld [vmem:[%s1745_s1 + $0x10] ss:$8 sps:$4 sm:$0xff]  }
  0x10   : > { %v1351_v51 = vld [vmem:[%s1746_s2 + $0x18] ss:$12 sps:$4 sm:$0xff]  }
  0x11   : > { %v1206_v3 = vpack.i.bf16 %v218_v2, %v217_v1  ;;  %vm1438_vm1 = vcmp.ge.s32.totalorder %v205_v7, 1  ;;  %vm1452_vm5 = vcmp.le.s32.totalorder %v205_v7, 2 }
  0x12   : > { %vm1504_vm7 = vmpackc.low %vm1452_vm5, %vm1452_vm5 }
  0x13   : > { %1207 = vrot.lane.b32.xlu0 %v1206_v3, %s1379_s21  ;;  %1217 = vrot.lane.b32.xlu1 %v1206_v3, %s1380_s22  ;;  %vm1516_vm9 = vmpackc.low %vm1438_vm1, %vm1438_vm1 }
  0x17   : > { %1212 = vrot.lane.b32.xlu0 %v1206_v3, %s1382_s23 }
  0x85   : > { %v1208_v9 = vpop.permute.xlu0 %1207  ;;  %v1218_v10 = vpop.permute.xlu1 %1217 }
  0x86   : > { %v1210_v11 = vunpack.i.h.bf16 %v1208_v9  ;;  %v1209_v12 = vunpack.i.l.bf16 %v1208_v9  ;;  %v1220_v13 = vunpack.i.h.bf16 %v1218_v10  ;;  %v1219_v14 = vunpack.i.l.bf16 %v1218_v10 }
  0x88   : > { %v233_v16 = vsel %vm231_vm2, 0.0, %v1210_v11  ;;  %v232_v17 = vsel %vm231_vm2, 0.0, %v1209_v12  ;;  %v1037_v18 = vpack.c.bf16 %v1220_v13, %v1219_v14 }
  0x89   : > { %v237_v19 = vsel %vm1438_vm1, %v233_v16, 0.0  ;;  %v236_v20 = vsel %vm1438_vm1, %v232_v17, 0.0  ;;  %v1046_v21 = vpack.c.bf16 %v233_v16, %v232_v17  ;;  %v1213_v22 = vpop.permute.xlu0 %1212 }
  0x8a   : > { %v1215_v24 = vunpack.i.h.bf16 %v1213_v22  ;;  %v1214_v25 = vunpack.i.l.bf16 %v1213_v22  ;;  %v1221_v26 = vpack.i.bf16 %v237_v19, %v236_v20  ;;  %1038 = vmatpush1.bf16.msk.msra.mxu0 %vm1442_vm3, %v1037_v18 }
  0x8b   : > { %365 = vmatprep.subr.bf16.mxu0 %v1381_v4 }
  0x8c   : > { %v246_v27 = vsel %vm244_vm4, %v1215_v24, 0.0  ;;  %v245_v28 = vsel %vm244_vm4, %v1214_v25, 0.0  ;;  %1222 = vrot.lane.b32.xlu1 %v1221_v26, %s1380_s22 }
  0x8d   : > { %v250_v29 = vsel %vm1452_vm5, %v246_v27, 0.0  ;;  %v249_v30 = vsel %vm1452_vm5, %v245_v28, 0.0  ;;  %v1043_v31 = vpack.c.bf16 %v246_v27, %v245_v28 }
  0x8e   : > { %v1226_v32 = vpack.i.bf16 %v250_v29, %v249_v30 }
  0x90   : > { %1227 = vrot.lane.b32.xlu0 %v1226_v32, %s1383_s24  ;;  %1232 = vrot.lane.b32.xlu1 %v1206_v3, %s1383_s24 }
  0x94   : > { %1237 = vrot.lane.b32.xlu0 %v1221_v26, %s1383_s24  ;;  %1242 = vrot.lane.b32.xlu1 %v1226_v32, %s1380_s22 }
  0x98   : > { %335 = vperm.xlu1 %1247, %v1477_v34   ;;  %330 = vperm.xlu0 %1246, %v1482_v35  }
  0x9c   : > { %320 = vperm.xlu1 %1247, %v1489_v36   ;;  %325 = vperm.xlu0 %1246, %v1494_v37  }
  0xfe   : > { %v1223_v38 = vpop.permute.xlu1 %1222 }
  0xff   : > { %v1225_v39 = vunpack.i.h.bf16 %v1223_v38  ;;  %v1224_v40 = vunpack.i.l.bf16 %v1223_v38 }
 0x101   : > { %v1040_v41 = vpack.c.bf16 %v1225_v39, %v1224_v40 }
 0x102   : > { %v1228_v43 = vpop.permute.xlu0 %1227  ;;  %v1233_v47 = vpop.permute.xlu1 %1232 }
 0x103   : > { %1041 = vmatpush1.bf16.msk.msra.mxu0 %vm1442_vm3, %v1040_v41  ;;  %v1230_v44 = vunpack.i.h.bf16 %v1228_v43  ;;  %v1229_v45 = vunpack.i.l.bf16 %v1228_v43  ;;  %v1235_v49 = vunpack.i.h.bf16 %v1233_v47  ;;  %v1234_v50 = vunpack.i.l.bf16 %v1233_v47 }
 0x104   : > { %367 = vmatprep.subr.bf16.mxu0 %v1381_v4 }
 0x105   : > { %v1051_v48 = vpack.c.bf16 %v1230_v44, %v1229_v45  ;;  %v1056_v53 = vpack.c.bf16 %v1235_v49, %v1234_v50 }
 0x106   : > { %v1238_v52 = vpop.permute.xlu0 %1237  ;;  %v1243_v56 = vpop.permute.xlu1 %1242 }
 0x107   : > { %1044 = vmatpush1.bf16.msk.msra.mxu0 %vm1504_vm7, %v1043_v31  ;;  %v1240_v54 = vunpack.i.h.bf16 %v1238_v52  ;;  %v1239_v55 = vunpack.i.l.bf16 %v1238_v52  ;;  %v1245_v58 = vunpack.i.h.bf16 %v1243_v56  ;;  %v1244_v59 = vunpack.i.l.bf16 %v1243_v56 }
 0x108   : > { %369 = vmatprep.subr.bf16.mxu0 %v1381_v4  ;;  %v1384_v31 = vmov 1  }
 0x109   : > { %v1061_v57 = vpack.c.bf16 %v1240_v54, %v1239_v55  ;;  %v1064_v60 = vpack.c.bf16 %v1245_v58, %v1244_v59  ;;  %1249 = vset.pattern.permute.xlu1 %v1384_v31  ;;  %1248 = vset.pattern.permute.xlu0 %v1384_v31  ;;  %v1385_v55 = vmov 2  }
 0x10b   : > { %370 = vmatpush1.bf16.msra.mxu0 %v1428_v0 }
 0x10c   : > { %371 = vmatprep.subr.bf16.mxu0 %v1381_v4 }
 0x10f   : > { %1047 = vmatpush1.bf16.msk.msra.mxu0 %vm1516_vm9, %v1046_v21 }
 0x110   : > { %373 = vmatprep.subr.bf16.mxu0 %v1381_v4 }
 0x113   : > { %1052 = vmatpush1.bf16.msk.msra.mxu0 %vm1523_vm11, %v1051_v48  ;;  %v331_v0 = vpop.permute.xlu0 %330  ;;  %v336_v2 = vpop.permute.xlu1 %335 }
 0x114   : > { %375 = vmatprep.subr.bf16.mxu0 %v1381_v4 }
 0x117   : > { %1057 = vmatpush1.bf16.msk.msra.mxu0 %vm1523_vm11, %v1056_v53  ;;  %v321_v9 = vpop.permute.xlu1 %320 }
 0x118   : > { %377 = vmatprep.subr.bf16.mxu0 %v1381_v4 }
 0x11b   : > { %1062 = vmatpush1.bf16.msk.msra.mxu0 %vm1523_vm11, %v1061_v57 }
 0x11c   : > { %393 = vmatprep.subr.bf16.mxu0 %v1381_v4  ;;  %v326_v4 = vpop.permute.xlu0 %325 }
 0x11f   : > { %1065 = vmatpush2.bf16.msk.msra.mxu0 %vm1442_vm3, %v1064_v60 }
 0x122   : > { %396 = vmatmul.mubr.bf16.vlgmr.msra.gmra.mxu0 %v1340_v61 }
 0x123   : > { %1067 = vmatprep.mubr.msk.bf16.mxu0 %vm356_vm6, %v1343_v62 }
 0x12a   : > { %404 = vmatmul.mubr.bf16.gmra.mxu0 %v1345_v63 }
 0x1e2   : > { %v397_v1 = vpop.f32.mrf.mxu0 }
 0x1e3   : > { %v398_v13 = vadd.f32 %v397_v1, %v321_v9 }
 0x1e4   : > { %v399_v3 = vpop.f32.mrf.mxu0 }
 0x1e5   : > { %v416_v22 = vmul.f32 0.01, %v398_v13  ;;  %vm412_vm15 = vcmp.ge.f32.partialorder %v398_v13, 0.0 }
 0x1e6   : > { %v400_v5 = vpop.f32.mrf.mxu0 }
 0x1e7   : > { %v401_v7 = vadd.f32 %v400_v5, %v326_v4  ;;  %v420_v29 = vsel %vm412_vm15, %v398_v13, %v416_v22 }
 0x1e8   : > { %v402_v6 = vpop.f32.mrf.mxu0  ;;  %v424_v30 = vsel %vm356_vm6, %v420_v29, 0.0 }
 0x1e9   : > { %v417_v14 = vmul.f32 0.01, %v401_v7  ;;  %vm413_vm13 = vcmp.ge.f32.partialorder %v401_v7, 0.0 }
 0x1ea   : > { %v405_v10 = vpop.f32.mrf.mxu0 }
 0x1eb   : > { %v406_v11 = vadd.f32 %v405_v10, %v331_v0  ;;  %v421_v25 = vsel %vm413_vm13, %v401_v7, %v417_v14 }
 0x1ec   : > { %v407_v12 = vpop.f32.mrf.mxu0  ;;  %v427_v28 = vsel %vm356_vm6, %v421_v25, 0.0 }
 0x1ed   : > { %v418_v16 = vmul.f32 0.01, %v406_v11  ;;  %vm414_vm12 = vcmp.ge.f32.partialorder %v406_v11, 0.0 }
 0x1ee   : > { %v408_v17 = vpop.f32.mrf.mxu0 }
 0x1ef   : > { %v409_v18 = vadd.f32 %v408_v17, %v336_v2  ;;  %v422_v19 = vsel %vm414_vm12, %v406_v11, %v418_v16 }
 0x1f0   : > { %v410_v20 = vpop.f32.mrf.mxu0  ;;  %v430_v21 = vsel %vm356_vm6, %v422_v19, 0.0 }
 0x1f1   : > { %v419_v24 = vmul.f32 0.01, %v409_v18  ;;  %431 = vadd.xlane.f32.xlu1 %v430_v21  ;;  %vm415_vm14 = vcmp.ge.f32.partialorder %v409_v18, 0.0 }
 0x1f3   : > { %v423_v26 = vsel %vm415_vm14, %v409_v18, %v419_v24 }
 0x1f4   : > { %v433_v27 = vsel %vm356_vm6, %v423_v26, 0.0 }
 0x1f5   : > { %434 = vadd.xlane.f32.xlu0 %v433_v27  ;;  %428 = vadd.xlane.f32.xlu1 %v427_v28 }
 0x1f9   : > { %425 = vadd.xlane.f32.xlu0 %v424_v30 }
 0x27a   : > { %v432_v32 = vpop.xlane.xlu1 %431 }
 0x27b   : > { %v439_v40 = vmul.f32 0.0625, %v432_v32 }
 0x27d   : > { %v443_v47 = vsub.f32 %v422_v19, %v439_v40 }
 0x27e   : > { %v435_v33 = vpop.xlane.xlu0 %434  ;;  %v429_v38 = vpop.xlane.xlu1 %428 }
 0x27f   : > { %v438_v39 = vmul.f32 0.0625, %v429_v38  ;;  %v447_v53 = vmul.f32 %v443_v47, %v443_v47  ;;  %v440_v56 = vmul.f32 0.0625, %v435_v33 }
 0x281   : > { %v442_v41 = vsub.f32 %v421_v25, %v438_v39  ;;  %v455_v54 = vsel %vm356_vm6, %v447_v53, 0.0  ;;  %v444_v57 = vsub.f32 %v423_v26, %v440_v56 }
 0x282   : > { %v426_v43 = vpop.xlane.xlu0 %425 }
 0x283   : > { %v437_v44 = vmul.f32 0.0625, %v426_v43  ;;  %v446_v45 = vmul.f32 %v442_v41, %v442_v41  ;;  %v448_v58 = vmul.f32 %v444_v57, %v444_v57 }
 0x285   : > { %v441_v48 = vsub.f32 %v420_v29, %v437_v44  ;;  %v452_v49 = vsel %vm356_vm6, %v446_v45, 0.0  ;;  %v458_v59 = vsel %vm356_vm6, %v448_v58, 0.0 }
 0x286   : > { %453 = vadd.xlane.f32.xlu1 %v452_v49 }
 0x287   : > { %v445_v50 = vmul.f32 %v441_v48, %v441_v48 }
 0x289   : > { %v449_v52 = vsel %vm356_vm6, %v445_v50, 0.0 }
 0x28a   : > { %450 = vadd.xlane.f32.xlu0 %v449_v52 }
 0x28e   : > { %456 = vadd.xlane.f32.xlu0 %v455_v54 }
 0x297   : > { %490 = vperm.xlu1 %1249, %v1477_v34  }
 0x29b   : > { %1250 = vset.pattern.permute.xlu1 %v1385_v55 }
 0x29c   : > { %506 = vperm.xlu1 %1250, %v1482_v35  }
 0x2a0   : > { %510 = vperm.xlu1 %1250, %v1477_v34  }
 0x2a4   : > { %1251 = vset.pattern.permute.xlu1 %v1384_v31  ;;  %486 = vperm.xlu0 %1248, %v1482_v35  }
 0x2a5   : > { %478 = vperm.xlu1 %1251, %v1489_v36  }
 0x2a9   : > { %482 = vperm.xlu1 %1251, %v1494_v37  }
 0x2ad   : > { %1252 = vset.pattern.permute.xlu1 %v1385_v55 }
 0x2ae   : > { %498 = vperm.xlu1 %1252, %v1489_v36  }
 0x2d2   : > { %459 = vadd.xlane.f32.xlu1 %v458_v59 }
 0x2e3   : > { %502 = vperm.xlu1 %1252, %v1494_v37  }
 0x30f   : > { %v454_v60 = vpop.xlane.xlu1 %453 }
 0x310   : > { %v462_v1 = vmul.f32 0.0625, %v454_v60 }
 0x312   : > { %v466_v4 = vadd.f32 1e-05, %v462_v1 }
 0x313   : > { %v491_v61 = vpop.permute.xlu1 %490  ;;  %v451_v62 = vpop.xlane.xlu0 %450 }
 0x314   : > { %v461_v0 = vmul.f32 0.0625, %v451_v62 }
 0x316   : > { %v465_v2 = vadd.f32 1e-05, %v461_v0 }
 0x317   : > { %v507_v63 = vpop.permute.xlu1 %506  ;;  %v457_v6 = vpop.xlane.xlu0 %456 }
 0x318   : > { %1355 = vrsqrt.f32 %v465_v2  ;;  %v463_v9 = vmul.f32 0.0625, %v457_v6 }
 0x319   : > { %1357 = vrsqrt.f32 %v466_v4 }
 0x31a   : > { %v467_v11 = vadd.f32 1e-05, %v463_v9 }
 0x31b   : > { %v511_v3 = vpop.permute.xlu1 %510 }
 0x31c   : > { %1359 = vrsqrt.f32 %v467_v11 }
 0x31f   : > { %v487_v30 = vpop.permute.xlu0 %486 }
 0x320   : > { %v479_v5 = vpop.permute.xlu1 %478 }
 0x324   : > { %v483_v7 = vpop.permute.xlu1 %482 }
 0x325   : > { %v1356_v10 = vpop.eup %1355 }
 0x326   : > { %v1358_v12 = vpop.eup %1357  ;;  %v473_v14 = vmul.f32 %v1356_v10, %v441_v48 }
 0x327   : > { %v474_v16 = vmul.f32 %v1358_v12, %v442_v41 }
 0x328   : > { %v493_v18 = vmul.f32 %v479_v5, %v473_v14 }
 0x329   : > { %v499_v13 = vpop.permute.xlu1 %498  ;;  %v494_v20 = vmul.f32 %v483_v7, %v474_v16  ;;  %v1360_v28 = vpop.eup %1359 }
 0x32a   : > { %v1564_v24 = vadd.f32 %v499_v13, %v493_v18  ;;  %v475_v29 = vmul.f32 %v1360_v28, %v443_v47 }
 0x32c   : > { %v495_v32 = vmul.f32 %v487_v30, %v475_v29 }
 0x32e   : > { %v1574_v39 = vadd.f32 %v507_v63, %v495_v32 }
 0x35b   : > { %v460_v17 = vpop.xlane.xlu1 %459 }
 0x35c   : > { %v464_v19 = vmul.f32 0.0625, %v460_v17 }
 0x35e   : > { %v468_v21 = vadd.f32 1e-05, %v464_v19 }
 0x35f   : > { %v503_v22 = vpop.permute.xlu1 %502 }
 0x360   : > { %1361 = vrsqrt.f32 %v468_v21  ;;  %v1566_v25 = vadd.f32 %v503_v22, %v494_v20 }
 0x362   : > { %v1570_v26 = vpack.i.bf16 %v1566_v25, %v1564_v24  ;;  %v681_v27 = vpack.c.bf16 %v1566_v25, %v1564_v24  ;;  %v1352_v25 = vld [vmem:[%s1746_s2 + $0x8] ss:$12 sps:$4 sm:$0xff]  }
 0x36d   : > { %v1362_v31 = vpop.eup %1361 }
 0x36e   : > { %v476_v33 = vmul.f32 %v1362_v31, %v444_v57  ;;  %v1348_v31 = vld [vmem:[%s1746_s2 + $0x4] ss:$12 sps:$4 sm:$0xff]  }
 0x36f   : > { %776 = vmatprep.mubr.bf16.mxu1 %v1348_v31 }
 0x370   : > { %v496_v38 = vmul.f32 %v491_v61, %v476_v33 }
 0x372   : > { %v1576_v40 = vadd.f32 %v511_v3, %v496_v38 }
 0x374   : > { %v1263_v41 = vpack.i.bf16 %v1576_v40, %v1574_v39  ;;  %v682_v43 = vpack.c.bf16 %v1576_v40, %v1574_v39  ;;  %v1346_v39 = vld [vmem:[%s1746_s2] ss:$12 sps:$4 sm:$0xff]   ;;  %v1349_v40 = vld [vmem:[%s1746_s2 + $0x1c] ss:$12 sps:$4 sm:$0xff]  }
 0x376   : > { %1264 = vrot.lane.b32.xlu0 %v1263_v41, %s1382_s23  ;;  %1254 = vrot.lane.b32.xlu1 %v1263_v41, %s1379_s21 }
 0x37a   : > { %1269 = vrot.lane.b32.xlu0 %v1570_v26, %s1382_s23  ;;  %1259 = vrot.lane.b32.xlu1 %v1570_v26, %s1379_s21 }
 0x37e   : > { %1279 = vrot.lane.b32.xlu0 %v1570_v26, %s1380_s22  ;;  %1274 = vrot.lane.b32.xlu1 %v1263_v41, %s1380_s22 }
 0x3e8   : > { %v1265_v44 = vpop.permute.xlu0 %1264  ;;  %v1255_v45 = vpop.permute.xlu1 %1254 }
 0x3e9   : > { %v1267_v47 = vunpack.i.h.bf16 %v1265_v44  ;;  %v1266_v48 = vunpack.i.l.bf16 %v1265_v44  ;;  %v1257_v49 = vunpack.i.h.bf16 %v1255_v45  ;;  %v1256_v50 = vunpack.i.l.bf16 %v1255_v45 }
 0x3eb   : > { %v1592_v52 = vsel %vm244_vm4, %v1267_v47, 0.0  ;;  %v1595_v53 = vsel %vm244_vm4, %v1266_v48, 0.0  ;;  %v536_v54 = vsel %vm231_vm2, 0.0, %v1257_v49  ;;  %v535_v55 = vsel %vm231_vm2, 0.0, %v1256_v50 }
 0x3ec   : > { %v560_v56 = vsel %vm1452_vm5, %v1592_v52, 0.0  ;;  %v559_v57 = vsel %vm1452_vm5, %v1595_v53, 0.0  ;;  %v1123_v58 = vpack.c.bf16 %v1592_v52, %v1595_v53  ;;  %v540_v59 = vsel %vm1438_vm1, %v536_v54, 0.0  ;;  %v1270_v60 = vpop.permute.xlu0 %1269  ;;  %v1260_v61 = vpop.permute.xlu1 %1259 }
 0x3ed   : > { %v539_v62 = vsel %vm1438_vm1, %v535_v55, 0.0  ;;  %v1272_v63 = vunpack.i.h.bf16 %v1270_v60  ;;  %v1271_v0 = vunpack.i.l.bf16 %v1270_v60  ;;  %v1262_v1 = vunpack.i.h.bf16 %v1260_v61 }
 0x3ee   : > { %v1261_v2 = vunpack.i.l.bf16 %v1260_v61  ;;  %v1293_v3 = vpack.i.bf16 %v560_v56, %v559_v57  ;;  %v1283_v4 = vpack.i.bf16 %v540_v59, %v539_v62  ;;  %v1075_v29 = vpack.c.bf16 %v536_v54, %v535_v55 }
 0x3ef   : > { %v1612_v5 = vsel %vm244_vm4, %v1272_v63, 0.0  ;;  %v1615_v6 = vsel %vm244_vm4, %v1271_v0, 0.0  ;;  %v534_v7 = vsel %vm231_vm2, 0.0, %v1262_v1 }
 0x3f0   : > { %v558_v9 = vsel %vm1452_vm5, %v1612_v5, 0.0  ;;  %v557_v10 = vsel %vm1452_vm5, %v1615_v6, 0.0  ;;  %v1126_v11 = vpack.c.bf16 %v1612_v5, %v1615_v6  ;;  %v538_v12 = vsel %vm1438_vm1, %v534_v7, 0.0  ;;  %1294 = vrot.lane.b32.xlu0 %v1293_v3, %s1383_s24  ;;  %1284 = vrot.lane.b32.xlu1 %v1283_v4, %s1380_s22  ;;  %v1280_v13 = vpop.permute.xlu0 %1279  ;;  %v1275_v14 = vpop.permute.xlu1 %1274 }
 0x3f1   : > { %v533_v16 = vsel %vm231_vm2, 0.0, %v1261_v2  ;;  %v1282_v17 = vunpack.i.h.bf16 %v1280_v13  ;;  %v1277_v18 = vunpack.i.h.bf16 %v1275_v14  ;;  %v1281_v19 = vunpack.i.l.bf16 %v1280_v13 }
 0x3f2   : > { %v537_v23 = vsel %vm1438_vm1, %v533_v16, 0.0  ;;  %v1276_v20 = vunpack.i.l.bf16 %v1275_v14  ;;  %v1298_v21 = vpack.i.bf16 %v558_v9, %v557_v10  ;;  %v1078_v8 = vpack.c.bf16 %v534_v7, %v533_v16 }
 0x3f3   : > { %v1288_v22 = vpack.i.bf16 %v538_v12, %v537_v23  ;;  %v1114_v30 = vpack.c.bf16 %v1282_v17, %v1281_v19  ;;  %vm962_vm5 = vcmask 125952  }
 0x3f4   : > { %1299 = vrot.lane.b32.xlu0 %v1298_v21, %s1383_s24  ;;  %v1111_v28 = vpack.c.bf16 %v1277_v18, %v1276_v20 }
 0x3f5   : > { %1289 = vrot.lane.b32.xlu1 %v1288_v22, %s1380_s22 }
 0x3f6   : > { %1148 = vmatprep.subr.msk.bf16.mxu1 %vm1442_vm3, %v1111_v28 }
 0x3f7   : > { %1149 = vmatpush3.bf16.msk.msra.mxu1 %vm1516_vm9, %v1075_v29 }
 0x3f8   : > { %1309 = vrot.lane.b32.xlu0 %v1570_v26, %s1383_s24  ;;  %1150 = vmatprep.subr.msk.bf16.mxu1 %vm1442_vm3, %v1114_v30  ;;  %v1386_v26 = vmov 3  }
 0x3f9   : > { %1304 = vrot.lane.b32.xlu1 %v1263_v41, %s1383_s24  ;;  %1334 = vset.pattern.permute.xlu0 %v1386_v26 }
 0x3fa   : > { %1333 = vset.pattern.permute.xlu1 %v1386_v26 }
 0x3fb   : > { %1151 = vmatpush3.bf16.msk.msra.mxu1 %vm1516_vm9, %v1078_v8 }
 0x3fc   : > { %1319 = vrot.lane.b32.xlu0 %v1288_v22, %s1383_s24 }
 0x3fd   : > { %1314 = vrot.lane.b32.xlu1 %v1283_v4, %s1383_s24 }
 0x400   : > { %1329 = vrot.lane.b32.xlu0 %v1298_v21, %s1380_s22 }
 0x401   : > { %1324 = vrot.lane.b32.xlu1 %v1293_v3, %s1380_s22 }
 0x404   : > { %696 = vperm.xlu0 %1334, %v1494_v37  }
 0x405   : > { %692 = vperm.xlu1 %1333, %v1489_v36  }
 0x409   : > { %700 = vperm.xlu1 %1333, %v1482_v35  }
 0x40d   : > { %704 = vperm.xlu1 %1333, %v1477_v34  }
 0x462   : > { %v1295_v46 = vpop.permute.xlu0 %1294  ;;  %v1285_v32 = vpop.permute.xlu1 %1284 }
 0x463   : > { %v1297_v33 = vunpack.i.h.bf16 %v1295_v46  ;;  %v1296_v38 = vunpack.i.l.bf16 %v1295_v46  ;;  %v1287_v41 = vunpack.i.h.bf16 %v1285_v32  ;;  %v1286_v44 = vunpack.i.l.bf16 %v1285_v32 }
 0x465   : > { %v1083_v45 = vpack.c.bf16 %v1297_v33, %v1296_v38  ;;  %v1117_v47 = vpack.c.bf16 %v1287_v41, %v1286_v44 }
 0x466   : > { %v1300_v48 = vpop.permute.xlu0 %1299 }
 0x467   : > { %v1302_v49 = vunpack.i.h.bf16 %v1300_v48  ;;  %v1301_v50 = vunpack.i.l.bf16 %v1300_v48  ;;  %v1290_v54 = vpop.permute.xlu1 %1289  ;;  %1152 = vmatprep.subr.msk.bf16.mxu1 %vm1442_vm3, %v1117_v47 }
 0x468   : > { %v1292_v55 = vunpack.i.h.bf16 %v1290_v54  ;;  %v1291_v56 = vunpack.i.l.bf16 %v1290_v54  ;;  %1153 = vmatpush3.bf16.msk.msra.mxu1 %vm1523_vm11, %v1083_v45 }
 0x469   : > { %v1088_v57 = vpack.c.bf16 %v1302_v49, %v1301_v50 }
 0x46a   : > { %v1120_v59 = vpack.c.bf16 %v1292_v55, %v1291_v56  ;;  %v1310_v61 = vpop.permute.xlu0 %1309 }
 0x46b   : > { %v1305_v60 = vpop.permute.xlu1 %1304  ;;  %v1312_v1 = vunpack.i.h.bf16 %v1310_v61  ;;  %v1311_v2 = vunpack.i.l.bf16 %v1310_v61 }
 0x46c   : > { %v1307_v62 = vunpack.i.h.bf16 %v1305_v60  ;;  %v1306_v63 = vunpack.i.l.bf16 %v1305_v60  ;;  %1154 = vmatprep.subr.msk.bf16.mxu1 %vm1442_vm3, %v1120_v59 }
 0x46d   : > { %1155 = vmatpush3.bf16.msk.msra.mxu1 %vm1523_vm11, %v1088_v57  ;;  %v1098_v4 = vpack.c.bf16 %v1312_v1, %v1311_v2 }
 0x46e   : > { %v1093_v0 = vpack.c.bf16 %v1307_v62, %v1306_v63  ;;  %1156 = vmatprep.subr.msk.bf16.mxu1 %vm1504_vm7, %v1123_v58  ;;  %v1320_v7 = vpop.permute.xlu0 %1319 }
 0x46f   : > { %v1315_v3 = vpop.permute.xlu1 %1314  ;;  %v1322_v53 = vunpack.i.h.bf16 %v1320_v7  ;;  %v1321_v58 = vunpack.i.l.bf16 %v1320_v7 }
 0x470   : > { %v1317_v9 = vunpack.i.h.bf16 %v1315_v3  ;;  %v1316_v10 = vunpack.i.l.bf16 %v1315_v3 }
 0x471   : > { %1157 = vmatpush3.bf16.msk.msra.mxu1 %vm1523_vm11, %v1093_v0  ;;  %v1108_v42 = vpack.c.bf16 %v1322_v53, %v1321_v58 }
 0x472   : > { %1158 = vmatprep.subr.msk.bf16.mxu1 %vm1504_vm7, %v1126_v11  ;;  %v1103_v12 = vpack.c.bf16 %v1317_v9, %v1316_v10  ;;  %v1330_v6 = vpop.permute.xlu0 %1329 }
 0x473   : > { %v1325_v52 = vpop.permute.xlu1 %1324  ;;  %v1332_v11 = vunpack.i.h.bf16 %v1330_v6  ;;  %v1331_v14 = vunpack.i.l.bf16 %v1330_v6 }
 0x474   : > { %v1327_v13 = vunpack.i.h.bf16 %v1325_v52  ;;  %v1326_v5 = vunpack.i.l.bf16 %v1325_v52 }
 0x475   : > { %1159 = vmatpush3.bf16.msk.msra.mxu1 %vm1523_vm11, %v1098_v4  ;;  %v1132_v24 = vpack.c.bf16 %v1332_v11, %v1331_v14 }
 0x476   : > { %1160 = vmatprep.subr.bf16.mxu1 %v682_v43  ;;  %v1129_v16 = vpack.c.bf16 %v1327_v13, %v1326_v5  ;;  %v1387_v43 = vmov 4  }
 0x477   : > { %1335 = vset.pattern.permute.xlu1 %v1387_v43  ;;  %1336 = vset.pattern.permute.xlu0 %v1387_v43 }
 0x479   : > { %1161 = vmatpush3.bf16.msk.msra.mxu1 %vm1523_vm11, %v1103_v12 }
 0x47a   : > { %1162 = vmatprep.subr.bf16.mxu1 %v681_v27  ;;  %v1353_v27 = vld [vmem:[%s1746_s2 + $0x20] ss:$12 sps:$4 sm:$0xff]  }
 0x47d   : > { %1163 = vmatpush3.bf16.msk.msra.mxu1 %vm1523_vm11, %v1108_v42 }
 0x47e   : > { %1180 = vmatprep.subr.msk.bf16.mxu1 %vm1442_vm3, %v1129_v16 }
 0x47f   : > { %v697_v38 = vpop.permute.xlu0 %696 }
 0x480   : > { %777 = vmatmul.mubr.bf16.vlgmr.msra.gmra.mxu1 %v1346_v39  ;;  %v693_v15 = vpop.permute.xlu1 %692 }
 0x481   : > { %1181 = vmatpush3.bf16.msk.msra.mxu1 %vm1442_vm3, %v1129_v16  ;;  %784 = vmatprep.mubr.bf16.mxu1 %v1349_v40 }
 0x482   : > { %1182 = vmatprep.subr.msk.bf16.mxu1 %vm1442_vm3, %v1132_v24 }
 0x484   : > { %v701_v28 = vpop.permute.xlu1 %700 }
 0x485   : > { %1183 = vmatpush3.bf16.msk.msra.mxu1 %vm1442_vm3, %v1132_v24 }
 0x488   : > { %785 = vmatmul.mubr.bf16.gmra.mxu1 %v1351_v51  ;;  %v705_v44 = vpop.permute.xlu1 %704 }
 0x489   : > { %1184 = vmatprep.mubr.msk.bf16.mxu1 %vm737_vm0, %v1352_v25 }
 0x490   : > { %1185 = vmatmul.mubr.msk.bf16.vlgmr.msra.gmra.mxu1 %vm737_vm0, %v1353_v27 }
 0x540   : > { %v1164_v17 = vpop.f32.mrf.mxu1 }
 0x542   : > { %v1165_v18 = vpop.f32.mrf.mxu1 }
 0x543   : > { %v1166_v30 = vadd.f32 %v1165_v18, %v1164_v17  ;;  %v1388_v17 = vmov 5  }
 0x544   : > { %v1167_v23 = vpop.f32.mrf.mxu1 }
 0x545   : > { %v779_v33 = vadd.f32 %v1166_v30, %v693_v15 }
 0x546   : > { %v1168_v19 = vpop.f32.mrf.mxu1 }
 0x547   : > { %v1169_v46 = vadd.f32 %v1168_v19, %v1167_v23 }
 0x548   : > { %v1170_v20 = vpop.f32.mrf.mxu1 }
 0x549   : > { %v782_v50 = vadd.f32 %v1169_v46, %v697_v38 }
 0x54a   : > { %v1171_v21 = vpop.f32.mrf.mxu1 }
 0x54b   : > { %v1172_v22 = vadd.f32 %v1171_v21, %v1170_v20 }
 0x54c   : > { %v1173_v29 = vpop.f32.mrf.mxu1 }
 0x54d   : > { %v787_v26 = vadd.f32 %v1172_v22, %v701_v28 }
 0x54e   : > { %v1174_v8 = vpop.f32.mrf.mxu1 }
 0x54f   : > { %v1175_v31 = vadd.f32 %v1174_v8, %v1173_v29 }
 0x550   : > { %v1186_v32 = vpop.f32.mrf.mxu1 }
 0x551   : > { %v836_v41 = vadd.f32 %v1186_v32, %v787_v26  ;;  %v790_v49 = vadd.f32 %v1175_v31, %v705_v44 }
 0x552   : > { %v827_v45 = vpop.f32.mrf.mxu1 }
 0x553   : > { %v848_v47 = vmul.f32 0.01, %v836_v41  ;;  %v828_v48 = vadd.f32 %v827_v45, %v779_v33  ;;  %vm844_vm1 = vcmp.ge.f32.partialorder %v836_v41, 0.0 }
 0x554   : > { %v1187_v54 = vpop.f32.mrf.mxu1 }
 0x555   : > { %v846_v55 = vmul.f32 0.01, %v828_v48  ;;  %v839_v56 = vadd.f32 %v1187_v54, %v790_v49  ;;  %v852_v57 = vsel %vm844_vm1, %v836_v41, %v848_v47  ;;  %vm842_vm2 = vcmp.ge.f32.partialorder %v828_v48, 0.0 }
 0x556   : > { %v830_v59 = vpop.f32.mrf.mxu1  ;;  %v860_v60 = vsel %vm356_vm6, %v852_v57, 0.0 }
 0x557   : > { %v849_v61 = vmul.f32 0.01, %v839_v56  ;;  %v831_v62 = vadd.f32 %v830_v59, %v782_v50  ;;  %861 = vadd.xlane.f32.xlu0 %v860_v60  ;;  %v850_v63 = vsel %vm842_vm2, %v828_v48, %v846_v55  ;;  %vm845_vm3 = vcmp.ge.f32.partialorder %v839_v56, 0.0 }
 0x558   : > { %v854_v1 = vsel %vm356_vm6, %v850_v63, 0.0 }
 0x559   : > { %v847_v0 = vmul.f32 0.01, %v831_v62  ;;  %vm843_vm4 = vcmp.ge.f32.partialorder %v831_v62, 0.0  ;;  %v853_v3 = vsel %vm845_vm3, %v839_v56, %v849_v61 }
 0x55a   : > { %v863_v7 = vsel %vm356_vm6, %v853_v3, 0.0 }
 0x55b   : > { %855 = vadd.xlane.f32.xlu0 %v854_v1  ;;  %v851_v2 = vsel %vm843_vm4, %v831_v62, %v847_v0 }
 0x55c   : > { %v857_v4 = vsel %vm356_vm6, %v851_v2, 0.0 }
 0x55d   : > { %858 = vadd.xlane.f32.xlu1 %v857_v4 }
 0x55f   : > { %864 = vadd.xlane.f32.xlu0 %v863_v7 }
 0x56e   : > { %907 = vperm.xlu1 %1335, %v1489_v36  }
 0x5e0   : > { %v862_v9 = vpop.xlane.xlu0 %861 }
 0x5e1   : > { %v868_v10 = vmul.f32 0.0625, %v862_v9 }
 0x5e3   : > { %v872_v52 = vsub.f32 %v852_v57, %v868_v10 }
 0x5e4   : > { %v856_v53 = vpop.xlane.xlu0 %855 }
 0x5e5   : > { %v866_v58 = vmul.f32 0.0625, %v856_v53  ;;  %v876_v12 = vmul.f32 %v872_v52, %v872_v52 }
 0x5e6   : > { %v859_v13 = vpop.xlane.xlu1 %858 }
 0x5e7   : > { %v870_v5 = vsub.f32 %v850_v63, %v866_v58  ;;  %v867_v6 = vmul.f32 0.0625, %v859_v13  ;;  %v884_v42 = vsel %vm356_vm6, %v876_v12, 0.0 }
 0x5e8   : > { %885 = vadd.xlane.f32.xlu1 %v884_v42  ;;  %v865_v11 = vpop.xlane.xlu0 %864 }
 0x5e9   : > { %v869_v14 = vmul.f32 0.0625, %v865_v11  ;;  %v874_v16 = vmul.f32 %v870_v5, %v870_v5  ;;  %v1718_v39 = vsub.f32 %v851_v2, %v867_v6 }
 0x5ea   : > { %v908_v18 = vpop.permute.xlu1 %907 }
 0x5eb   : > { %v873_v40 = vsub.f32 %v853_v3, %v869_v14  ;;  %v878_v24 = vsel %vm356_vm6, %v874_v16, 0.0  ;;  %v875_v27 = vmul.f32 %v1718_v39, %v1718_v39 }
 0x5ec   : > { %879 = vadd.xlane.f32.xlu1 %v878_v24 }
 0x5ed   : > { %v877_v51 = vmul.f32 %v873_v40, %v873_v40  ;;  %v881_v43 = vsel %vm356_vm6, %v875_v27, 0.0 }
 0x5ef   : > { %v887_v25 = vsel %vm356_vm6, %v877_v51, 0.0 }
 0x5f0   : > { %888 = vadd.xlane.f32.xlu0 %v887_v25 }
 0x5f4   : > { %882 = vadd.xlane.f32.xlu0 %v881_v43 }
 0x5fd   : > { %915 = vperm.xlu1 %1335, %v1482_v35  }
 0x601   : > { %919 = vperm.xlu1 %1335, %v1477_v34  }
 0x605   : > { %1337 = vset.pattern.permute.xlu1 %v1388_v17 }
 0x606   : > { %927 = vperm.xlu1 %1337, %v1489_v36  }
 0x60a   : > { %931 = vperm.xlu1 %1337, %v1494_v37   ;;  %911 = vperm.xlu0 %1336, %v1494_v37  }
 0x60e   : > { %935 = vperm.xlu1 %1337, %v1482_v35   ;;  %1338 = vset.pattern.permute.xlu0 %v1388_v17 }
 0x612   : > { %939 = vperm.xlu1 %1337, %v1477_v34  }
 0x671   : > { %v886_v23 = vpop.xlane.xlu1 %885 }
 0x672   : > { %v892_v15 = vmul.f32 0.0625, %v886_v23 }
 0x674   : > { %v896_v19 = vadd.f32 1e-05, %v892_v15 }
 0x675   : > { %v880_v20 = vpop.xlane.xlu1 %879 }
 0x676   : > { %1363 = vrsqrt.f32 %v896_v19  ;;  %v890_v21 = vmul.f32 0.0625, %v880_v20 }
 0x678   : > { %v894_v22 = vadd.f32 1e-05, %v890_v21 }
 0x679   : > { %v916_v28 = vpop.permute.xlu1 %915  ;;  %v889_v29 = vpop.xlane.xlu0 %888 }
 0x67a   : > { %1365 = vrsqrt.f32 %v894_v22  ;;  %v893_v36 = vmul.f32 0.0625, %v889_v29 }
 0x67c   : > { %v897_v30 = vadd.f32 1e-05, %v893_v36 }
 0x67d   : > { %v920_v37 = vpop.permute.xlu1 %919  ;;  %v883_v8 = vpop.xlane.xlu0 %882 }
 0x67e   : > { %1367 = vrsqrt.f32 %v897_v30  ;;  %v891_v35 = vmul.f32 0.0625, %v883_v8 }
 0x680   : > { %v895_v31 = vadd.f32 1e-05, %v891_v35 }
 0x681   : > { %v928_v34 = vpop.permute.xlu1 %927 }
 0x682   : > { %1369 = vrsqrt.f32 %v895_v31 }
 0x683   : > { %v1364_v26 = vpop.eup %1363 }
 0x684   : > { %v904_v46 = vmul.f32 %v1364_v26, %v872_v52 }
 0x685   : > { %v932_v32 = vpop.permute.xlu1 %931  ;;  %v912_v60 = vpop.permute.xlu0 %911 }
 0x686   : > { %v924_v38 = vmul.f32 %v916_v28, %v904_v46 }
 0x687   : > { %v1366_v33 = vpop.eup %1365 }
 0x688   : > { %v902_v41 = vmul.f32 %v1366_v33, %v870_v5 }
 0x689   : > { %v936_v44 = vpop.permute.xlu1 %935 }
 0x68a   : > { %v922_v45 = vmul.f32 %v908_v18, %v902_v41  ;;  %v944_v47 = vadd.f32 %v936_v44, %v924_v38 }
 0x68b   : > { %v1368_v48 = vpop.eup %1367 }
 0x68c   : > { %v905_v49 = vmul.f32 %v1368_v48, %v873_v40  ;;  %v942_v50 = vadd.f32 %v928_v34, %v922_v45  ;;  %v1146_v54 = vpack.c.bf16 %v944_v47, %v944_v47 }
 0x68d   : > { %v940_v59 = vpop.permute.xlu1 %939 }
 0x68e   : > { %v925_v55 = vmul.f32 %v920_v37, %v905_v49  ;;  %v1144_v56 = vpack.c.bf16 %v942_v50, %v942_v50  ;;  %965 = vst.msk [vmem:[%s197_s6 + $0x8] sm:$0xf] %vm962_vm5, %v1146_v54 }
 0x68f   : > { %v1370_v57 = vpop.eup %1369 }
 0x690   : > { %963 = vst.msk [vmem:[%s197_s6] sm:$0xf] %vm962_vm5, %v1144_v56  ;;  %v945_v61 = vadd.f32 %v940_v59, %v925_v55  ;;  %v903_v62 = vmul.f32 %v1370_v57, %v1718_v39 }
 0x692   : > { %v1147_v63 = vpack.c.bf16 %v945_v61, %v945_v61  ;;  %v923_v0 = vmul.f32 %v912_v60, %v903_v62 }
 0x694   : > { %966 = vst.msk [vmem:[%s197_s6 + $0xc] sm:$0xf] %vm962_vm5, %v1147_v63  ;;  %v943_v1 = vadd.f32 %v932_v32, %v923_v0 }
 0x696   : > { %v1145_v2 = vpack.c.bf16 %v943_v1, %v943_v1 }
 0x698   : > { %964 = vst.msk [vmem:[%s197_s6 + $0x4] sm:$0xf] %vm962_vm5, %v1145_v2 }
 0x699 PF: > { %s14_s15 = sadd.s32 1, %s1377_s15  }
 0x69a   : > { %p11_p4 = scmp.ge.s32.totalorder %s14_s15, 4  }
 0x69c   :  { %13 = sbr.rel (!%p11_p4) target bundleno = 1 (0x1), region = 66 }

// kernel: unet_forward.5
= control target key start
LH: loop header
LB: loop body
LE: loop exit
PB: predicated region body
PF: predicated region fallthrough
CT: control target
= control target key end

     0   :  { %s1064_s18 = smov 0   ;;  %s1285_s0 = inlined_call_operand.vmem [shape: f32[2,1,256], index: 0, kind: input, shape index: {}]   ;;  %s1286_s1 = inlined_call_operand.vmem [shape: bf16[8,9], index: 1, kind: input, shape index: {}]   ;;  %s1287_s2 = inlined_call_operand.vmem [shape: bf16[8,72], index: 2, kind: input, shape index: {}]   ;;  %s1288_s3 = inlined_call_operand.vmem [shape: f32[8,8], index: 3, kind: input, shape index: {}]   ;;  %s1289_s4 = inlined_call_operand.vmem [shape: bf16[2,8,256], index: 4, kind: output, shape index: {0}]   ;;  %s1290_s5 = inlined_call_operand.vmem [shape: bf16[2,8,128], index: 5, kind: output, shape index: {1}]  }
   0x1 LB: > { %s874_s19 = sadd.s32 4294967295, %s1013_s18   ;;  %p878_p0 = scmp.ge.s32.totalorder %s1013_s18, 1  ;;  %s1013_s18 = sphi %s1064_s18, %s16_s18  }
   0x2   : > { %p189_p1 = scmp.lt.s32.totalorder %s1013_s18, 3 }
   0x4   : > { %p190_p2 = pnand %p878_p0, %p189_p1 }
   0x5   : > { %p220_p3 = scmp.lt.s32.totalorder (!%p190_p2), %s874_s19, 1  ;;  %s1017_s24 = smov (!%p190_p2), 127  }
   0x6   : > { %193 = sbr.rel (%p190_p2) target bundleno = 1757 (0x6dd), region = 36  ;;  %s1018_s25 = smov (!%p190_p2), 1  }
   0x7   : > { %s1019_s28 = smov (!%p190_p2), 16   ;;  %s1026_s29 = smov (!%p190_p2), 112  }
   0x8   : > { %s1029_s13 = smov (!%p190_p2), 32   ;;  %s1030_s14 = smov (!%p190_p2), 96  }
   0x9   : > { %s1031_s15 = smov (!%p190_p2), 80   ;;  %s1032_s16 = smov (!%p190_p2), 64  }
   0xa   : > { %s1033_s17 = smov (!%p190_p2), 48  }
   0xb   : > { %v234_v0 = vlaneseq  ;;  %v1015_v1 = vmov 1   ;;  %v1016_v2 = vmov 0   ;;  %s1302_s19 = smov (!%p220_p3, %s874_s19), 1  ;;  %v298_v9 = vld [vmem:[%s1286_s1] sm:$0xf]  ;;  %v1020_v11 = vmov 2  }
   0xc   : > { %939 = vset.pattern.permute.xlu1 %v1015_v1  ;;  %938 = vset.pattern.permute.xlu0 %v1016_v2  ;;  %s879_s20 = sshll.u32 %s1302_s19, 1  ;;  %v299_v10 = vunpack.c.l.bf16 %v298_v9  ;;  %v1021_v12 = vmov 3   ;;  %v1022_v13 = vmov 4   ;;  %v1023_v14 = vmov 6   ;;  %v1158_v38 = vld [vmem:[%s1288_s3] sm:$0xff]  ;;  %s909_s9 = sshll.u32 %s1302_s19, 3 }
   0xd   : > { %v269_v3 = vshrl.u32 %v234_v0, 7  ;;  %675 = vmatprep.mubr.bf16.mxu0 %v1016_v2  ;;  %s223_s23 = scalar_lea.vmem %s1285_s0, %s879_s20  ;;  %v1024_v15 = vmov 5   ;;  %v1025_v16 = vmov 7   ;;  %v235_v17 = vand.u32 127, %v234_v0  ;;  %v617_v20 = vld [vmem:[%s1287_s2] sm:$0xf]  ;;  %s228_s12 = scalar_lea.vmem %s1289_s4, %s909_s9 }
   0xe   : > { %v265_v6 = vld [vmem:[%s223_s23] sm:$0x3]  ;;  %vm280_vm0 = vcmask 7168   ;;  %vm291_vm2 = vcmask 1039360   ;;  %v1027_v37 = vmov 8   ;;  %vm306_vm6 = vcmask 130048  }
   0xf   : > { %v1077_v4 = vsub.s32 0, %v269_v3  ;;  %v274_v5 = vsub.s32 1, %v269_v3  ;;  %v241_v18 = vand.u32 15, %v235_v17  ;;  %v236_v19 = vadd.s32 128, %v235_v17  ;;  %s882_s20 = sshll.u32 %s1302_s19, 2 }
  0x10   : > { %vm424_vm7 = vcmask 916480   ;;  %vm636_vm10 = vcmask 1043456   ;;  %vm1028_vm12 = vmmov 1   ;;  %s232_s23 = scalar_lea.vmem %s1290_s5, %s882_s20 }
  0x11   : > { %v1083_v7 = vrot.slane %v265_v6, %v1077_v4  ;;  %v1089_v8 = vrot.slane %v265_v6, %v274_v5  ;;  %vm1105_vm1 = vcmp.ge.s32.totalorder %v241_v18, 1  ;;  %v248_v21 = vand.u32 15, %v236_v19  ;;  %vm884_vm11 = vmpackc.low %vm424_vm7, %vm424_vm7 }
  0x12   : > { %vm1122_vm4 = vcmp.le.s32.totalorder %v241_v18, 14 }
  0x13   : > { %287 = vrot.lane.b32.xlu1 %v1083_v7, %s1017_s24  ;;  %276 = vrot.lane.b32.xlu0 %v1083_v7, %s1018_s25  ;;  %vm1116_vm3 = vcmp.ge.s32.totalorder %v248_v21, 1  ;;  %vm1139_vm5 = vcmp.le.s32.totalorder %v248_v21, 14  ;;  %vm890_vm14 = vmpackc.low %vm1122_vm4, %vm1028_vm12 }
  0x14   : > { %vm887_vm13 = vmpackc.low %vm1139_vm5, %vm1028_vm12 }
  0x15   : > { %vm893_vm15 = vmpackc.low %vm1116_vm3, %vm1028_vm12  ;;  %vm783_vm12 = vcmask 785408  }
  0x17   : > { %289 = vrot.lane.b32.xlu1 %v1089_v8, %s1017_s24  ;;  %278 = vrot.lane.b32.xlu0 %v1089_v8, %s1018_s25 }
  0x1b   : > { %337 = vperm.xlu1 %939, %v299_v10   ;;  %313 = vperm.xlu0 %938, %v299_v10  }
  0x1f   : > { %328 = vrot.lane.b32.xlu1 %v1083_v7, %s1019_s28  ;;  %330 = vrot.lane.b32.xlu0 %v1089_v8, %s1019_s28 }
  0x20   : > { %940 = vset.pattern.permute.xlu1 %v1020_v11  ;;  %941 = vset.pattern.permute.xlu0 %v1021_v12 }
  0x23   : > { %363 = vperm.xlu1 %940, %v299_v10   ;;  %379 = vperm.xlu0 %941, %v299_v10  }
  0x27   : > { %942 = vset.pattern.permute.xlu1 %v1022_v13  ;;  %944 = vset.pattern.permute.xlu0 %v1023_v14 }
  0x28   : > { %395 = vperm.xlu1 %942, %v299_v10   ;;  %430 = vperm.xlu0 %944, %v299_v10  }
  0x2c   : > { %943 = vset.pattern.permute.xlu1 %v1024_v15  ;;  %945 = vset.pattern.permute.xlu0 %v1025_v16 }
  0x2d   : > { %405 = vperm.xlu1 %943, %v299_v10  }
  0x31   : > { %948 = vset.pattern.permute.xlu1 %v1015_v1 }
  0x85   : > { %v277_v22 = vpop.permute.xlu0 %276  ;;  %v288_v23 = vpop.permute.xlu1 %287 }
  0x86   : > { %v284_v24 = vsel %vm280_vm0, 0.0, %v277_v22 }
  0x87   : > { %v1112_v25 = vsel %vm1105_vm1, %v284_v24, 0.0 }
  0x88   : > { %302 = vrot.lane.b32.xlu1 %v1112_v25, %s1019_s28  ;;  %v385_v1 = vrot.slane %v1112_v25, %v1077_v4 }
  0x89   : > { %v279_v27 = vpop.permute.xlu0 %278  ;;  %v290_v28 = vpop.permute.xlu1 %289 }
  0x8a   : > { %v281_v29 = vsel %vm280_vm0, %v277_v22, %v279_v27  ;;  %v292_v30 = vsel %vm291_vm2, %v288_v23, %v290_v28  ;;  %v295_v34 = vsel %vm291_vm2, %v290_v28, 0.0 }
  0x8b   : > { %v1128_v32 = vsel %vm1116_vm3, %v281_v29, 0.0  ;;  %v1136_v33 = vsel %vm1122_vm4, %v292_v30, 0.0  ;;  %v1149_v36 = vsel %vm1139_vm5, %v295_v34, 0.0 }
  0x8c   : > { %445 = vrot.lane.b32.xlu1 %v1083_v7, %s1026_s29  ;;  %304 = vrot.lane.b32.xlu0 %v1128_v32, %s1019_s28  ;;  %v389_v17 = vrot.slane %v1128_v32, %v1077_v4  ;;  %v411_v18 = vrot.slane %v1136_v33, %v1077_v4  ;;  %v415_v34 = vrot.slane %v1149_v36, %v1077_v4 }
  0x90   : > { %447 = vrot.lane.b32.xlu1 %v1089_v8, %s1026_s29  ;;  %354 = vrot.lane.b32.xlu0 %v1136_v33, %s1019_s28 }
  0x94   : > { %356 = vrot.lane.b32.xlu1 %v1149_v36, %s1019_s28  ;;  %454 = vperm.xlu0 %945, %v299_v10  }
  0x96   : > { %v338_v39 = vpop.permute.xlu1 %337  ;;  %v314_v41 = vpop.permute.xlu0 %313 }
  0x98   : > { %420 = vrot.lane.b32.xlu1 %v1112_v25, %s1026_s29  ;;  %946 = vset.pattern.permute.xlu0 %v1027_v37 }
  0x99   : > { %478 = vperm.xlu0 %946, %v299_v10  }
  0x9a   : > { %v329_v40 = vpop.permute.xlu1 %328  ;;  %v331_v43 = vpop.permute.xlu0 %330 }
  0x9b   : > { %v335_v50 = vsel %vm306_vm6, 0.0, %v329_v40  ;;  %v332_v56 = vsel %vm306_vm6, %v329_v40, %v331_v43 }
  0x9c   : > { %422 = vrot.lane.b32.xlu1 %v1128_v32, %s1026_s29  ;;  %v343_v55 = vrot.slane %v335_v50, %v1077_v4  ;;  %v347_v62 = vrot.slane %v332_v56, %v1077_v4 }
  0x9d   : > { %947 = vset.pattern.permute.xlu0 %v1016_v2 }
  0x9e   : > { %495 = vperm.xlu0 %947, %v1158_v38   ;;  %v364_v42 = vpop.permute.xlu1 %363  ;;  %v380_v45 = vpop.permute.xlu0 %379  ;;  %v348_v63 = vmul.f32 %v343_v55, %v338_v39  ;;  %v349_v10 = vmul.f32 %v347_v62, %v338_v39 }
  0x9f   : > { %v391_v25 = vmul.f32 %v389_v17, %v380_v45 }
  0xa0   : > { %469 = vrot.lane.b32.xlu1 %v1136_v33, %s1026_s29 }
  0xa2   : > { %949 = vset.pattern.permute.xlu0 %v1020_v11  ;;  %v390_v11 = vmul.f32 %v385_v1, %v380_v45 }
  0xa3   : > { %v396_v44 = vpop.permute.xlu1 %395  ;;  %v431_v47 = vpop.permute.xlu0 %430 }
  0xa4   : > { %471 = vrot.lane.b32.xlu1 %v1149_v36, %s1026_s29  ;;  %v400_v19 = vmul.f32 %v396_v44, %v1083_v7  ;;  %v401_v30 = vmul.f32 %v396_v44, %v1089_v8 }
  0xa8   : > { %v406_v46 = vpop.permute.xlu1 %405 }
  0xa9   : > { %v416_v27 = vmul.f32 %v411_v18, %v406_v46  ;;  %v417_v40 = vmul.f32 %v415_v34, %v406_v46 }
  0xfa   : > { %v303_v48 = vpop.permute.xlu1 %302 }
  0xfb   : > { %v310_v49 = vsel %vm306_vm6, 0.0, %v303_v48 }
  0xfc   : > { %v319_v51 = vrot.slane %v310_v49, %v1077_v4 }
  0xfe   : > { %v446_v52 = vpop.permute.xlu1 %445  ;;  %v305_v53 = vpop.permute.xlu0 %304  ;;  %v324_v57 = vmul.f32 %v319_v51, %v314_v41 }
  0xff   : > { %v307_v54 = vsel %vm306_vm6, %v303_v48, %v305_v53 }
 0x100   : > { %v323_v58 = vrot.slane %v307_v54, %v1077_v4  ;;  %v350_v2 = vadd.f32 %v348_v63, %v324_v57 }
 0x102   : > { %v448_v59 = vpop.permute.xlu1 %447  ;;  %v355_v60 = vpop.permute.xlu0 %354  ;;  %v325_v3 = vmul.f32 %v323_v58, %v314_v41 }
 0x103   : > { %v361_v61 = vsel %vm306_vm6, 0.0, %v355_v60  ;;  %v449_v36 = vsel %vm424_vm7, %v446_v52, %v448_v59  ;;  %v452_v50 = vsel %vm424_vm7, %v448_v59, 0.0 }
 0x104   : > { %v369_v0 = vrot.slane %v361_v61, %v1077_v4  ;;  %v351_v21 = vadd.f32 %v349_v10, %v325_v3  ;;  %v460_v53 = vrot.slane %v449_v36, %v1077_v4  ;;  %v464_v54 = vrot.slane %v452_v50, %v1077_v4 }
 0x106   : > { %v374_v5 = vmul.f32 %v369_v0, %v364_v42  ;;  %v357_v6 = vpop.permute.xlu1 %356 }
 0x107   : > { %v358_v9 = vsel %vm306_vm6, %v355_v60, %v357_v6 }
 0x108   : > { %v376_v14 = vadd.f32 %v374_v5, %v350_v2  ;;  %v373_v16 = vrot.slane %v358_v9, %v1077_v4 }
 0x10a   : > { %v392_v22 = vadd.f32 %v390_v11, %v376_v14  ;;  %v375_v23 = vmul.f32 %v373_v16, %v364_v42  ;;  %v421_v24 = vpop.permute.xlu1 %420 }
 0x10c   : > { %v377_v28 = vadd.f32 %v375_v23, %v351_v21  ;;  %v402_v29 = vadd.f32 %v400_v19, %v392_v22 }
 0x10e   : > { %v393_v32 = vadd.f32 %v391_v25, %v377_v28  ;;  %v423_v37 = vpop.permute.xlu1 %422  ;;  %v418_v39 = vadd.f32 %v416_v27, %v402_v29 }
 0x10f   : > { %v425_v33 = vsel %vm424_vm7, %v421_v24, %v423_v37  ;;  %v428_v7 = vsel %vm424_vm7, %v423_v37, 0.0  ;;  %v455_v45 = vpop.permute.xlu0 %454 }
 0x110   : > { %v436_v41 = vrot.slane %v425_v33, %v1077_v4  ;;  %v440_v42 = vrot.slane %v428_v7, %v1077_v4  ;;  %v403_v43 = vadd.f32 %v401_v30, %v393_v32  ;;  %v465_v60 = vmul.f32 %v460_v53, %v455_v45 }
 0x112   : > { %v441_v48 = vmul.f32 %v436_v41, %v431_v47  ;;  %v442_v49 = vmul.f32 %v440_v42, %v431_v47  ;;  %v419_v8 = vadd.f32 %v417_v40, %v403_v43  ;;  %v470_v44 = vpop.permute.xlu1 %469  ;;  %v466_v47 = vmul.f32 %v464_v54, %v455_v45 }
 0x114   : > { %v479_v51 = vpop.permute.xlu0 %478  ;;  %v443_v46 = vadd.f32 %v441_v48, %v418_v39  ;;  %v444_v55 = vadd.f32 %v442_v49, %v419_v8 }
 0x116   : > { %v472_v56 = vpop.permute.xlu1 %471  ;;  %v467_v62 = vadd.f32 %v465_v60, %v443_v46  ;;  %v468_v59 = vadd.f32 %v466_v47, %v444_v55 }
 0x117   : > { %v473_v57 = vsel %vm424_vm7, %v470_v44, %v472_v56  ;;  %v476_v58 = vsel %vm424_vm7, %v472_v56, 0.0 }
 0x118   : > { %v484_v61 = vrot.slane %v473_v57, %v1077_v4  ;;  %v488_v52 = vrot.slane %v476_v58, %v1077_v4 }
 0x119   : > { %v496_v1 = vpop.permute.xlu0 %495 }
 0x11a   : > { %v489_v63 = vmul.f32 %v484_v61, %v479_v51  ;;  %v490_v0 = vmul.f32 %v488_v52, %v479_v51 }
 0x11c   : > { %v491_v2 = vadd.f32 %v489_v63, %v467_v62  ;;  %v492_v3 = vadd.f32 %v490_v0, %v468_v59 }
 0x11e   : > { %v498_v5 = vadd.f32 %v496_v1, %v491_v2  ;;  %v499_v6 = vadd.f32 %v496_v1, %v492_v3 }
 0x120   : > { %v502_v9 = vmul.f32 0.01, %v498_v5  ;;  %v503_v10 = vmul.f32 0.01, %v499_v6  ;;  %vm500_vm8 = vcmp.ge.f32.partialorder %v498_v5, 0.0  ;;  %vm501_vm9 = vcmp.ge.f32.partialorder %v499_v6, 0.0 }
 0x122   : > { %v504_v11 = vsel %vm500_vm8, %v498_v5, %v502_v9  ;;  %v505_v14 = vsel %vm501_vm9, %v499_v6, %v503_v10  ;;  %vm777_vm9 = vcmask 392192  }
 0x123   : > { %v506_v16 = vadd.f32 %v505_v14, %v504_v11 }
 0x125   : > { %507 = vadd.xlane.f32.xlu1 %v506_v16 }
 0x136   : > { %524 = vperm.xlu1 %948, %v1158_v38  }
 0x13a   : > { %991 = vset.pattern.permute.xlu1 %v1022_v13 }
 0x1ae   : > { %v508_v4 = vpop.xlane.xlu1 %507 }
 0x1af   : > { %v510_v17 = vmul.f32 0.00390625, %v508_v4 }
 0x1b1   : > { %v511_v18 = vsub.f32 %v504_v11, %v510_v17  ;;  %v512_v19 = vsub.f32 %v505_v14, %v510_v17 }
 0x1b2   : > { %v525_v28 = vpop.permute.xlu1 %524 }
 0x1b3   : > { %v513_v21 = vmul.f32 %v511_v18, %v511_v18  ;;  %v514_v22 = vmul.f32 %v512_v19, %v512_v19 }
 0x1b5   : > { %v515_v23 = vadd.f32 %v514_v22, %v513_v21 }
 0x1b7   : > { %516 = vadd.xlane.f32.xlu0 %v515_v23 }
 0x1cd   : > { %530 = vperm.xlu0 %949, %v1158_v38  }
 0x1d1   : > { %990 = vset.pattern.permute.xlu0 %v1021_v12 }
 0x1d2   : > { %629 = vperm.xlu0 %990, %v1158_v38  }
 0x1d6   : > { %992 = vset.pattern.permute.xlu0 %v1024_v15 }
 0x240   : > { %v517_v24 = vpop.xlane.xlu0 %516 }
 0x241   : > { %v518_v25 = vmul.f32 0.00390625, %v517_v24 }
 0x243   : > { %v519_v27 = vadd.f32 1e-05, %v518_v25 }
 0x245   : > { %1003 = vrsqrt.f32 %v519_v27 }
 0x248   : > { %v531_v34 = vpop.permute.xlu0 %530 }
 0x252   : > { %v1004_v13 = vpop.eup %1003 }
 0x253   : > { %v521_v29 = vmul.f32 %v1004_v13, %v511_v18  ;;  %v522_v30 = vmul.f32 %v1004_v13, %v512_v19 }
 0x255   : > { %v527_v32 = vmul.f32 %v525_v28, %v521_v29  ;;  %v528_v37 = vmul.f32 %v525_v28, %v522_v30  ;;  %v630_v28 = vpop.permute.xlu0 %629 }
 0x257   : > { %v1208_v39 = vadd.f32 %v531_v34, %v527_v32  ;;  %v534_v33 = vadd.f32 %v531_v34, %v528_v37 }
 0x259   : > { %v950_v12 = vpack.i.bf16 %v534_v33, %v1208_v39 }
 0x25b   : > { %951 = vrot.lane.b32.xlu1 %v950_v12, %s1017_s24 }
 0x25f   : > { %956 = vrot.lane.b32.xlu1 %v950_v12, %s1018_s25 }
 0x263   : > { %961 = vrot.lane.b32.xlu1 %v950_v12, %s1026_s29 }
 0x2cd   : > { %v952_v15 = vpop.permute.xlu1 %951 }
 0x2ce   : > { %v954_v7 = vunpack.i.h.bf16 %v952_v15  ;;  %v953_v40 = vunpack.i.l.bf16 %v952_v15 }
 0x2d0   : > { %v558_v41 = vsel %vm291_vm2, %v954_v7, 0.0  ;;  %v555_v42 = vsel %vm291_vm2, %v953_v40, %v954_v7 }
 0x2d1   : > { %v564_v43 = vsel %vm1139_vm5, %v558_v41, 0.0  ;;  %v957_v45 = vpop.permute.xlu1 %956  ;;  %v563_v48 = vsel %vm1122_vm4, %v555_v42, 0.0  ;;  %v888_v14 = vpack.c.bf16 %v558_v41, %v534_v33  ;;  %v891_v17 = vpack.c.bf16 %v555_v42, %v1208_v39 }
 0x2d2   : > { %v959_v49 = vunpack.i.h.bf16 %v957_v45  ;;  %v958_v8 = vunpack.i.l.bf16 %v957_v45  ;;  %v965_v44 = vpack.i.bf16 %v564_v43, %v563_v48 }
 0x2d4   : > { %v544_v36 = vsel %vm280_vm0, 0.0, %v958_v8  ;;  %966 = vrot.lane.b32.xlu1 %v965_v44, %s1026_s29  ;;  %v541_v50 = vsel %vm280_vm0, %v958_v8, %v959_v49  ;;  %vm1246_vm0 = vmneg %vm306_vm6 }
 0x2d5   : > { %v549_v51 = vsel %vm1105_vm1, %v544_v36, 0.0  ;;  %v550_v53 = vsel %vm1116_vm3, %v541_v50, 0.0  ;;  %v962_v46 = vpop.permute.xlu1 %961  ;;  %vm897_vm4 = vmpackc.low %vm1105_vm1, %vm1246_vm0  ;;  %vm632_vm1 = vcmask 588800  }
 0x2d6   : > { %v970_v54 = vpack.i.bf16 %v550_v53, %v549_v51  ;;  %v964_v58 = vunpack.i.h.bf16 %v962_v46  ;;  %v963_v60 = vunpack.i.l.bf16 %v962_v46  ;;  %vm902_vm3 = vmpackc.low %vm1246_vm0, %vm1246_vm0 }
 0x2d8   : > { %971 = vrot.lane.b32.xlu1 %v970_v54, %s1026_s29  ;;  %v606_v5 = vsel %vm424_vm7, %v963_v60, %v964_v58 }
 0x2dc   : > { %976 = vrot.lane.b32.xlu1 %v965_v44, %s1019_s28 }
 0x2e0   : > { %981 = vrot.lane.b32.xlu1 %v970_v54, %s1019_s28 }
 0x2e4   : > { %986 = vrot.lane.b32.xlu1 %v950_v12, %s1019_s28 }
 0x346   : > { %v967_v55 = vpop.permute.xlu1 %966 }
 0x347   : > { %v969_v56 = vunpack.i.h.bf16 %v967_v55  ;;  %v968_v57 = vunpack.i.l.bf16 %v967_v55 }
 0x349   : > { %v616_v47 = vsel %vm424_vm7, %v969_v56, 0.0  ;;  %v607_v61 = vsel %vm424_vm7, %v968_v57, %v969_v56 }
 0x34a   : > { %v972_v52 = vpop.permute.xlu1 %971  ;;  %v627_v62 = vpack.c.bf16 %v616_v47, %v616_v47  ;;  %v626_v59 = vpack.c.bf16 %v607_v61, %v607_v61 }
 0x34b   : > { %v974_v63 = vunpack.i.h.bf16 %v972_v52  ;;  %v973_v0 = vunpack.i.l.bf16 %v972_v52 }
 0x34c   : > { %883 = vmatprep.subr.msk.bf16.mxu0 %vm636_vm10, %v627_v62  ;;  %v638_v1 = vsel %vm636_vm10, %v626_v59, 0  ;;  %vm779_vm10 = vcmask 523264  }
 0x34d   : > { %v885_v2 = vpack.c.bf16 %v964_v58, %v974_v63  ;;  %650 = vmatpush1.bf16.msra.mxu0 %v638_v1  ;;  %v605_v3 = vsel %vm424_vm7, %v973_v0, %v974_v63 }
 0x34e   : > { %v977_v6 = vpop.permute.xlu1 %976  ;;  %v624_v9 = vpack.c.bf16 %v606_v5, %v605_v3 }
 0x34f   : > { %v979_v10 = vunpack.i.h.bf16 %v977_v6  ;;  %v978_v11 = vunpack.i.l.bf16 %v977_v6  ;;  %886 = vmatprep.subr.msk.bf16.mxu0 %vm884_vm11, %v885_v2  ;;  %vm781_vm11 = vcmask 654336  }
 0x351   : > { %v583_v16 = vsel %vm306_vm6, %v978_v11, %v979_v10  ;;  %652 = vmatpush1.bf16.msra.mxu0 %v624_v9  ;;  %v898_v26 = vpack.c.bf16 %v544_v36, %v978_v11 }
 0x352   : > { %v982_v4 = vpop.permute.xlu1 %981  ;;  %889 = vmatprep.subr.msk.bf16.mxu0 %vm887_vm13, %v888_v14  ;;  %v894_v35 = vpack.c.bf16 %v541_v50, %v583_v16 }
 0x353   : > { %v984_v19 = vunpack.i.h.bf16 %v982_v4  ;;  %v983_v21 = vunpack.i.l.bf16 %v982_v4 }
 0x355   : > { %892 = vmatpush1.bf16.msk.msra.mxu0 %vm890_vm14, %v891_v17  ;;  %v581_v24 = vsel %vm306_vm6, %v983_v21, %v984_v19 }
 0x356   : > { %v987_v22 = vpop.permute.xlu1 %986  ;;  %895 = vmatprep.subr.msk.bf16.mxu0 %vm893_vm15, %v894_v35 }
 0x357   : > { %v989_v31 = vunpack.i.h.bf16 %v987_v22  ;;  %v988_v23 = vunpack.i.l.bf16 %v987_v22 }
 0x359   : > { %899 = vmatpush1.bf16.msk.msra.mxu0 %vm897_vm4, %v898_v26  ;;  %v582_v25 = vsel %vm306_vm6, %v988_v23, %v989_v31  ;;  %v903_v13 = vpack.c.bf16 %v988_v23, %v983_v21 }
 0x35a   : > { %v619_v27 = vpack.c.bf16 %v582_v25, %v581_v24 }
 0x35c   : > { %657 = vmatprep.subr.bf16.mxu0 %v619_v27 }
 0x35d   : > { %904 = vmatpush1.bf16.msk.msra.mxu0 %vm902_vm3, %v903_v13 }
 0x360   : > { %905 = vmatmul.mubr.msk.bf16.vlgmr.msra.gmra.mxu0 %vm632_vm1, %v617_v20 }
 0x420   : > { %v677_v29 = vpop.f32.mrf.mxu0 }
 0x421   : > { %v678_v30 = vadd.f32 %v677_v29, %v630_v28 }
 0x422   : > { %v679_v34 = vpop.f32.mrf.mxu0 }
 0x423   : > { %v686_v32 = vmul.f32 0.01, %v678_v30  ;;  %v680_v37 = vadd.f32 %v679_v34, %v630_v28  ;;  %vm684_vm5 = vcmp.ge.f32.partialorder %v678_v30, 0.0 }
 0x424   : > { %v681_v39 = vpop.f32.mrf.mxu0 }
 0x425   : > { %v687_v33 = vmul.f32 0.01, %v680_v37  ;;  %vm685_vm8 = vcmp.ge.f32.partialorder %v680_v37, 0.0  ;;  %v688_v15 = vsel %vm684_vm5, %v678_v30, %v686_v32 }
 0x426   : > { %v682_v12 = vpop.f32.mrf.mxu0 }
 0x427   : > { %v689_v7 = vsel %vm685_vm8, %v680_v37, %v687_v33 }
 0x428   : > { %v690_v40 = vadd.f32 %v689_v7, %v688_v15 }
 0x42a   : > { %691 = vadd.xlane.f32.xlu1 %v690_v40 }
 0x43b   : > { %707 = vperm.xlu1 %991, %v1158_v38  }
 0x4b3   : > { %v692_v41 = vpop.xlane.xlu1 %691 }
 0x4b4   : > { %v693_v42 = vmul.f32 0.00390625, %v692_v41 }
 0x4b6   : > { %v694_v43 = vsub.f32 %v688_v15, %v693_v42  ;;  %v695_v45 = vsub.f32 %v689_v7, %v693_v42 }
 0x4b7   : > { %v708_v53 = vpop.permute.xlu1 %707 }
 0x4b8   : > { %v696_v48 = vmul.f32 %v694_v43, %v694_v43  ;;  %v697_v49 = vmul.f32 %v695_v45, %v695_v45 }
 0x4ba   : > { %v698_v8 = vadd.f32 %v697_v49, %v696_v48 }
 0x4bc   : > { %699 = vadd.xlane.f32.xlu0 %v698_v8 }
 0x4d2   : > { %713 = vperm.xlu0 %992, %v1158_v38  }
 0x545   : > { %v700_v44 = vpop.xlane.xlu0 %699 }
 0x546   : > { %v701_v36 = vmul.f32 0.00390625, %v700_v44 }
 0x548   : > { %v702_v50 = vadd.f32 1e-05, %v701_v36 }
 0x54a   : > { %1005 = vrsqrt.f32 %v702_v50 }
 0x54d   : > { %v714_v55 = vpop.permute.xlu0 %713 }
 0x557   : > { %v1006_v51 = vpop.eup %1005 }
 0x558   : > { %v704_v54 = vmul.f32 %v1006_v51, %v694_v43  ;;  %v705_v46 = vmul.f32 %v1006_v51, %v695_v45 }
 0x55a   : > { %v710_v56 = vmul.f32 %v708_v53, %v704_v54  ;;  %v711_v57 = vmul.f32 %v708_v53, %v705_v46 }
 0x55c   : > { %v716_v58 = vadd.f32 %v714_v55, %v710_v56  ;;  %v717_v60 = vadd.f32 %v714_v55, %v711_v57 }
 0x55e   : > { %v910_v47 = vpack.c.bf16 %v717_v60, %v716_v58  ;;  %v993_v38 = vpack.i.bf16 %v717_v60, %v716_v58 }
 0x560   : > { %726 = vst [vmem:[%s228_s12] sm:$0xff] %v910_v47  ;;  %994 = vrot.lane.b32.xlu1 %v993_v38, %s1017_s24 }
 0x5d2   : > { %v995_v61 = vpop.permute.xlu1 %994 }
 0x5d3   : > { %v997_v52 = vunpack.i.h.bf16 %v995_v61  ;;  %v996_v62 = vunpack.i.l.bf16 %v995_v61 }
 0x5d5   : > { %v736_v59 = vsel %vm291_vm2, %v997_v52, 0.0  ;;  %v733_v63 = vsel %vm291_vm2, %v996_v62, %v997_v52  ;;  %vm775_vm2 = vcmask 261120  }
 0x5d6   : > { %v738_v0 = vmax.f32 %v717_v60, %v736_v59  ;;  %v737_v1 = vmax.f32 %v716_v58, %v733_v63 }
 0x5d8   : > { %v998_v2 = vpack.i.bf16 %v738_v0, %v737_v1 }
 0x5da   : > { %999 = vrot.lane.b32.xlu1 %v998_v2, %s1026_s29 }
 0x64c   : > { %v1000_v3 = vpop.permute.xlu1 %999 }
 0x64d   : > { %v1002_v5 = vunpack.i.h.bf16 %v1000_v3  ;;  %v1001_v6 = vunpack.i.l.bf16 %v1000_v3 }
 0x64f   : > { %v748_v9 = vsel %vm424_vm7, %v1002_v5, 0.0  ;;  %v745_v10 = vsel %vm424_vm7, %v1001_v6, %v1002_v5 }
 0x650   : > { %v750_v11 = vmax.f32 %v738_v0, %v748_v9  ;;  %v749_v14 = vmax.f32 %v737_v1, %v745_v10 }
 0x652   : > { %768 = vrot.lane.b32.xlu0 %v750_v11, %s1029_s13  ;;  %752 = vrot.lane.b32.xlu1 %v749_v14, %s1026_s29 }
 0x656   : > { %755 = vrot.lane.b32.xlu1 %v749_v14, %s1030_s14 }
 0x65a   : > { %758 = vrot.lane.b32.xlu1 %v749_v14, %s1031_s15 }
 0x65e   : > { %762 = vrot.lane.b32.xlu1 %v750_v11, %s1032_s16 }
 0x662   : > { %765 = vrot.lane.b32.xlu1 %v750_v11, %s1033_s17 }
 0x666   : > { %771 = vrot.lane.b32.xlu1 %v750_v11, %s1019_s28 }
 0x6c4   : > { %v753_v16 = vpop.permute.xlu1 %752  ;;  %v769_v23 = vpop.permute.xlu0 %768 }
 0x6c5   : > { %v774_v35 = vsel %vm306_vm6, %v749_v14, %v753_v16 }
 0x6c8   : > { %v756_v4 = vpop.permute.xlu1 %755 }
 0x6c9   : > { %v776_v19 = vsel %vm775_vm2, %v774_v35, %v756_v4 }
 0x6cc   : > { %v759_v17 = vpop.permute.xlu1 %758 }
 0x6cd   : > { %v778_v21 = vsel %vm777_vm9, %v776_v19, %v759_v17 }
 0x6d0   : > { %v763_v18 = vpop.permute.xlu1 %762 }
 0x6d1   : > { %v780_v22 = vsel %vm779_vm10, %v778_v21, %v763_v18 }
 0x6d4   : > { %v766_v26 = vpop.permute.xlu1 %765 }
 0x6d5   : > { %v782_v31 = vsel %vm781_vm11, %v780_v22, %v766_v26 }
 0x6d6   : > { %v784_v24 = vsel %vm783_vm12, %v782_v31, %v769_v23 }
 0x6d8   : > { %v772_v25 = vpop.permute.xlu1 %771 }
 0x6d9   : > { %v785_v27 = vsel %vm424_vm7, %v784_v24, %v772_v25 }
 0x6da   : > { %v786_v13 = vpack.c.bf16 %v785_v27, %v785_v27 }
 0x6dc   : > { %787 = vst [vmem:[%s232_s23] sm:$0xf] %v786_v13 }
 0x6dd PF: > { %s16_s18 = sadd.s32 1, %s1013_s18  }
 0x6de   : > { %p13_p4 = scmp.ge.s32.totalorder %s16_s18, 4  }
 0x6e0   :  { %15 = sbr.rel (!%p13_p4) target bundleno = 1 (0x1), region = 78 }

// kernel: unet_forward.8
= control target key start
LH: loop header
LB: loop body
LE: loop exit
PB: predicated region body
PF: predicated region fallthrough
CT: control target
= control target key end

     0   :  { %s1557_s30 = smov 0   ;;  %s1882_s0 = inlined_call_operand.vmem [shape: bf16[2,32,64], index: 0, kind: input, shape index: {}]   ;;  %s1883_s1 = inlined_call_operand.vmem [shape: bf16[2,16,64], index: 1, kind: input, shape index: {}]   ;;  %s1884_s2 = inlined_call_operand.vmem [shape: bf16[16,32], index: 2, kind: input, shape index: {}]   ;;  %s1885_s3 = inlined_call_operand.vmem [shape: bf16[16,144], index: 3, kind: input, shape index: {}]   ;;  %s1886_s4 = inlined_call_operand.vmem [shape: bf16[16,144], index: 4, kind: input, shape index: {}]   ;;  %s1887_s5 = inlined_call_operand.vmem [shape: bf16[16,144], index: 5, kind: input, shape index: {}]   ;;  %s1888_s6 = inlined_call_operand.vmem [shape: bf16[8,16], index: 6, kind: input, shape index: {}]   ;;  %s1889_s7 = inlined_call_operand.vmem [shape: f32[16,8], index: 7, kind: input, shape index: {}]   ;;  %s1890_s8 = inlined_call_operand.vmem [shape: bf16[2,16,64], index: 8, kind: output, shape index: {0}]   ;;  %s1891_s9 = inlined_call_operand.vmem [shape: f32[2,8,64], index: 9, kind: output, shape index: {1}]  }
   0x1 LB: > { %s1166_s10 = sadd.s32 4294967295, %s1492_s30   ;;  %p1170_p0 = scmp.ge.s32.totalorder %s1492_s30, 1  ;;  %s1492_s30 = sphi %s1557_s30, %s20_s30  }
   0x2   : > { %p300_p1 = scmp.lt.s32.totalorder %s1492_s30, 3 }
   0x4   : > { %p301_p2 = pnand %p1170_p0, %p300_p1 }
   0x5   : > { %p345_p3 = scmp.lt.s32.totalorder (!%p301_p2), %s1166_s10, 1  ;;  %s1497_s25 = smov (!%p301_p2), 127  }
   0x6   : > { %304 = sbr.rel (%p301_p2) target bundleno = 1997 (0x7cd), region = 52  ;;  %s1498_s26 = smov (!%p301_p2), 1  }
   0x7   : > { %s1499_s27 = smov (!%p301_p2), 120   ;;  %s1500_s28 = smov (!%p301_p2), 8  }
   0xb   : > { %v1494_v0 = vmov 0.0   ;;  %vm1495_vm0 = vmmov 0   ;;  %v1571_v1 = vld [vmem:[%s1889_s7] sm:$0xff]  ;;  %s1905_s10 = smov (!%p345_p3, %s1166_s10), 1  ;;  %v1496_v2 = vmov 0   ;;  %v1579_v3 = vld [vmem:[%s1889_s7 + $0x8] sm:$0xff]  ;;  %v365_v21 = vlaneseq }
   0xc   : > { %1297 = vmatprep.subr.bf16.mxu0 %v1494_v0  ;;  %1301 = vmatprep.mubr.msk.bf16.mxu0 %vm1495_vm0, %v1494_v0  ;;  %s1287_s13 = sshll.u32 %s1905_s10, 4  ;;  %v1466_v6 = vld [vmem:[%s1884_s2] sm:$0xff]   ;;  %vm420_vm1 = vcmask 261120   ;;  %s1590_s21 = sshll.u32 %s1905_s10, 3  ;;  %vm486_vm2 = vcmask 515072   ;;  %vm473_vm4 = vcmask 7168  }
   0xd   : > { %1332 = vset.pattern.permute.xlu0 %v1496_v2  ;;  %656 = vmatprep.subr.bf16.mxu1 %v1496_v2  ;;  %s349_s18 = scalar_lea.vmem %s1882_s0, %s1287_s13  ;;  %s354_s24 = scalar_lea.vmem %s1883_s1, %s1590_s21  ;;  %v366_v22 = vand.u32 127, %v365_v21  ;;  %vm540_vm5 = vcmask 457728   ;;  %vm652_vm8 = vcmask 130048   ;;  %vm515_vm10 = vcmask 64512   ;;  %v1474_v35 = vld [vmem:[%s1887_s5 + $0x4] ss:$8 sps:$4 sm:$0xff]  }
   0xe   : > { %395 = vperm.xlu0 %1332, %v1571_v1   ;;  %v1464_v4 = vld [vmem:[%s349_s18 + $0x8] sm:$0xff]   ;;  %v1465_v5 = vld [vmem:[%s349_s18] sm:$0xff]   ;;  %vm1656_vm7 = vmpackc.low %vm540_vm5, %vm540_vm5  ;;  %vm766_vm15 = vcmask 523264   ;;  %s363_s29 = scalar_lea.vmem %s1891_s9, %s1590_s21 }
   0xf   : > { %1298 = vmatpush3.bf16.msra.mxu0 %v1464_v4  ;;  %v1596_v10 = vld [vmem:[%s354_s24] sm:$0xff]   ;;  %v371_v23 = vand.u32 7, %v366_v22  ;;  %vm1197_vm12 = vmneg %vm515_vm10  ;;  %s359_s24 = scalar_lea.vmem %s1890_s8, %s1590_s21 }
  0x10   : > { %1299 = vmatprep.subr.bf16.mxu0 %v1494_v0  ;;  %v385_v15 = vunpack.c.l.bf16 %v1596_v10  ;;  %v386_v16 = vunpack.c.h.bf16 %v1596_v10  ;;  %vm1755_vm13 = vmpackc.low %vm1197_vm12, %vm1197_vm12 }
  0x11   : > { %vm1624_vm3 = vcmp.ge.s32.totalorder %v371_v23, 1  ;;  %vm1640_vm6 = vcmp.le.s32.totalorder %v371_v23, 6 }
  0x12   : > { %400 = vperm.xlu0 %1332, %v1579_v3   ;;  %v1614_v20 = vpack.i.bf16 %v386_v16, %v385_v15  ;;  %v1473_v15 = vld [vmem:[%s1886_s4 + $0x4] ss:$8 sps:$4 sm:$0xff]   ;;  %v1501_v16 = vmov 1   ;;  %vm1720_vm9 = vmpackc.low %vm1640_vm6, %vm1640_vm6 }
  0x13   : > { %1300 = vmatpush3.bf16.msra.mxu0 %v1465_v5  ;;  %1215 = vmatprep.mubr.msk.bf16.mxu1 %vm652_vm8, %v1473_v15  ;;  %vm1743_vm11 = vmpackc.low %vm1624_vm3, %vm1624_vm3 }
  0x14   : > { %709 = vmatprep.subr.bf16.mxu0 %v1496_v2  ;;  %1414 = vset.pattern.permute.xlu1 %v1501_v16 }
  0x16   : > { %1302 = vmatmul.mubr.msk.bf16.vlgmr.msra.gmra.mxu0 %vm420_vm1, %v1466_v6  ;;  %1413 = vset.pattern.permute.xlu0 %v1501_v16 }
  0x89   : > { %v396_v7 = vpop.permute.xlu0 %395 }
  0x8d   : > { %v401_v11 = vpop.permute.xlu0 %400 }
  0xd6   : > { %v458_v8 = vpop.f32.mrf.mxu0 }
  0xd7   : > { %v1598_v13 = vadd.f32 %v458_v8, %v396_v7 }
  0xd8   : > { %v1303_v9 = vpop.f32.mrf.mxu0 }
  0xda   : > { %v461_v12 = vpop.f32.mrf.mxu0 }
  0xdb   : > { %v1600_v14 = vadd.f32 %v461_v12, %v401_v11  ;;  %v1468_v12 = vld [vmem:[%s1885_s3 + $0x4] ss:$8 sps:$4 sm:$0xff]  }
  0xdc   : > { %v1304_v17 = vpop.f32.mrf.mxu0  ;;  %1248 = vmatprep.mubr.msk.bf16.mxu0 %vm652_vm8, %v1468_v12 }
  0xdd   : > { %v1606_v18 = vpack.i.bf16 %v1600_v14, %v1598_v13  ;;  %v553_v19 = vpack.c.bf16 %v1600_v14, %v1598_v13 }
  0xdf   : > { %1344 = vrot.lane.b32.xlu0 %v1606_v18, %s1497_s25  ;;  %1334 = vrot.lane.b32.xlu1 %v1606_v18, %s1498_s26 }
  0xe3   : > { %1359 = vrot.lane.b32.xlu0 %v1606_v18, %s1499_s27  ;;  %1339 = vrot.lane.b32.xlu1 %v1614_v20, %s1498_s26 }
  0xe7   : > { %1349 = vrot.lane.b32.xlu1 %v1614_v20, %s1497_s25 }
  0xeb   : > { %1354 = vrot.lane.b32.xlu1 %v1614_v20, %s1499_s27 }
 0x151   : > { %v1345_v24 = vpop.permute.xlu0 %1344  ;;  %v1335_v26 = vpop.permute.xlu1 %1334 }
 0x152   : > { %v1347_v27 = vunpack.i.h.bf16 %v1345_v24  ;;  %v1346_v28 = vunpack.i.l.bf16 %v1345_v24  ;;  %v1337_v29 = vunpack.i.h.bf16 %v1335_v26  ;;  %v1336_v30 = vunpack.i.l.bf16 %v1335_v26 }
 0x154   : > { %v1629_v31 = vsel %vm486_vm2, %v1347_v27, 0.0  ;;  %v1632_v32 = vsel %vm486_vm2, %v1346_v28, 0.0  ;;  %v1635_v33 = vsel %vm473_vm4, 0.0, %v1337_v29  ;;  %v1638_v34 = vsel %vm473_vm4, 0.0, %v1336_v30 }
 0x155   : > { %v1225_v36 = vpack.c.bf16 %v1629_v31, %v1632_v32  ;;  %v479_v37 = vsel %vm1624_vm3, %v1635_v33, 0.0  ;;  %v1360_v38 = vpop.permute.xlu0 %1359  ;;  %v1340_v39 = vpop.permute.xlu1 %1339  ;;  %v478_v40 = vsel %vm1624_vm3, %v1638_v34, 0.0  ;;  %v1228_v41 = vpack.c.bf16 %v1635_v33, %v1638_v34 }
 0x156   : > { %v1362_v42 = vunpack.i.h.bf16 %v1360_v38  ;;  %v1361_v43 = vunpack.i.l.bf16 %v1360_v38  ;;  %v1342_v44 = vunpack.i.h.bf16 %v1340_v39  ;;  %v1341_v45 = vunpack.i.l.bf16 %v1340_v39 }
 0x157   : > { %v1363_v46 = vpack.i.bf16 %v479_v37, %v478_v40  ;;  %v492_v48 = vsel %vm1640_vm6, %v1629_v31, 0.0  ;;  %v491_v49 = vsel %vm1640_vm6, %v1632_v32, 0.0 }
 0x158   : > { %v1219_v50 = vpack.c.bf16 %v1362_v42, %v1361_v43  ;;  %v1667_v51 = vsel %vm473_vm4, 0.0, %v1342_v44  ;;  %v1670_v52 = vsel %vm473_vm4, 0.0, %v1341_v45  ;;  %v1378_v60 = vpack.i.bf16 %v492_v48, %v491_v49 }
 0x159   : > { %1364 = vrot.lane.b32.xlu0 %v1363_v46, %s1499_s27  ;;  %v1350_v53 = vpop.permute.xlu1 %1349  ;;  %v569_v54 = vsel %vm1624_vm3, %v1667_v51, 0.0  ;;  %v568_v55 = vsel %vm1624_vm3, %v1670_v52, 0.0  ;;  %v1195_v56 = vpack.c.bf16 %v1667_v51, %v1670_v52 }
 0x15a   : > { %v1352_v57 = vunpack.i.h.bf16 %v1350_v53  ;;  %1220 = vmatpush1.bf16.msk.msra.mxu0 %vm1656_vm7, %v1219_v50  ;;  %v1351_v58 = vunpack.i.l.bf16 %v1350_v53  ;;  %v1368_v59 = vpack.i.bf16 %v569_v54, %v568_v55 }
 0x15b   : > { %711 = vmatprep.subr.bf16.mxu0 %v1496_v2 }
 0x15c   : > { %v577_v61 = vsel %vm486_vm2, %v1352_v57, 0.0  ;;  %v576_v63 = vsel %vm486_vm2, %v1351_v58, 0.0  ;;  %1369 = vrot.lane.b32.xlu1 %v1368_v59, %s1499_s27 }
 0x15d   : > { %v579_v62 = vsel %vm1640_vm6, %v577_v61, 0.0  ;;  %1379 = vrot.lane.b32.xlu0 %v1378_v60, %s1500_s28  ;;  %v1355_v4 = vpop.permute.xlu1 %1354  ;;  %v578_v5 = vsel %vm1640_vm6, %v576_v63, 0.0  ;;  %v1192_v6 = vpack.c.bf16 %v577_v61, %v576_v63  ;;  %v1471_v61 = vld [vmem:[%s1886_s4] ss:$8 sps:$4 sm:$0xff]  }
 0x15e   : > { %v1357_v7 = vunpack.i.h.bf16 %v1355_v4  ;;  %v1356_v8 = vunpack.i.l.bf16 %v1355_v4  ;;  %v1373_v9 = vpack.i.bf16 %v579_v62, %v578_v5  ;;  %v1502_v62 = vmov 2  }
 0x160   : > { %v1186_v11 = vpack.c.bf16 %v1357_v7, %v1356_v8  ;;  %1374 = vrot.lane.b32.xlu1 %v1373_v9, %s1500_s28 }
 0x161   : > { %1384 = vrot.lane.b32.xlu0 %v1606_v18, %s1500_s28 }
 0x162   : > { %1187 = vmatpush1.bf16.msk.msra.mxu1 %vm1656_vm7, %v1186_v11 }
 0x163   : > { %658 = vmatprep.subr.bf16.mxu1 %v1496_v2 }
 0x164   : > { %1389 = vrot.lane.b32.xlu1 %v1614_v20, %s1500_s28 }
 0x165   : > { %1399 = vrot.lane.b32.xlu0 %v1363_v46, %s1500_s28 }
 0x168   : > { %1394 = vrot.lane.b32.xlu1 %v1368_v59, %s1500_s28  ;;  %v1470_v59 = vld [vmem:[%s1885_s3] ss:$8 sps:$4 sm:$0xff]  }
 0x169   : > { %1404 = vrot.lane.b32.xlu0 %v1378_v60, %s1499_s27 }
 0x16c   : > { %1409 = vrot.lane.b32.xlu1 %v1373_v9, %s1499_s27 }
 0x16d   : > { %751 = vperm.xlu0 %1413, %v1571_v1  }
 0x170   : > { %755 = vperm.xlu1 %1414, %v1579_v3  }
 0x171   : > { %1415 = vset.pattern.permute.xlu0 %v1502_v62 }
 0x174   : > { %1416 = vset.pattern.permute.xlu1 %v1502_v62 }
 0x1cb   : > { %v1365_v17 = vpop.permute.xlu0 %1364 }
 0x1cc   : > { %v1367_v18 = vunpack.i.h.bf16 %v1365_v17  ;;  %v1366_v20 = vunpack.i.l.bf16 %v1365_v17 }
 0x1ce   : > { %v1222_v21 = vpack.c.bf16 %v1367_v18, %v1366_v20  ;;  %v1370_v22 = vpop.permute.xlu1 %1369 }
 0x1cf   : > { %v1372_v23 = vunpack.i.h.bf16 %v1370_v22  ;;  %v1371_v24 = vunpack.i.l.bf16 %v1370_v22  ;;  %v1380_v26 = vpop.permute.xlu0 %1379 }
 0x1d0   : > { %1223 = vmatpush1.bf16.msk.msra.mxu0 %vm1656_vm7, %v1222_v21  ;;  %v1382_v32 = vunpack.i.h.bf16 %v1380_v26 }
 0x1d1   : > { %713 = vmatprep.subr.bf16.mxu0 %v1496_v2  ;;  %v1189_v28 = vpack.c.bf16 %v1372_v23, %v1371_v24 }
 0x1d2   : > { %v1375_v29 = vpop.permute.xlu1 %1374 }
 0x1d3   : > { %1190 = vmatpush1.bf16.msk.msra.mxu1 %vm1656_vm7, %v1189_v28  ;;  %v1385_v30 = vpop.permute.xlu0 %1384  ;;  %v1377_v38 = vunpack.i.h.bf16 %v1375_v29  ;;  %v1376_v39 = vunpack.i.l.bf16 %v1375_v29  ;;  %v1503_v28 = vmov 3  }
 0x1d4   : > { %1226 = vmatpush1.bf16.msk.msra.mxu0 %vm1720_vm9, %v1225_v36  ;;  %660 = vmatprep.subr.bf16.mxu1 %v1496_v2  ;;  %v1381_v36 = vunpack.i.l.bf16 %v1380_v26  ;;  %v1387_v40 = vunpack.i.h.bf16 %v1385_v30  ;;  %v1386_v42 = vunpack.i.l.bf16 %v1385_v30 }
 0x1d5   : > { %715 = vmatprep.subr.bf16.mxu0 %v1496_v2  ;;  %v1200_v43 = vpack.c.bf16 %v1377_v38, %v1376_v39 }
 0x1d6   : > { %v1390_v37 = vpop.permute.xlu1 %1389  ;;  %v1238_v45 = vpack.c.bf16 %v1387_v40, %v1386_v42 }
 0x1d7   : > { %1193 = vmatpush1.bf16.msk.msra.mxu1 %vm1720_vm9, %v1192_v6  ;;  %v1400_v13 = vpop.permute.xlu0 %1399  ;;  %v1391_v44 = vunpack.i.l.bf16 %v1390_v37 }
 0x1d8   : > { %716 = vmatpush1.bf16.msra.mxu0 %v553_v19  ;;  %662 = vmatprep.subr.bf16.mxu1 %v1496_v2  ;;  %v1233_v19 = vpack.c.bf16 %v1382_v32, %v1381_v36  ;;  %v1402_v33 = vunpack.i.h.bf16 %v1400_v13  ;;  %v1401_v34 = vunpack.i.l.bf16 %v1400_v13 }
 0x1d9   : > { %717 = vmatprep.subr.bf16.mxu0 %v1496_v2 }
 0x1da   : > { %v1243_v49 = vpack.c.bf16 %v1402_v33, %v1401_v34 }
 0x1db   : > { %663 = vmatpush1.bf16.msra.mxu1 %v1596_v10  ;;  %v1392_v10 = vunpack.i.h.bf16 %v1390_v37  ;;  %v1405_v46 = vpop.permute.xlu0 %1404 }
 0x1dc   : > { %1229 = vmatpush1.bf16.msk.msra.mxu0 %vm1743_vm11, %v1228_v41  ;;  %664 = vmatprep.subr.bf16.mxu1 %v1496_v2  ;;  %v1395_v41 = vpop.permute.xlu1 %1394  ;;  %v1407_v52 = vunpack.i.h.bf16 %v1405_v46  ;;  %v1406_v53 = vunpack.i.l.bf16 %v1405_v46 }
 0x1dd   : > { %719 = vmatprep.subr.bf16.mxu0 %v1496_v2  ;;  %v1205_v48 = vpack.c.bf16 %v1392_v10, %v1391_v44  ;;  %v1397_v50 = vunpack.i.h.bf16 %v1395_v41  ;;  %v1396_v51 = vunpack.i.l.bf16 %v1395_v41 }
 0x1df   : > { %1196 = vmatpush1.bf16.msk.msra.mxu1 %vm1743_vm11, %v1195_v56  ;;  %v1210_v55 = vpack.c.bf16 %v1397_v50, %v1396_v51  ;;  %v1246_v56 = vpack.c.bf16 %v1407_v52, %v1406_v53 }
 0x1e0   : > { %1234 = vmatpush1.bf16.msk.msra.mxu0 %vm1755_vm13, %v1233_v19  ;;  %666 = vmatprep.subr.bf16.mxu1 %v1496_v2  ;;  %v1410_v54 = vpop.permute.xlu1 %1409 }
 0x1e1   : > { %721 = vmatprep.subr.bf16.mxu0 %v1496_v2  ;;  %v1412_v57 = vunpack.i.h.bf16 %v1410_v54  ;;  %v1411_v58 = vunpack.i.l.bf16 %v1410_v54 }
 0x1e3   : > { %1201 = vmatpush1.bf16.msk.msra.mxu1 %vm1755_vm13, %v1200_v43  ;;  %v1213_v60 = vpack.c.bf16 %v1412_v57, %v1411_v58 }
 0x1e4   : > { %1239 = vmatpush1.bf16.msk.msra.mxu0 %vm1755_vm13, %v1238_v45  ;;  %668 = vmatprep.subr.bf16.mxu1 %v1496_v2 }
 0x1e5   : > { %723 = vmatprep.subr.bf16.mxu0 %v1496_v2 }
 0x1e7   : > { %1206 = vmatpush1.bf16.msk.msra.mxu1 %vm1755_vm13, %v1205_v48 }
 0x1e8   : > { %1244 = vmatpush1.bf16.msk.msra.mxu0 %vm1755_vm13, %v1243_v49  ;;  %670 = vmatprep.subr.bf16.mxu1 %v1496_v2  ;;  %v752_v5 = vpop.permute.xlu0 %751 }
 0x1e9   : > { %739 = vmatprep.subr.bf16.mxu0 %v1496_v2 }
 0x1eb   : > { %1211 = vmatpush1.bf16.msk.msra.mxu1 %vm1755_vm13, %v1210_v55  ;;  %v756_v16 = vpop.permute.xlu1 %755 }
 0x1ec   : > { %1247 = vmatpush2.bf16.msk.msra.mxu0 %vm1656_vm7, %v1246_v56  ;;  %686 = vmatprep.subr.bf16.mxu1 %v1496_v2 }
 0x1ed   : > { %1305 = vmatprep.subr.bf16.mxu0 %v1494_v0 }
 0x1ef   : > { %742 = vmatmul.mubr.bf16.vlgmr.msra.gmra.mxu0 %v1470_v59  ;;  %1214 = vmatpush2.bf16.msk.msra.mxu1 %vm1656_vm7, %v1213_v60 }
 0x1f0   : > { %1307 = vmatprep.mubr.msk.bf16.mxu0 %vm1495_vm0, %v1494_v0  ;;  %919 = vmatprep.subr.bf16.mxu1 %v1496_v2 }
 0x1f2   : > { %689 = vmatmul.mubr.bf16.vlgmr.msra.gmra.mxu1 %v1471_v61 }
 0x1f3   : > { %1281 = vmatprep.mubr.msk.bf16.mxu1 %vm652_vm8, %v1474_v35 }
 0x2af   : > { %v743_v63 = vpop.f32.mrf.mxu0 }
 0x2b1   : > { %v745_v4 = vpop.f32.mrf.mxu0 }
 0x2b2   : > { %v690_v6 = vpop.f32.mrf.mxu1 }
 0x2b3   : > { %v746_v7 = vpop.f32.mrf.mxu0  ;;  %v744_v8 = vadd.f32 %v743_v63, %v690_v6 }
 0x2b4   : > { %v692_v9 = vpop.f32.mrf.mxu1 }
 0x2b5   : > { %v748_v11 = vpop.f32.mrf.mxu0  ;;  %v758_v12 = vadd.f32 %v752_v5, %v744_v8 }
 0x2b6   : > { %v693_v15 = vpop.f32.mrf.mxu1 }
 0x2b7   : > { %v762_v17 = vmul.f32 0.01, %v758_v12  ;;  %v747_v18 = vadd.f32 %v746_v7, %v693_v15  ;;  %vm760_vm14 = vcmp.ge.f32.partialorder %v758_v12, 0.0 }
 0x2b8   : > { %v695_v0 = vpop.f32.mrf.mxu1 }
 0x2b9   : > { %v759_v20 = vadd.f32 %v756_v16, %v747_v18  ;;  %v764_v21 = vsel %vm760_vm14, %v758_v12, %v762_v17 }
 0x2ba   : > { %v767_v22 = vsel %vm766_vm15, %v764_v21, 0.0 }
 0x2bb   : > { %v763_v23 = vmul.f32 0.01, %v759_v20  ;;  %768 = vadd.xlane.f32.xlu1 %v767_v22  ;;  %vm761_vm0 = vcmp.ge.f32.partialorder %v759_v20, 0.0 }
 0x2bd   : > { %v765_v24 = vsel %vm761_vm0, %v759_v20, %v763_v23  ;;  %v1504_v23 = vmov 4  }
 0x2be   : > { %v770_v26 = vsel %vm766_vm15, %v765_v24, 0.0 }
 0x2bf   : > { %771 = vadd.xlane.f32.xlu0 %v770_v26 }
 0x2cc   : > { %799 = vperm.xlu1 %1416, %v1579_v3  }
 0x2d0   : > { %1417 = vset.pattern.permute.xlu1 %v1503_v28 }
 0x2d1   : > { %805 = vperm.xlu1 %1417, %v1571_v1  }
 0x344   : > { %v769_v29 = vpop.xlane.xlu1 %768 }
 0x345   : > { %v774_v30 = vmul.f32 0.015625, %v769_v29 }
 0x347   : > { %v776_v32 = vsub.f32 %v764_v21, %v774_v30 }
 0x348   : > { %v772_v36 = vpop.xlane.xlu0 %771  ;;  %v800_v42 = vpop.permute.xlu1 %799 }
 0x349   : > { %v775_v37 = vmul.f32 0.015625, %v772_v36  ;;  %v778_v38 = vmul.f32 %v776_v32, %v776_v32 }
 0x34b   : > { %v777_v39 = vsub.f32 %v765_v24, %v775_v37  ;;  %v780_v13 = vsel %vm766_vm15, %v778_v38, 0.0 }
 0x34c   : > { %781 = vadd.xlane.f32.xlu0 %v780_v13  ;;  %v806_v43 = vpop.permute.xlu1 %805 }
 0x34d   : > { %v779_v19 = vmul.f32 %v777_v39, %v777_v39 }
 0x34f   : > { %v783_v40 = vsel %vm766_vm15, %v779_v19, 0.0 }
 0x350   : > { %784 = vadd.xlane.f32.xlu1 %v783_v40 }
 0x361   : > { %809 = vperm.xlu1 %1417, %v1579_v3  }
 0x362   : > { %795 = vperm.xlu0 %1415, %v1571_v1  }
 0x365   : > { %1458 = vset.pattern.permute.xlu1 %v1504_v23 }
 0x366   : > { %1459 = vset.pattern.permute.xlu0 %v1504_v23 }
 0x3d5   : > { %v782_v10 = vpop.xlane.xlu0 %781 }
 0x3d6   : > { %v786_v44 = vmul.f32 0.015625, %v782_v10 }
 0x3d8   : > { %v788_v33 = vadd.f32 1e-05, %v786_v44 }
 0x3d9   : > { %v785_v34 = vpop.xlane.xlu1 %784 }
 0x3da   : > { %1478 = vrsqrt.f32 %v788_v33  ;;  %v787_v41 = vmul.f32 0.015625, %v785_v34  ;;  %v1476_v34 = vld [vmem:[%s1887_s5] ss:$8 sps:$4 sm:$0xff]  }
 0x3dc   : > { %v789_v45 = vadd.f32 1e-05, %v787_v41  ;;  %v1505_v41 = vmov 5  }
 0x3dd   : > { %v796_v49 = vpop.permute.xlu0 %795  ;;  %v810_v54 = vpop.permute.xlu1 %809 }
 0x3de   : > { %1480 = vrsqrt.f32 %v789_v45 }
 0x3e7   : > { %v1479_v46 = vpop.eup %1478 }
 0x3e8   : > { %v792_v48 = vmul.f32 %v1479_v46, %v776_v32 }
 0x3ea   : > { %v802_v52 = vmul.f32 %v796_v49, %v792_v48 }
 0x3eb   : > { %v1481_v50 = vpop.eup %1480 }
 0x3ec   : > { %v793_v51 = vmul.f32 %v1481_v50, %v777_v39  ;;  %v812_v56 = vadd.f32 %v806_v43, %v802_v52 }
 0x3ee   : > { %v803_v53 = vmul.f32 %v800_v42, %v793_v51 }
 0x3f0   : > { %v813_v55 = vadd.f32 %v810_v54, %v803_v53 }
 0x3f2   : > { %v1443_v57 = vpack.i.bf16 %v813_v55, %v812_v56  ;;  %v894_v58 = vpack.c.bf16 %v813_v55, %v812_v56 }
 0x3f4   : > { %1444 = vrot.lane.b32.xlu0 %v1443_v57, %s1500_s28  ;;  %1419 = vrot.lane.b32.xlu1 %v1443_v57, %s1498_s26 }
 0x3f8   : > { %1424 = vrot.lane.b32.xlu1 %v1443_v57, %s1497_s25 }
 0x3fc   : > { %1429 = vrot.lane.b32.xlu1 %v1443_v57, %s1499_s27  ;;  %v1506_v57 = vmov 6  }
 0x466   : > { %v1420_v59 = vpop.permute.xlu1 %1419  ;;  %v1445_v37 = vpop.permute.xlu0 %1444 }
 0x467   : > { %v1422_v60 = vunpack.i.h.bf16 %v1420_v59  ;;  %v1421_v61 = vunpack.i.l.bf16 %v1420_v59  ;;  %v1447_v38 = vunpack.i.h.bf16 %v1445_v37  ;;  %v1446_v39 = vunpack.i.l.bf16 %v1445_v37 }
 0x469   : > { %v823_v62 = vsel %vm473_vm4, 0.0, %v1422_v60  ;;  %v822_v63 = vsel %vm473_vm4, 0.0, %v1421_v61  ;;  %v1271_v27 = vpack.c.bf16 %v1447_v38, %v1446_v39 }
 0x46a   : > { %v825_v4 = vsel %vm1624_vm3, %v823_v62, 0.0  ;;  %v824_v5 = vsel %vm1624_vm3, %v822_v63, 0.0  ;;  %v1261_v6 = vpack.c.bf16 %v823_v62, %v822_v63  ;;  %v1425_v7 = vpop.permute.xlu1 %1424  ;;  %vm1020_vm3 = vcmask 519168  }
 0x46b   : > { %v1427_v8 = vunpack.i.h.bf16 %v1425_v7  ;;  %v1426_v9 = vunpack.i.l.bf16 %v1425_v7  ;;  %v1433_v11 = vpack.i.bf16 %v825_v4, %v824_v5 }
 0x46d   : > { %v833_v12 = vsel %vm486_vm2, %v1427_v8, 0.0  ;;  %v832_v15 = vsel %vm486_vm2, %v1426_v9, 0.0  ;;  %1434 = vrot.lane.b32.xlu1 %v1433_v11, %s1499_s27 }
 0x46e   : > { %v835_v16 = vsel %vm1640_vm6, %v833_v12, 0.0  ;;  %v834_v17 = vsel %vm1640_vm6, %v832_v15, 0.0  ;;  %v1258_v18 = vpack.c.bf16 %v833_v12, %v832_v15  ;;  %v1430_v25 = vpop.permute.xlu1 %1429 }
 0x46f   : > { %v1432_v0 = vunpack.i.h.bf16 %v1430_v25  ;;  %v1431_v20 = vunpack.i.l.bf16 %v1430_v25  ;;  %v1453_v21 = vpack.i.bf16 %v835_v16, %v834_v17 }
 0x471   : > { %v1252_v22 = vpack.c.bf16 %v1432_v0, %v1431_v20  ;;  %1454 = vrot.lane.b32.xlu0 %v1453_v21, %s1499_s27  ;;  %1439 = vrot.lane.b32.xlu1 %v1453_v21, %s1500_s28 }
 0x473   : > { %1253 = vmatpush1.bf16.msk.msra.mxu1 %vm1656_vm7, %v1252_v22 }
 0x474   : > { %921 = vmatprep.subr.bf16.mxu1 %v1496_v2 }
 0x475   : > { %1449 = vrot.lane.b32.xlu1 %v1433_v11, %s1500_s28  ;;  %904 = vperm.xlu0 %1459, %v1579_v3  }
 0x479   : > { %900 = vperm.xlu1 %1458, %v1571_v1   ;;  %1461 = vset.pattern.permute.xlu0 %v1505_v41 }
 0x47d   : > { %1460 = vset.pattern.permute.xlu1 %v1505_v41 }
 0x4df   : > { %v1435_v24 = vpop.permute.xlu1 %1434 }
 0x4e0   : > { %v1437_v26 = vunpack.i.h.bf16 %v1435_v24  ;;  %v1436_v28 = vunpack.i.l.bf16 %v1435_v24 }
 0x4e2   : > { %v1255_v29 = vpack.c.bf16 %v1437_v26, %v1436_v28 }
 0x4e3   : > { %v1440_v30 = vpop.permute.xlu1 %1439  ;;  %v1455_v43 = vpop.permute.xlu0 %1454 }
 0x4e4   : > { %1256 = vmatpush1.bf16.msk.msra.mxu1 %vm1656_vm7, %v1255_v29  ;;  %v1442_v32 = vunpack.i.h.bf16 %v1440_v30  ;;  %v1441_v36 = vunpack.i.l.bf16 %v1440_v30  ;;  %v1457_v31 = vunpack.i.h.bf16 %v1455_v43  ;;  %v1456_v10 = vunpack.i.l.bf16 %v1455_v43  ;;  %v1023_v30 = vld [vmem:[%s1888_s6] sm:$0xf] }
 0x4e5   : > { %923 = vmatprep.subr.bf16.mxu1 %v1496_v2 }
 0x4e6   : > { %v1266_v13 = vpack.c.bf16 %v1442_v32, %v1441_v36  ;;  %v1279_v33 = vpack.c.bf16 %v1457_v31, %v1456_v10 }
 0x4e7   : > { %v1450_v19 = vpop.permute.xlu1 %1449 }
 0x4e8   : > { %1259 = vmatpush1.bf16.msk.msra.mxu1 %vm1720_vm9, %v1258_v18  ;;  %v1452_v40 = vunpack.i.h.bf16 %v1450_v19  ;;  %v1451_v42 = vunpack.i.l.bf16 %v1450_v19 }
 0x4e9   : > { %925 = vmatprep.subr.bf16.mxu1 %v1496_v2 }
 0x4ea   : > { %v1276_v44 = vpack.c.bf16 %v1452_v40, %v1451_v42 }
 0x4ec   : > { %926 = vmatpush1.bf16.msra.mxu1 %v894_v58 }
 0x4ed   : > { %927 = vmatprep.subr.bf16.mxu1 %v1496_v2 }
 0x4f0   : > { %1262 = vmatpush1.bf16.msk.msra.mxu1 %vm1743_vm11, %v1261_v6  ;;  %v905_v14 = vpop.permute.xlu0 %904 }
 0x4f1   : > { %929 = vmatprep.subr.bf16.mxu1 %v1496_v2 }
 0x4f4   : > { %1267 = vmatpush1.bf16.msk.msra.mxu1 %vm1755_vm13, %v1266_v13  ;;  %v901_v45 = vpop.permute.xlu1 %900 }
 0x4f5   : > { %931 = vmatprep.subr.bf16.mxu1 %v1496_v2 }
 0x4f8   : > { %1272 = vmatpush1.bf16.msk.msra.mxu1 %vm1755_vm13, %v1271_v27 }
 0x4f9   : > { %933 = vmatprep.subr.bf16.mxu1 %v1496_v2 }
 0x4fc   : > { %1277 = vmatpush1.bf16.msk.msra.mxu1 %vm1755_vm13, %v1276_v44 }
 0x4fd   : > { %949 = vmatprep.subr.bf16.mxu1 %v1496_v2 }
 0x500   : > { %1280 = vmatpush2.bf16.msk.msra.mxu1 %vm1656_vm7, %v1279_v33 }
 0x503   : > { %952 = vmatmul.mubr.bf16.vlgmr.msra.gmra.mxu1 %v1476_v34 }
 0x5c3   : > { %v953_v46 = vpop.f32.mrf.mxu1 }
 0x5c4   : > { %v954_v48 = vadd.f32 %v953_v46, %v901_v45 }
 0x5c5   : > { %v955_v49 = vpop.f32.mrf.mxu1 }
 0x5c6   : > { %v962_v50 = vmul.f32 0.01, %v954_v48  ;;  %vm960_vm1 = vcmp.ge.f32.partialorder %v954_v48, 0.0 }
 0x5c7   : > { %v956_v2 = vpop.f32.mrf.mxu1 }
 0x5c8   : > { %v957_v51 = vadd.f32 %v956_v2, %v905_v14  ;;  %v964_v52 = vsel %vm960_vm1, %v954_v48, %v962_v50 }
 0x5c9   : > { %v958_v53 = vpop.f32.mrf.mxu1  ;;  %v966_v54 = vsel %vm766_vm15, %v964_v52, 0.0 }
 0x5ca   : > { %v963_v55 = vmul.f32 0.01, %v957_v51  ;;  %967 = vadd.xlane.f32.xlu1 %v966_v54  ;;  %vm961_vm2 = vcmp.ge.f32.partialorder %v957_v51, 0.0 }
 0x5cc   : > { %v965_v47 = vsel %vm961_vm2, %v957_v51, %v963_v55 }
 0x5cd   : > { %v969_v56 = vsel %vm766_vm15, %v965_v47, 0.0 }
 0x5ce   : > { %970 = vadd.xlane.f32.xlu0 %v969_v56 }
 0x5db   : > { %993 = vperm.xlu1 %1460, %v1571_v1  }
 0x5df   : > { %1462 = vset.pattern.permute.xlu1 %v1506_v57 }
 0x653   : > { %v968_v58 = vpop.xlane.xlu1 %967 }
 0x654   : > { %v972_v59 = vmul.f32 0.015625, %v968_v58 }
 0x656   : > { %v974_v60 = vsub.f32 %v964_v52, %v972_v59 }
 0x657   : > { %v971_v61 = vpop.xlane.xlu0 %970  ;;  %v994_v8 = vpop.permute.xlu1 %993 }
 0x658   : > { %v973_v62 = vmul.f32 0.015625, %v971_v61  ;;  %v976_v63 = vmul.f32 %v974_v60, %v974_v60 }
 0x65a   : > { %v975_v4 = vsub.f32 %v965_v47, %v973_v62  ;;  %v978_v5 = vsel %vm766_vm15, %v976_v63, 0.0 }
 0x65b   : > { %979 = vadd.xlane.f32.xlu1 %v978_v5 }
 0x65c   : > { %v977_v6 = vmul.f32 %v975_v4, %v975_v4 }
 0x65e   : > { %v981_v7 = vsel %vm766_vm15, %v977_v6, 0.0 }
 0x65f   : > { %982 = vadd.xlane.f32.xlu0 %v981_v7 }
 0x66c   : > { %1003 = vperm.xlu1 %1462, %v1571_v1  }
 0x670   : > { %1007 = vperm.xlu1 %1462, %v1579_v3  }
 0x675   : > { %997 = vperm.xlu0 %1461, %v1579_v3  }
 0x679   : > { %1463 = vset.pattern.permute.xlu0 %v1506_v57 }
 0x6e4   : > { %v980_v9 = vpop.xlane.xlu1 %979 }
 0x6e5   : > { %v984_v11 = vmul.f32 0.015625, %v980_v9 }
 0x6e7   : > { %v986_v12 = vadd.f32 1e-05, %v984_v11 }
 0x6e8   : > { %v983_v15 = vpop.xlane.xlu0 %982  ;;  %v1004_v0 = vpop.permute.xlu1 %1003 }
 0x6e9   : > { %1482 = vrsqrt.f32 %v986_v12  ;;  %v985_v16 = vmul.f32 0.015625, %v983_v15 }
 0x6eb   : > { %v987_v17 = vadd.f32 1e-05, %v985_v16 }
 0x6ec   : > { %v1008_v24 = vpop.permute.xlu1 %1007 }
 0x6ed   : > { %1484 = vrsqrt.f32 %v987_v17 }
 0x6f0   : > { %v998_v21 = vpop.permute.xlu0 %997 }
 0x6f6   : > { %v1483_v18 = vpop.eup %1482 }
 0x6f7   : > { %v990_v25 = vmul.f32 %v1483_v18, %v974_v60 }
 0x6f9   : > { %v1000_v20 = vmul.f32 %v994_v8, %v990_v25 }
 0x6fa   : > { %v1485_v1 = vpop.eup %1484 }
 0x6fb   : > { %v1010_v22 = vadd.f32 %v1004_v0, %v1000_v20  ;;  %v991_v3 = vmul.f32 %v1485_v1, %v975_v4 }
 0x6fd   : > { %v1290_v35 = vpack.c.bf16 %v1010_v22, %v1010_v22  ;;  %v1001_v23 = vmul.f32 %v998_v21, %v991_v3 }
 0x6ff   : > { %1021 = vst.msk [vmem:[%s359_s24] sm:$0xf] %vm1020_vm3, %v1290_v35  ;;  %v1011_v26 = vadd.f32 %v1008_v24, %v1001_v23 }
 0x701   : > { %v1012_v28 = vpack.c.bf16 %v1011_v26, %v1010_v22  ;;  %v1291_v29 = vpack.c.bf16 %v1011_v26, %v1011_v26 }
 0x703   : > { %1022 = vst.msk [vmem:[%s359_s24 + $0x4] sm:$0xf] %vm1020_vm3, %v1291_v29  ;;  %1306 = vmatpush3.bf16.msra.mxu0 %v1012_v28 }
 0x706   : > { %1308 = vmatmul.mubr.msk.bf16.vlgmr.msra.gmra.mxu0 %vm652_vm8, %v1023_v30 }
 0x7c6   : > { %v1061_v32 = vpop.f32.mrf.mxu0 }
 0x7c7   : > { %1067 = vst.msk [vmem:[%s363_s29] sm:$0xff] %vm766_vm15, %v1061_v32 }
 0x7c8   : > { %v1309_v36 = vpop.f32.mrf.mxu0 }
 0x7ca   : > { %v1064_v37 = vpop.f32.mrf.mxu0 }
 0x7cc   : > { %v1310_v38 = vpop.f32.mrf.mxu0 }
 0x7cd PF: > { %s20_s30 = sadd.s32 1, %s1492_s30  }
 0x7ce   : > { %p17_p4 = scmp.ge.s32.totalorder %s20_s30, 4  }
 0x7d0   :  { %19 = sbr.rel (!%p17_p4) target bundleno = 1 (0x1), region = 97 }

// kernel: unet_forward.9
= control target key start
LH: loop header
LB: loop body
LE: loop exit
PB: predicated region body
PF: predicated region fallthrough
CT: control target
= control target key end

     0   :  { %s1927_s0 = inlined_call_operand.vmem [shape: bf16[2,16,256], index: 0, kind: input, shape index: {}]   ;;  %s1928_s1 = inlined_call_operand.vmem [shape: bf16[2,8,256], index: 1, kind: input, shape index: {}]   ;;  %s1929_s2 = inlined_call_operand.vmem [shape: bf16[8,16], index: 2, kind: input, shape index: {}]   ;;  %s1930_s3 = inlined_call_operand.vmem [shape: bf16[8,72], index: 3, kind: input, shape index: {}]   ;;  %s1931_s4 = inlined_call_operand.vmem [shape: bf16[8,72], index: 4, kind: input, shape index: {}]   ;;  %s1932_s5 = inlined_call_operand.vmem [shape: bf16[8,72], index: 5, kind: input, shape index: {}]   ;;  %s1933_s6 = inlined_call_operand.vmem [shape: bf16[8,8], index: 6, kind: input, shape index: {}]   ;;  %s1934_s7 = inlined_call_operand.vmem [shape: f32[8,8], index: 7, kind: input, shape index: {}]   ;;  %s1935_s8 = inlined_call_operand.hbm [shape: bf16[2,8,256], index: 8, kind: output, shape index: {0}]   ;;  %s1936_s9 = inlined_call_operand.vmem [shape: f32[2,8,256], index: 9, kind: output, shape index: {1}]  }
   0x1   :  { %1940 = sst [smem:[#allocation5_spill]] %s1927_s0 }
   0x2   :  { %1941 = sst [smem:[#allocation6_spill]] %s1928_s1 }
   0x3   :  { %15 = vsyncpa [#allocation3], 0 }
   0x4   :  { %17 = vsyncpa [#allocation3 + $0x1], 0  ;;  %s1548_s30 = smov 0   ;;  %s1550_s10 = smov 0  }
   0x5   :  { %s1552_s11 = smov 0   ;;  %s1554_s12 = smov 0  }
   0x6 LB: > { %s1569_s13 = sadd.s32 4294967295, %s1483_s12   ;;  %s1142_s14 = sadd.s32 4294967294, %s1483_s12   ;;  %s1483_s12 = sphi %s1554_s12, %s1976_s12   ;;  %s1479_s11 = sphi %s1552_s11, %s1975_s11   ;;  %s1475_s10 = sphi %s1550_s10, %s1974_s10   ;;  %s1471_s30 = sphi %s1548_s30, %s1973_s30  }
   0x7   : > { %s1573_s15 = sadd.s32 1, %s1483_s12   ;;  %s208_s16 = sadd.s32 1, %s1479_s11 }
   0x8   : > { %s205_s17 = ssub.s32 %s1483_s12, %s1573_s15  ;;  %p218_p0 = scmp.ne.s32.totalorder %s1479_s11, %s1475_s10 }
   0x9   : > { %p206_p1 = scmp.eq.s32.totalorder %s205_s17, 0  ;;  %p219_p2 = scmp.eq.s32.totalorder %s1569_s13, 1 }
   0xa   : > { %p224_p3 = scmp.ne.s32.totalorder %s1475_s10, %s1471_s30  ;;  %p225_p4 = scmp.eq.s32.totalorder %s1142_s14, 1 }
   0xb   : > { %s1584_s18 = scalar_select %p206_p1, %s1479_s11, %s208_s16  }
   0xc   : > { %p1586_p5 = por %p219_p2, %p218_p0  ;;  %p1590_p6 = por %p225_p4, %p224_p3 }
   0xd   : > { %p1145_p7 = scmp.ge.s32.totalorder %s1483_s12, 1  ;;  %p303_p8 = scmp.lt.s32.totalorder %s1483_s12, 3 }
   0xf   : > { %p304_p9 = pnand %p1145_p7, %p303_p8 }
  0x10   : > { %p349_p10 = scmp.lt.s32.totalorder (!%p304_p9), %s1569_s13, 1  ;;  %s1944_s0 = sld [smem:[#allocation5_spill]] (!%p304_p9) }
  0x11   : > { %307 = sbr.rel (%p304_p9) target bundleno = 1993 (0x7c9), region = 52  ;;  %s1945_s1 = sld [smem:[#allocation6_spill]] (!%p304_p9) }
  0x12   : > { %s1486_s22 = smov (!%p304_p9), 127   ;;  %s1488_s26 = smov (!%p304_p9), 112  }
  0x13   : > { %s1489_s27 = smov (!%p304_p9), 16   ;;  %s1237_s29 = sshll.u32 (!%p304_p9), %s1569_s13, 7 }
  0x14   : > { %s1041_s17 = scalar_lea.hbm (!%p304_p9), %s1935_s8, %s1237_s29 }
  0x16   : > { %v1600_v0 = vld [vmem:[%s1934_s7] sm:$0xff]  ;;  %v1485_v1 = vmov 0   ;;  %s1605_s23 = scalar_select %p349_p10, %s1569_s13, 1  ;;  %vm1937_vm0 = vcmask 130048   ;;  %v365_v9 = vlaneseq  ;;  %vm484_vm1 = vcmask 1039360  }
  0x17   : > { %454 = vmatprep.mubr.bf16.mxu0 %v1485_v1  ;;  %1289 = vset.pattern.permute.xlu0 %v1485_v1  ;;  %v400_v8 = vld [vmem:[%s1929_s2] sm:$0xf]  ;;  %vm469_vm5 = vcmask 7168   ;;  %vm535_vm7 = vcmask 916480   ;;  %vm648_vm8 = vcmask 1043456   ;;  %vm1491_vm10 = vmmov 1   ;;  %vm1763_vm14 = vmneg %vm1937_vm0 }
  0x18   : > { %405 = vperm.xlu0 %1289, %v1600_v0   ;;  %687 = vmatprep.mubr.bf16.mxu1 %v1485_v1  ;;  %s1939_s24 = sshll.u32 %s1605_s23, 4  ;;  %s1234_s25 = sshll.u32 %s1605_s23, 3  ;;  %v366_v10 = vand.u32 127, %v365_v9  ;;  %vm1726_vm9 = vmpackc.low %vm535_vm7, %vm535_vm7  ;;  %v1494_v24 = vmov 4  }
  0x19   : > { %s353_s28 = scalar_lea.vmem %s1944_s0, %s1939_s24  ;;  %s358_s16 = scalar_lea.vmem %s1945_s1, %s1234_s25 }
  0x1a   : > { %v1619_v2 = vld [vmem:[%s358_s16] sm:$0xff]  ;;  %v367_v11 = vadd.s32 128, %v366_v10  ;;  %v372_v16 = vand.u32 15, %v366_v10  ;;  %s1487_s25 = smov 1  }
  0x1b   : > { %v398_v3 = vunpack.c.l.bf16 %v1619_v2  ;;  %v399_v4 = vunpack.c.h.bf16 %v1619_v2  ;;  %v1416_v5 = vld [vmem:[%s353_s28 + $0x4] ss:$8 sps:$4 sm:$0xff]   ;;  %v1418_v6 = vld [vmem:[%s353_s28] ss:$8 sps:$4 sm:$0xff]  }
  0x1c   : > { %436 = vmatprep.subr.bf16.mxu0 %v1416_v5  ;;  %v379_v15 = vand.u32 15, %v367_v11  ;;  %vm1641_vm3 = vcmp.le.s32.totalorder %v372_v16, 14  ;;  %vm1668_vm4 = vcmp.ge.s32.totalorder %v372_v16, 1 }
  0x1d   : > { %v1295_v7 = vpack.i.bf16 %v399_v4, %v398_v3  ;;  %437 = vmatpush1.bf16.msra.mxu0 %v1418_v6  ;;  %vm1745_vm12 = vmpackc.low %vm1641_vm3, %vm1491_vm10 }
  0x1e   : > { %vm1637_vm2 = vcmp.le.s32.totalorder %v379_v15, 14  ;;  %vm1672_vm6 = vcmp.ge.s32.totalorder %v379_v15, 1  ;;  %vm1780_vm15 = vmpackc.low %vm1668_vm4, %vm1763_vm14 }
  0x1f   : > { %1296 = vrot.lane.b32.xlu1 %v1295_v7, %s1486_s22  ;;  %vm1733_vm11 = vmpackc.low %vm1637_vm2, %vm1491_vm10 }
  0x20   : > { %1155 = vmatmul.mubr.msk.bf16.vlgmr.msra.gmra.mxu0 %vm1937_vm0, %v400_v8  ;;  %vm1754_vm13 = vmpackc.low %vm1672_vm6, %vm1491_vm10 }
  0x21   : > { %737 = vmatprep.mubr.bf16.mxu0 %v1485_v1  ;;  %vm1811_vm10 = vmpackc.low %vm1763_vm14, %vm1763_vm14 }
  0x91   : > { %v1297_v12 = vpop.permute.xlu1 %1296 }
  0x92   : > { %v1299_v17 = vunpack.i.h.bf16 %v1297_v12  ;;  %v1298_v18 = vunpack.i.l.bf16 %v1297_v12 }
  0x93   : > { %v406_v13 = vpop.permute.xlu0 %405 }
  0x94   : > { %v1648_v26 = vsel %vm484_vm1, %v1299_v17, 0.0  ;;  %v1651_v27 = vsel %vm484_vm1, %v1298_v18, %v1299_v17 }
  0x95   : > { %v580_v29 = vsel %vm1637_vm2, %v1648_v26, 0.0  ;;  %v579_v30 = vsel %vm1641_vm3, %v1651_v27, 0.0 }
  0x96   : > { %v1310_v31 = vpack.i.bf16 %v580_v29, %v579_v30 }
  0xe0   : > { %v456_v14 = vpop.f32.mrf.mxu0 }
  0xe1   : > { %v1633_v20 = vadd.f32 %v456_v14, %v406_v13 }
  0xe2   : > { %v458_v19 = vpop.f32.mrf.mxu0 }
  0xe3   : > { %v1635_v21 = vadd.f32 %v458_v19, %v406_v13 }
  0xe4   : > { %v460_v22 = vpop.f32.mrf.mxu0 }
  0xe5   : > { %v1300_v25 = vpack.i.bf16 %v1635_v21, %v1633_v20 }
  0xe6   : > { %v461_v28 = vpop.f32.mrf.mxu0 }
  0xe7   : > { %1301 = vrot.lane.b32.xlu1 %v1300_v25, %s1487_s25  ;;  %1291 = vrot.lane.b32.xlu0 %v1300_v25, %s1486_s22 }
  0xeb   : > { %1306 = vrot.lane.b32.xlu0 %v1295_v7, %s1487_s25 }
  0xef   : > { %1311 = vrot.lane.b32.xlu0 %v1310_v31, %s1488_s26 }
  0xf3   : > { %1321 = vrot.lane.b32.xlu0 %v1295_v7, %s1488_s26 }
  0xf7   : > { %1326 = vrot.lane.b32.xlu0 %v1300_v25, %s1488_s26 }
  0xfb   : > { %1331 = vrot.lane.b32.xlu0 %v1310_v31, %s1489_s27  ;;  %v1161_v31 = vpack.c.bf16 %v1648_v26, %v399_v4 }
  0xff   : > { %1336 = vrot.lane.b32.xlu0 %v1300_v25, %s1489_s27 }
 0x103   : > { %1366 = vrot.lane.b32.xlu0 %v1295_v7, %s1489_s27  ;;  %v1490_v7 = vmov 1  }
 0x104   : > { %1370 = vset.pattern.permute.xlu1 %v1490_v7 }
 0x159   : > { %v1292_v32 = vpop.permute.xlu0 %1291  ;;  %v1302_v33 = vpop.permute.xlu1 %1301 }
 0x15a   : > { %v1294_v34 = vunpack.i.h.bf16 %v1292_v32  ;;  %v1293_v35 = vunpack.i.l.bf16 %v1292_v32  ;;  %v1304_v40 = vunpack.i.h.bf16 %v1302_v33  ;;  %v1303_v41 = vunpack.i.l.bf16 %v1302_v33 }
 0x15c   : > { %v1677_v43 = vsel %vm484_vm1, %v1294_v34, 0.0  ;;  %v1686_v46 = vsel %vm484_vm1, %v1293_v35, %v1294_v34  ;;  %v1701_v55 = vsel %vm469_vm5, 0.0, %v1303_v41  ;;  %v1705_v56 = vsel %vm469_vm5, %v1303_v41, %v1304_v40  ;;  %v861_v35 = vld [vmem:[%s1932_s5] sm:$0xf] }
 0x15d   : > { %v1307_v36 = vpop.permute.xlu0 %1306  ;;  %v494_v53 = vsel %vm1637_vm2, %v1677_v43, 0.0  ;;  %v493_v54 = vsel %vm1641_vm3, %v1686_v46, 0.0  ;;  %v478_v62 = vsel %vm1668_vm4, %v1701_v55, 0.0  ;;  %v479_v63 = vsel %vm1672_vm6, %v1705_v56, 0.0 }
 0x15e   : > { %v1309_v38 = vunpack.i.h.bf16 %v1307_v36  ;;  %v1308_v39 = vunpack.i.l.bf16 %v1307_v36  ;;  %v1340_v61 = vpack.i.bf16 %v494_v53, %v493_v54  ;;  %v1345_v6 = vpack.i.bf16 %v479_v63, %v478_v62 }
 0x15f   : > { %v1164_v40 = vpack.c.bf16 %v1651_v27, %v398_v3  ;;  %v1184_v62 = vpack.c.bf16 %v1677_v43, %v1635_v21 }
 0x160   : > { %v1680_v44 = vsel %vm469_vm5, 0.0, %v1308_v39  ;;  %v1683_v45 = vsel %vm469_vm5, %v1308_v39, %v1309_v38 }
 0x161   : > { %v569_v47 = vsel %vm1668_vm4, %v1680_v44, 0.0  ;;  %v1312_v48 = vpop.permute.xlu0 %1311  ;;  %v570_v49 = vsel %vm1672_vm6, %v1683_v45, 0.0 }
 0x162   : > { %v1314_v50 = vunpack.i.h.bf16 %v1312_v48  ;;  %v1313_v51 = vunpack.i.l.bf16 %v1312_v48  ;;  %v1315_v52 = vpack.i.bf16 %v570_v49, %v569_v47 }
 0x164   : > { %1316 = vrot.lane.b32.xlu1 %v1315_v52, %s1488_s26  ;;  %v632_v57 = vsel %vm535_vm7, %v1314_v50, 0.0  ;;  %v623_v58 = vsel %vm535_vm7, %v1313_v51, %v1314_v50 }
 0x165   : > { %v643_v59 = vpack.c.bf16 %v632_v57, %v632_v57  ;;  %v642_v60 = vpack.c.bf16 %v623_v58, %v623_v58  ;;  %v1322_v8 = vpop.permute.xlu0 %1321 }
 0x166   : > { %v1324_v10 = vunpack.i.h.bf16 %v1322_v8  ;;  %v1323_v11 = vunpack.i.l.bf16 %v1322_v8 }
 0x167   : > { %1156 = vmatprep.subr.msk.bf16.mxu1 %vm648_vm8, %v643_v59  ;;  %v650_v5 = vsel %vm648_vm8, %v642_v60, 0 }
 0x168   : > { %1341 = vrot.lane.b32.xlu1 %v1340_v61, %s1488_s26  ;;  %662 = vmatpush1.bf16.msra.mxu1 %v650_v5  ;;  %v622_v16 = vsel %vm535_vm7, %v1323_v11, %v1324_v10 }
 0x169   : > { %v1327_v9 = vpop.permute.xlu0 %1326 }
 0x16a   : > { %v1329_v36 = vunpack.i.h.bf16 %v1327_v9  ;;  %v1328_v38 = vunpack.i.l.bf16 %v1327_v9 }
 0x16c   : > { %1346 = vrot.lane.b32.xlu1 %v1345_v6, %s1488_s26  ;;  %v537_v3 = vsel %vm535_vm7, %v1328_v38, %v1329_v36 }
 0x16d   : > { %v1332_v12 = vpop.permute.xlu0 %1331 }
 0x16e   : > { %v1334_v17 = vunpack.i.h.bf16 %v1332_v12  ;;  %v1333_v18 = vunpack.i.l.bf16 %v1332_v12 }
 0x170   : > { %1351 = vrot.lane.b32.xlu1 %v1340_v61, %s1489_s27  ;;  %v599_v34 = vsel %vm1937_vm0, %v1333_v18, %v1334_v17  ;;  %v1171_v57 = vpack.c.bf16 %v1680_v44, %v1333_v18  ;;  %v1187_v44 = vpack.c.bf16 %v1686_v46, %v1633_v20 }
 0x171   : > { %v1167_v50 = vpack.c.bf16 %v1683_v45, %v599_v34  ;;  %v1337_v53 = vpop.permute.xlu0 %1336 }
 0x172   : > { %v1338_v7 = vunpack.i.l.bf16 %v1337_v53 }
 0x174   : > { %1356 = vrot.lane.b32.xlu1 %v1345_v6, %s1489_s27  ;;  %v1339_v6 = vunpack.i.h.bf16 %v1337_v53 }
 0x175   : > { %v1367_v63 = vpop.permute.xlu0 %1366 }
 0x176   : > { %v1369_v11 = vunpack.i.h.bf16 %v1367_v63  ;;  %v1368_v21 = vunpack.i.l.bf16 %v1367_v63  ;;  %v512_v20 = vsel %vm1937_vm0, %v1338_v7, %v1339_v6 }
 0x178   : > { %1361 = vrot.lane.b32.xlu1 %v1315_v52, %s1489_s27 }
 0x17c   : > { %747 = vperm.xlu1 %1370, %v1600_v0  }
 0x1d6   : > { %v1317_v13 = vpop.permute.xlu1 %1316 }
 0x1d7   : > { %v1319_v14 = vunpack.i.h.bf16 %v1317_v13  ;;  %v1318_v15 = vunpack.i.l.bf16 %v1317_v13 }
 0x1d9   : > { %v1158_v22 = vpack.c.bf16 %v1324_v10, %v1319_v14  ;;  %v621_v25 = vsel %vm535_vm7, %v1318_v15, %v1319_v14 }
 0x1da   : > { %v1342_v28 = vpop.permute.xlu1 %1341  ;;  %v640_v29 = vpack.c.bf16 %v622_v16, %v621_v25  ;;  %v598_v16 = vsel %vm1937_vm0, %v1368_v21, %v1369_v11 }
 0x1db   : > { %v1344_v32 = vunpack.i.h.bf16 %v1342_v28  ;;  %v1343_v33 = vunpack.i.l.bf16 %v1342_v28  ;;  %1159 = vmatprep.subr.msk.bf16.mxu1 %vm1726_vm9, %v1158_v22  ;;  %v633_v28 = vld [vmem:[%s1931_s4] sm:$0xf] }
 0x1dc   : > { %664 = vmatpush1.bf16.msra.mxu1 %v640_v29  ;;  %v548_v29 = vld [vmem:[%s1930_s3] sm:$0xf] }
 0x1dd   : > { %v547_v39 = vsel %vm535_vm7, %v1344_v32, 0.0  ;;  %1162 = vmatprep.subr.msk.bf16.mxu1 %vm1733_vm11, %v1161_v31  ;;  %v538_v26 = vsel %vm535_vm7, %v1343_v33, %v1344_v32 }
 0x1de   : > { %v558_v41 = vpack.c.bf16 %v547_v39, %v547_v39  ;;  %v1347_v47 = vpop.permute.xlu1 %1346  ;;  %v557_v48 = vpack.c.bf16 %v538_v26, %v538_v26 }
 0x1df   : > { %v1349_v51 = vunpack.i.h.bf16 %v1347_v47  ;;  %v1348_v52 = vunpack.i.l.bf16 %v1347_v47 }
 0x1e0   : > { %1165 = vmatpush1.bf16.msk.msra.mxu1 %vm1745_vm12, %v1164_v40  ;;  %1179 = vmatprep.subr.msk.bf16.mxu0 %vm648_vm8, %v558_v41  ;;  %v700_v2 = vsel %vm648_vm8, %v557_v48, 0 }
 0x1e1   : > { %v1181_v27 = vpack.c.bf16 %v1329_v36, %v1349_v51  ;;  %v536_v54 = vsel %vm535_vm7, %v1348_v52, %v1349_v51  ;;  %1168 = vmatprep.subr.msk.bf16.mxu1 %vm1754_vm13, %v1167_v50  ;;  %712 = vmatpush1.bf16.msra.mxu0 %v700_v2  ;;  %v1492_v2 = vmov 2  }
 0x1e2   : > { %v555_v58 = vpack.c.bf16 %v537_v3, %v536_v54  ;;  %v1352_v59 = vpop.permute.xlu1 %1351  ;;  %1371 = vset.pattern.permute.xlu0 %v1492_v2  ;;  %v1493_v3 = vmov 3  }
 0x1e3   : > { %v1354_v60 = vunpack.i.h.bf16 %v1352_v59  ;;  %v1353_v61 = vunpack.i.l.bf16 %v1352_v59  ;;  %1182 = vmatprep.subr.msk.bf16.mxu0 %vm1726_vm9, %v1181_v27  ;;  %1372 = vset.pattern.permute.xlu1 %v1493_v3 }
 0x1e4   : > { %1172 = vmatpush1.bf16.msk.msra.mxu1 %vm1780_vm15, %v1171_v57 }
 0x1e5   : > { %v513_v5 = vsel %vm1937_vm0, %v1353_v61, %v1354_v60  ;;  %714 = vmatpush1.bf16.msra.mxu0 %v555_v58  ;;  %v1194_v46 = vpack.c.bf16 %v1701_v55, %v1353_v61 }
 0x1e6   : > { %v1357_v8 = vpop.permute.xlu1 %1356  ;;  %1185 = vmatprep.subr.msk.bf16.mxu0 %vm1733_vm11, %v1184_v62  ;;  %v1190_v43 = vpack.c.bf16 %v1705_v56, %v513_v5 }
 0x1e7   : > { %v1359_v9 = vunpack.i.h.bf16 %v1357_v8  ;;  %v1358_v10 = vunpack.i.l.bf16 %v1357_v8 }
 0x1e9   : > { %1188 = vmatpush1.bf16.msk.msra.mxu0 %vm1745_vm12, %v1187_v44  ;;  %v511_v12 = vsel %vm1937_vm0, %v1358_v10, %v1359_v9  ;;  %v1199_v55 = vpack.c.bf16 %v1338_v7, %v1358_v10 }
 0x1ea   : > { %v1362_v13 = vpop.permute.xlu1 %1361  ;;  %1191 = vmatprep.subr.msk.bf16.mxu0 %vm1754_vm13, %v1190_v43  ;;  %v550_v17 = vpack.c.bf16 %v512_v20, %v511_v12 }
 0x1eb   : > { %v1364_v14 = vunpack.i.h.bf16 %v1362_v13  ;;  %v1363_v15 = vunpack.i.l.bf16 %v1362_v13 }
 0x1ed   : > { %1195 = vmatpush1.bf16.msk.msra.mxu0 %vm1780_vm15, %v1194_v46  ;;  %v597_v56 = vsel %vm1937_vm0, %v1363_v15, %v1364_v14  ;;  %v1176_v25 = vpack.c.bf16 %v1368_v21, %v1363_v15  ;;  %vm1938_vm0 = vcmask 588800  }
 0x1ee   : > { %719 = vmatprep.subr.bf16.mxu0 %v550_v17  ;;  %v635_v18 = vpack.c.bf16 %v598_v16, %v597_v56 }
 0x1f0   : > { %669 = vmatprep.subr.bf16.mxu1 %v635_v18 }
 0x1f1   : > { %1177 = vmatpush1.bf16.msk.msra.mxu1 %vm1811_vm10, %v1176_v25  ;;  %1200 = vmatpush1.bf16.msk.msra.mxu0 %vm1811_vm10, %v1199_v55 }
 0x1f4   : > { %1178 = vmatmul.mubr.msk.bf16.vlgmr.msra.gmra.mxu1 %vm1938_vm0, %v633_v28  ;;  %1201 = vmatmul.mubr.msk.bf16.vlgmr.msra.gmra.mxu0 %vm1938_vm0, %v548_v29 }
 0x1f5   : > { %917 = vmatprep.mubr.bf16.mxu1 %v1485_v1  ;;  %1012 = vmatprep.mubr.bf16.mxu0 %v1485_v1 }
 0x1f7   : > { %v748_v31 = vpop.permute.xlu1 %747 }
 0x2b4   : > { %v689_v32 = vpop.f32.mrf.mxu1  ;;  %v739_v33 = vpop.f32.mrf.mxu0 }
 0x2b5   : > { %v740_v34 = vadd.f32 %v739_v33, %v689_v32 }
 0x2b6   : > { %v691_v36 = vpop.f32.mrf.mxu1  ;;  %v741_v38 = vpop.f32.mrf.mxu0 }
 0x2b7   : > { %v750_v39 = vadd.f32 %v748_v31, %v740_v34  ;;  %v742_v26 = vadd.f32 %v741_v38, %v691_v36 }
 0x2b8   : > { %v693_v40 = vpop.f32.mrf.mxu1  ;;  %v743_v41 = vpop.f32.mrf.mxu0 }
 0x2b9   : > { %v754_v47 = vmul.f32 0.01, %v750_v39  ;;  %v751_v48 = vadd.f32 %v748_v31, %v742_v26  ;;  %vm752_vm14 = vcmp.ge.f32.partialorder %v750_v39, 0.0 }
 0x2ba   : > { %v694_v49 = vpop.f32.mrf.mxu1  ;;  %v744_v50 = vpop.f32.mrf.mxu0 }
 0x2bb   : > { %vm753_vm0 = vcmp.ge.f32.partialorder %v751_v48, 0.0  ;;  %v755_v51 = vmul.f32 0.01, %v751_v48  ;;  %v756_v52 = vsel %vm752_vm14, %v750_v39, %v754_v47 }
 0x2bd   : > { %v757_v53 = vsel %vm753_vm0, %v751_v48, %v755_v51  ;;  %vm1968_vm0 = vcmask 130048  }
 0x2be   : > { %v758_v1 = vadd.f32 %v757_v53, %v756_v52 }
 0x2c0   : > { %759 = vadd.xlane.f32.xlu0 %v758_v1 }
 0x2d6   : > { %776 = vperm.xlu0 %1371, %v1600_v0  }
 0x2da   : > { %1413 = vset.pattern.permute.xlu0 %v1494_v24 }
 0x349   : > { %v760_v27 = vpop.xlane.xlu0 %759 }
 0x34a   : > { %v762_v54 = vmul.f32 0.00390625, %v760_v27 }
 0x34c   : > { %v763_v57 = vsub.f32 %v756_v52, %v762_v54  ;;  %v764_v58 = vsub.f32 %v757_v53, %v762_v54 }
 0x34e   : > { %v765_v59 = vmul.f32 %v763_v57, %v763_v57  ;;  %v766_v60 = vmul.f32 %v764_v58, %v764_v58 }
 0x350   : > { %v767_v61 = vadd.f32 %v766_v60, %v765_v59 }
 0x351   : > { %v777_v6 = vpop.permute.xlu0 %776 }
 0x352   : > { %768 = vadd.xlane.f32.xlu1 %v767_v61 }
 0x363   : > { %782 = vperm.xlu1 %1372, %v1600_v0  }
 0x3db   : > { %v769_v62 = vpop.xlane.xlu1 %768 }
 0x3dc   : > { %v770_v63 = vmul.f32 0.00390625, %v769_v62 }
 0x3de   : > { %v771_v5 = vadd.f32 1e-05, %v770_v63 }
 0x3df   : > { %v783_v9 = vpop.permute.xlu1 %782 }
 0x3e0   : > { %1419 = vrsqrt.f32 %v771_v5 }
 0x3ed   : > { %v1420_v44 = vpop.eup %1419 }
 0x3ee   : > { %v773_v7 = vmul.f32 %v1420_v44, %v763_v57  ;;  %v774_v8 = vmul.f32 %v1420_v44, %v764_v58 }
 0x3f0   : > { %v779_v10 = vmul.f32 %v777_v6, %v773_v7  ;;  %v780_v11 = vmul.f32 %v777_v6, %v774_v8 }
 0x3f2   : > { %v1831_v21 = vadd.f32 %v783_v9, %v779_v10  ;;  %v786_v43 = vadd.f32 %v783_v9, %v780_v11 }
 0x3f4   : > { %v1373_v12 = vpack.i.bf16 %v786_v43, %v1831_v21 }
 0x3f6   : > { %1374 = vrot.lane.b32.xlu1 %v1373_v12, %s1486_s22  ;;  %s339_s22 = sand.u32 1, %s1475_s10  }
 0x3f7   : > { %s1024_s24 = scalar_lea.sflag [#allocation3], %s339_s22 }
 0x3fa   : > { %1379 = vrot.lane.b32.xlu1 %v1373_v12, %s1487_s25  ;;  %s1146_s25 = sshll.u32 %s339_s22, 3 }
 0x468   : > { %v1375_v13 = vpop.permute.xlu1 %1374 }
 0x469   : > { %v1377_v20 = vunpack.i.h.bf16 %v1375_v13  ;;  %v1376_v46 = vunpack.i.l.bf16 %v1375_v13 }
 0x46b   : > { %v806_v14 = vsel %vm484_vm1, %v1377_v20, 0.0  ;;  %v803_v15 = vsel %vm484_vm1, %v1376_v46, %v1377_v20  ;;  %vm1969_vm1 = vmmov %vm1968_vm0 }
 0x46c   : > { %v808_v16 = vsel %vm1637_vm2, %v806_v14, 0.0  ;;  %v1380_v17 = vpop.permute.xlu1 %1379  ;;  %v807_v56 = vsel %vm1641_vm3, %v803_v15, 0.0  ;;  %v1207_v27 = vpack.c.bf16 %v806_v14, %v786_v43  ;;  %v1210_v61 = vpack.c.bf16 %v803_v15, %v1831_v21  ;;  %vm1970_vm2 = vmmov %vm1968_vm0 }
 0x46d   : > { %v1382_v18 = vunpack.i.h.bf16 %v1380_v17  ;;  %v1381_v55 = vunpack.i.l.bf16 %v1380_v17  ;;  %v1383_v25 = vpack.i.bf16 %v808_v16, %v807_v56  ;;  %vm1971_vm3 = vcmask 588800  }
 0x46e   : > { %v1495_v14 = vmov 5   ;;  %v1496_v15 = vmov 6  }
 0x46f   : > { %v796_v28 = vsel %vm469_vm5, 0.0, %v1381_v55  ;;  %1384 = vrot.lane.b32.xlu1 %v1383_v25, %s1488_s26  ;;  %v793_v29 = vsel %vm469_vm5, %v1381_v55, %v1382_v18 }
 0x470   : > { %v797_v31 = vsel %vm1668_vm4, %v796_v28, 0.0  ;;  %v798_v23 = vsel %vm1672_vm6, %v793_v29, 0.0  ;;  %1414 = vset.pattern.permute.xlu1 %v1495_v14  ;;  %vm970_vm6 = vcmask 64512  }
 0x471   : > { %v1403_v32 = vpack.i.bf16 %v798_v23, %v797_v31 }
 0x473   : > { %1404 = vrot.lane.b32.xlu0 %v1403_v32, %s1489_s27  ;;  %1389 = vrot.lane.b32.xlu1 %v1403_v32, %s1488_s26 }
 0x477   : > { %1394 = vrot.lane.b32.xlu1 %v1373_v12, %s1488_s26  ;;  %873 = vperm.xlu0 %1413, %v1600_v0   ;;  %s341_s26 = scalar_lea.vmem [#allocation2], %s1146_s25  ;;  %s1497_s25 = smov [#allocation2]  }
 0x478   : > { %s1043_s21 = sshll.u32 %s341_s26, 4  ;;  %s1427_s1 = sshll.u32 %s1497_s25, 4  ;;  %s1044_s21 = int_to_ptr.vmem [resolvable:$true] %s1043_s21  ;;  %s1428_s1 = int_to_ptr.vmem [resolvable:$false] %s1427_s1 }
 0x479   : > { %s1423_s0 = scalar_lea.vmem %s1044_s21, 128  ;;  %p1430_p0 = scmp.lt.s32.totalorder %s1044_s21, %s1428_s1 }
 0x47a   : > { %p1424_p11 = scmp.ne.s32.totalorder %s1044_s21, %s1423_s0 }
 0x47b   : > { %1399 = vrot.lane.b32.xlu1 %v1383_v25, %s1489_s27  ;;  %1415 = vset.pattern.permute.xlu0 %v1496_v15 }
 0x47c   : > { %p1425_p12 = pnand %p1424_p11, %p1586_p5 }
 0x47e   : > { %p1426_p13 = pneg %p1425_p12 }
 0x47f   : > { %1409 = vrot.lane.b32.xlu1 %v1373_v12, %s1489_s27  ;;  %s1429_s27 = scalar_lea.vmem %s1428_s1, 256 }
 0x480   : > { %p1431_p1 = scmp.lt.s32.totalorder %s1429_s27, %s1423_s0 }
 0x482   : > { %p1432_p2 = por %p1431_p1, %p1430_p0 }
 0x484   : > { %p1433_p3 = pnand %p1432_p2, %p1426_p13 }
 0x4e1   : > { %v1385_v37 = vpop.permute.xlu1 %1384 }
 0x4e2   : > { %v1387_v33 = vunpack.i.h.bf16 %v1385_v37  ;;  %v1386_v34 = vunpack.i.l.bf16 %v1385_v37 }
 0x4e4   : > { %v860_v42 = vsel %vm535_vm7, %v1387_v33, 0.0  ;;  %v851_v36 = vsel %vm535_vm7, %v1386_v34, %v1387_v33 }
 0x4e5   : > { %v871_v38 = vpack.c.bf16 %v860_v42, %v860_v42  ;;  %v1390_v39 = vpop.permute.xlu1 %1389  ;;  %v870_v26 = vpack.c.bf16 %v851_v36, %v851_v36  ;;  %v1405_v1 = vpop.permute.xlu0 %1404 }
 0x4e6   : > { %v1392_v41 = vunpack.i.h.bf16 %v1390_v39  ;;  %v1391_v47 = vunpack.i.l.bf16 %v1390_v39  ;;  %v1407_v58 = vunpack.i.h.bf16 %v1405_v1  ;;  %v1406_v59 = vunpack.i.l.bf16 %v1405_v1 }
 0x4e7   : > { %1202 = vmatprep.subr.msk.bf16.mxu1 %vm648_vm8, %v871_v38  ;;  %v880_v40 = vsel %vm648_vm8, %v870_v26, 0 }
 0x4e8   : > { %892 = vmatpush1.bf16.msra.mxu1 %v880_v40  ;;  %v849_v51 = vsel %vm535_vm7, %v1391_v47, %v1392_v41  ;;  %v825_v19 = vsel %vm1969_vm1, %v1406_v59, %v1407_v58  ;;  %v969_v47 = vld [vmem:[%s1933_s6] sm:$0xf] }
 0x4e9   : > { %v1395_v48 = vpop.permute.xlu1 %1394 }
 0x4ea   : > { %v1397_v49 = vunpack.i.h.bf16 %v1395_v48  ;;  %v1396_v50 = vunpack.i.l.bf16 %v1395_v48 }
 0x4ec   : > { %v850_v52 = vsel %vm535_vm7, %v1396_v50, %v1397_v49  ;;  %v1204_v53 = vpack.c.bf16 %v1397_v49, %v1392_v41 }
 0x4ed   : > { %v868_v2 = vpack.c.bf16 %v850_v52, %v849_v51  ;;  %v1400_v3 = vpop.permute.xlu1 %1399 }
 0x4ee   : > { %v1402_v54 = vunpack.i.h.bf16 %v1400_v3  ;;  %v1401_v57 = vunpack.i.l.bf16 %v1400_v3  ;;  %1205 = vmatprep.subr.msk.bf16.mxu1 %vm1726_vm9, %v1204_v53 }
 0x4ef   : > { %894 = vmatpush1.bf16.msra.mxu1 %v868_v2 }
 0x4f0   : > { %v827_v60 = vsel %vm1968_vm0, %v1401_v57, %v1402_v54  ;;  %1208 = vmatprep.subr.msk.bf16.mxu1 %vm1733_vm11, %v1207_v27  ;;  %v1217_v7 = vpack.c.bf16 %v796_v28, %v1401_v57 }
 0x4f1   : > { %v1213_v62 = vpack.c.bf16 %v793_v29, %v827_v60  ;;  %v1410_v63 = vpop.permute.xlu1 %1409 }
 0x4f2   : > { %v1412_v5 = vunpack.i.h.bf16 %v1410_v63  ;;  %v1411_v44 = vunpack.i.l.bf16 %v1410_v63  ;;  %v874_v4 = vpop.permute.xlu0 %873 }
 0x4f3   : > { %1211 = vmatpush1.bf16.msk.msra.mxu1 %vm1745_vm12, %v1210_v61 }
 0x4f4   : > { %1214 = vmatprep.subr.msk.bf16.mxu1 %vm1754_vm13, %v1213_v62  ;;  %v826_v6 = vsel %vm1970_vm2, %v1411_v44, %v1412_v5  ;;  %v1222_v30 = vpack.c.bf16 %v1411_v44, %v1406_v59 }
 0x4f5   : > { %v863_v8 = vpack.c.bf16 %v826_v6, %v825_v19 }
 0x4f7   : > { %1218 = vmatpush1.bf16.msk.msra.mxu1 %vm1780_vm15, %v1217_v7 }
 0x4f8   : > { %899 = vmatprep.subr.bf16.mxu1 %v863_v8 }
 0x4fb   : > { %1223 = vmatpush1.bf16.msk.msra.mxu1 %vm1811_vm10, %v1222_v30 }
 0x4fe   : > { %1224 = vmatmul.mubr.msk.bf16.vlgmr.msra.gmra.mxu1 %vm1971_vm3, %v861_v35 }
 0x5be   : > { %v919_v9 = vpop.f32.mrf.mxu1 }
 0x5bf   : > { %v920_v10 = vadd.f32 %v919_v9, %v874_v4 }
 0x5c0   : > { %v921_v11 = vpop.f32.mrf.mxu1 }
 0x5c1   : > { %v928_v21 = vmul.f32 0.01, %v920_v10  ;;  %v922_v43 = vadd.f32 %v921_v11, %v874_v4  ;;  %vm926_vm4 = vcmp.ge.f32.partialorder %v920_v10, 0.0 }
 0x5c2   : > { %v923_v12 = vpop.f32.mrf.mxu1 }
 0x5c3   : > { %v929_v45 = vmul.f32 0.01, %v922_v43  ;;  %vm927_vm5 = vcmp.ge.f32.partialorder %v922_v43, 0.0  ;;  %v930_v20 = vsel %vm926_vm4, %v920_v10, %v928_v21 }
 0x5c4   : > { %v924_v13 = vpop.f32.mrf.mxu1 }
 0x5c5   : > { %v931_v22 = vsel %vm927_vm5, %v922_v43, %v929_v45 }
 0x5c6   : > { %v932_v46 = vadd.f32 %v931_v22, %v930_v20 }
 0x5c8   : > { %933 = vadd.xlane.f32.xlu1 %v932_v46 }
 0x5d9   : > { %949 = vperm.xlu1 %1414, %v1600_v0  }
 0x651   : > { %v934_v16 = vpop.xlane.xlu1 %933 }
 0x652   : > { %v935_v17 = vmul.f32 0.00390625, %v934_v16 }
 0x654   : > { %v936_v56 = vsub.f32 %v930_v20, %v935_v17  ;;  %v937_v18 = vsub.f32 %v931_v22, %v935_v17 }
 0x655   : > { %v950_v24 = vpop.permute.xlu1 %949 }
 0x656   : > { %v938_v55 = vmul.f32 %v936_v56, %v936_v56  ;;  %v939_v25 = vmul.f32 %v937_v18, %v937_v18 }
 0x658   : > { %v940_v28 = vadd.f32 %v939_v25, %v938_v55 }
 0x65a   : > { %941 = vadd.xlane.f32.xlu0 %v940_v28 }
 0x670   : > { %955 = vperm.xlu0 %1415, %v1600_v0  }
 0x6e3   : > { %v942_v29 = vpop.xlane.xlu0 %941 }
 0x6e4   : > { %v943_v31 = vmul.f32 0.00390625, %v942_v29 }
 0x6e6   : > { %v944_v23 = vadd.f32 1e-05, %v943_v31 }
 0x6e8   : > { %1421 = vrsqrt.f32 %v944_v23 }
 0x6eb   : > { %v956_v34 = vpop.permute.xlu0 %955 }
 0x6f5   : > { %v1422_v32 = vpop.eup %1421 }
 0x6f6   : > { %v946_v37 = vmul.f32 %v1422_v32, %v936_v56  ;;  %v947_v33 = vmul.f32 %v1422_v32, %v937_v18 }
 0x6f8   : > { %v952_v42 = vmul.f32 %v950_v24, %v946_v37  ;;  %v953_v36 = vmul.f32 %v950_v24, %v947_v33 }
 0x6fa   : > { %v958_v38 = vadd.f32 %v956_v34, %v952_v42  ;;  %v959_v39 = vadd.f32 %v956_v34, %v953_v36 }
 0x6fc   : > { %v960_v26 = vpack.c.bf16 %v958_v38, %v958_v38  ;;  %v961_v40 = vpack.c.bf16 %v959_v39, %v959_v39  ;;  %v1236_v41 = vpack.c.bf16 %v959_v39, %v958_v38 }
 0x6fe   : > { %1226 = vmatprep.subr.msk.bf16.mxu0 %vm648_vm8, %v961_v40  ;;  %v975_v0 = vsel %vm648_vm8, %v960_v26, 0  ;;  %968 = vst [vmem:[%s341_s26] sm:$0xff] %v1236_v41 }
 0x6ff   : > { %995 = vmatpush1.bf16.msra.mxu0 %v975_v0 }
 0x702   : > { %1227 = vmatmul.mubr.msk.bf16.vlgmr.msra.gmra.mxu0 %vm970_vm6, %v969_v47 }
 0x703   : > { %1436 = shalt.err (!%p1433_p3)
}
 0x704   : > { %s1437_s13 = scalar_lea.hbm %s1041_s17, 128  ;;  %s1441_s28 = scalar_lea.hbm %s1935_s8, 256 }
 0x705   : > { %p1438_p4 = scmp.ne.s32.totalorder %s1041_s17, %s1437_s13  ;;  %p1442_p9 = scmp.lt.s32.totalorder %s1041_s17, %s1935_s8 }
 0x706   : > { %p1443_p10 = scmp.lt.s32.totalorder %s1441_s28, %s1437_s13 }
 0x707   : > { %p1439_p7 = pnand %p1438_p4, %p1586_p5 }
 0x708   : > { %p1444_p11 = por %p1443_p10, %p1442_p9 }
 0x709   : > { %p1440_p8 = pneg %p1439_p7 }
 0x70b   : > { %p1445_p12 = pnand %p1444_p11, %p1440_p8 }
 0x70d   : > { %1448 = shalt.err (!%p1445_p12)
}
 0x70e   : > { %1238 = dma.vmem_to_hbm [thread:$0]  (%p1586_p5), %s1044_s21, 128, %s1041_s17, %s1024_s24  }
 0x70f   : > { %s1972_s0 = sshll.u32 %s1605_s23, 4 }
 0x710   : > { %s363_s25 = scalar_lea.vmem %s1936_s9, %s1972_s0 }
 0x7c2   : > { %v1014_v48 = vpop.f32.mrf.mxu0 }
 0x7c3   : > { %1021 = vst [vmem:[%s363_s25] sm:$0xff] %v1014_v48 }
 0x7c4   : > { %v1016_v49 = vpop.f32.mrf.mxu0 }
 0x7c5   : > { %1022 = vst [vmem:[%s363_s25 + $0x8] sm:$0xff] %v1016_v49 }
 0x7c6   : > { %v1018_v50 = vpop.f32.mrf.mxu0 }
 0x7c8   : > { %v1019_v51 = vpop.f32.mrf.mxu0 }
 0x7c9 PF: > { %p1244_p13 = scmp.ge.s32.totalorder %s1483_s12, 2  ;;  %s1058_s27 = sand.u32 1, %s1471_s30  }
 0x7ca   : > { %s1059_s19 = scalar_lea.sflag [#allocation3], %s1058_s27 }
 0x7cb   : > { %p1241_p0 = pnand %p1244_p13, %p1590_p6 }
 0x7cd   : > { %p1242_p5 = pneg %p1241_p0 }
 0x7cf   : > { %1466 = dma.done.wait (%p1242_p5), %s1059_s19, 128  }
 0x7d0   : > { %1468 = vsyncadd (%p1242_p5), %s1059_s19, 4294967168  ;;  %p20_p1 = scmp.ge.s32.totalorder %s1573_s15, 4   ;;  %s1973_s30 = smov %s1475_s10 }
 0x7d1   : > { %s1974_s10 = smov %s1479_s11  ;;  %s1975_s11 = smov %s1584_s18 }
 0x7d2   : > { %s1976_s12 = smov %s1573_s15  ;;  %22 = sbr.rel (!%p20_p1) target bundleno = 6 (0x6), region = 102 }
 0x7d7   :  { %1072 = vsyncpa [#allocation3], 1 }
 0x7d8   :  { %1074 = vsyncpa [#allocation3 + $0x1], 1 }

</bundles_post_ra>
